<compile_context>
chip_gen: v5e
topology: v5e:2x2
jax: 0.10.0
libtpu: 0.0.40
codegen_flags: <defaults>
</compile_context>

<pallas_src>
import functools

import jax
import jax.numpy as jnp
from jax.experimental import pallas as pl
from jax.experimental.pallas import tpu as pltpu


def _cbam_kernel(x_ref, w1t_ref, w2_ref, wsp_ref, o_ref,
                 pad_avg_ref, pad_max_ref, sa_flat_ref,
                 *, C, H, W, K, Bb):
    """x_ref/o_ref: (Bb, C, H*W) VMEM.  w1t_ref/w2_ref: (C, C_r) VMEM.
    wsp_ref: (2*K*K,) SMEM.  pad_*_ref: (H+2p, W+2p) VMEM scratch.
    sa_flat_ref: (1, H*W) VMEM scratch."""
    pad = (K - 1) // 2
    HW = H * W
    inv_hw = 1.0 / HW
    inv_c = 1.0 / C

    # Zero the padded pooled-map scratches once per invocation; the border
    # staying 0 reproduces PyTorch's zero padding of the pooled maps.
    pad_avg_ref[...] = jnp.zeros_like(pad_avg_ref)
    pad_max_ref[...] = jnp.zeros_like(pad_max_ref)

    w1t = w1t_ref[...]        # (C, C_r) == W1.T
    w2 = w2_ref[...]          # (C, C_r) == W2

    for b in range(Bb):
        x2 = x_ref[b]                                          # (C, HW) f32

        # ---------------- channel attention ----------------
        avg_c = jnp.sum(x2, axis=1, keepdims=True) * inv_hw    # (C, 1)
        max_c = jnp.max(x2, axis=1, keepdims=True)             # (C, 1)
        # hidden_j = relu(sum_c W1[j,c] * v_c)   (shared MLP on both paths)
        h_avg = jnp.maximum(jnp.sum(w1t * avg_c, axis=0, keepdims=True), 0.0)  # (1, C_r)
        h_max = jnp.maximum(jnp.sum(w1t * max_c, axis=0, keepdims=True), 0.0)  # (1, C_r)
        # out_c = sum_j W2[c,j] * hidden_j
        a_avg = jnp.sum(w2 * h_avg, axis=1, keepdims=True)     # (C, 1)
        a_max = jnp.sum(w2 * h_max, axis=1, keepdims=True)     # (C, 1)
        ca = jax.nn.sigmoid(a_avg + a_max)                     # (C, 1)
        x1 = x2 * ca                                           # (C, HW) lane-dense

        # ---------------- spatial attention ----------------
        avg_sp = jnp.sum(x1, axis=0, keepdims=True) * inv_c    # (1, HW)
        max_sp = jnp.max(x1, axis=0, keepdims=True)            # (1, HW)

        # Scatter the flat pooled maps into the interior of the padded 2-D maps.
        for h in range(H):
            pad_avg_ref[pad + h:pad + h + 1, pad:pad + W] = avg_sp[:, h * W:(h + 1) * W]
            pad_max_ref[pad + h:pad + h + 1, pad:pad + W] = max_sp[:, h * W:(h + 1) * W]

        # 7x7 "valid" conv on the padded maps.  Lane shifts hoisted (7 shifted
        # strips per map); 4 independent accumulators break the serial chain.
        accs = [jnp.zeros((H, W), jnp.float32) for _ in range(4)]
        n = 0
        for dj in range(K):
            strip_a = pad_avg_ref[:, dj:dj + W]                # (H+2p, W)
            strip_m = pad_max_ref[:, dj:dj + W]                # (H+2p, W)
            for di in range(K):
                w_a = wsp_ref[di * K + dj]                     # scalar tap (avg channel)
                w_m = wsp_ref[K * K + di * K + dj]             # scalar tap (max channel)
                accs[n % 4] = accs[n % 4] + w_a * strip_a[di:di + H, :]
                accs[(n + 1) % 4] = accs[(n + 1) % 4] + w_m * strip_m[di:di + H, :]
                n += 2
        sa2d = jax.nn.sigmoid((accs[0] + accs[1]) + (accs[2] + accs[3]))   # (H, W)

        # Flatten sa back to (1, HW) so the final multiply / store stay lane-dense.
        for h in range(H):
            sa_flat_ref[:, h * W:(h + 1) * W] = sa2d[h:h + 1, :]

        o_ref[b] = x1 * sa_flat_ref[...]                       # (C, HW)


def cbam_forward(x, w_fc1, w_fc2, w_spatial, *, block_b=1):
    """CBAM forward.
    x: (B, C, H, W) float32
    w_fc1: (C//ratio, C)   -- ChannelAttention.fc[0] 1x1-conv weight (squeezed)
    w_fc2: (C, C//ratio)   -- ChannelAttention.fc[2] 1x1-conv weight (squeezed)
    w_spatial: (1, 2, K, K) -- SpatialAttention.conv weight
    Returns (B, C, H, W) float32."""
    B, C, H, W = x.shape
    K = w_spatial.shape[-1]
    C_r = w_fc1.shape[0]
    assert w_fc1.shape == (C_r, C) and w_fc2.shape == (C, C_r)
    HW = H * W
    pad = (K - 1) // 2
    Hp, Wp = H + 2 * pad, W + 2 * pad

    if block_b < 1 or B % block_b != 0:
        block_b = 1
    grid = (B // block_b,)

    # Free, metadata-only reshape (no extra HBM pass, unlike padding x).
    x_flat = x.reshape(B, C, HW).astype(jnp.float32)
    w1t = jnp.transpose(w_fc1).astype(jnp.float32)            # (C, C_r)
    w2 = w_fc2.astype(jnp.float32)                            # (C, C_r)
    wsp_flat = w_spatial.reshape(-1).astype(jnp.float32)      # (2*K*K,)

    kernel = functools.partial(_cbam_kernel, C=C, H=H, W=W, K=K, Bb=block_b)

    out_flat = pl.pallas_call(
        kernel,
        out_shape=jax.ShapeDtypeStruct((B, C, HW), jnp.float32),
        grid=grid,
        in_specs=[
            pl.BlockSpec((block_b, C, HW), lambda i: (i, 0, 0)),
            pl.BlockSpec((C, C_r), lambda i: (0, 0)),
            pl.BlockSpec((C, C_r), lambda i: (0, 0)),
            pl.BlockSpec(memory_space=pltpu.MemorySpace.SMEM),
        ],
        out_specs=pl.BlockSpec((block_b, C, HW), lambda i: (i, 0, 0)),
        scratch_shapes=[
            pltpu.VMEM((Hp, Wp), jnp.float32),
            pltpu.VMEM((Hp, Wp), jnp.float32),
            pltpu.VMEM((1, HW), jnp.float32),
        ],
        compiler_params=pltpu.CompilerParams(
            dimension_semantics=("parallel",)),
    )(x_flat, w1t, w2, wsp_flat)

    return out_flat.reshape(B, C, H, W)


def _reference(x, w_fc1, w_fc2, w_spatial):
    """Pure-JAX CBAM reference (f32-exact)."""
    avg = jnp.mean(x, axis=(2, 3))             # (B, C)
    mx = jnp.max(x, axis=(2, 3))               # (B, C)

    def fc(v):                                  # (B, C) -> (B, C)
        h = jnp.maximum(jnp.einsum("bc,rc->br", v, w_fc1,
                                   precision=jax.lax.Precision.HIGHEST), 0.0)
        return jnp.einsum("br,cr->bc", h, w_fc2,
                          precision=jax.lax.Precision.HIGHEST)

    ca = jax.nn.sigmoid(fc(avg) + fc(mx))[:, :, None, None]
    x1 = x * ca
    avg_sp = jnp.mean(x1, axis=1, keepdims=True)
    max_sp = jnp.max(x1, axis=1, keepdims=True)
    cat = jnp.concatenate([avg_sp, max_sp], axis=1)
    conv = jax.lax.conv_general_dilated(
        cat, w_spatial, window_strides=(1, 1), padding="SAME",
        dimension_numbers=("NCHW", "OIHW", "NCHW"),
        precision=jax.lax.Precision.HIGHEST)
    sa = jax.nn.sigmoid(conv)
    return x1 * sa


if __name__ == "__main__":
    key = jax.random.PRNGKey(0)
    kx, k1, k2, k3 = jax.random.split(key, 4)

    # planes must be divisible by ratio=8 for ChannelAttention's bottleneck.
    B, C, H, W = 2, 16, 16, 16
    ratio, K = 8, 7
    C_r = C // ratio

    x = jax.random.normal(kx, (B, C, H, W), dtype=jnp.float32)
    w_fc1 = 0.3 * jax.random.normal(k1, (C_r, C), dtype=jnp.float32)
    w_fc2 = 0.3 * jax.random.normal(k2, (C, C_r), dtype=jnp.float32)
    w_spatial = 0.1 * jax.random.normal(k3, (1, 2, K, K), dtype=jnp.float32)

    out = cbam_forward(x, w_fc1, w_fc2, w_spatial, block_b=1)
    out = jax.block_until_ready(out)

    ref = _reference(x, w_fc1, w_fc2, w_spatial)
    assert out.shape == (B, C, H, W)
    err = float(jnp.max(jnp.abs(out - ref)))
    assert jnp.allclose(out, ref, rtol=1e-4, atol=1e-5), f"mismatch vs reference, max abs err={err:e}"

    print("KERNEL_OK")
</pallas_src>

<mosaic_0001>
module attributes {stable_mosaic.version = 11 : i64} {
  func.func @_cbam_kernel(%arg0: i32, %arg1: memref<1x16x256xf32, #tpu.memory_space<vmem>>, %arg2: memref<16x2xf32, #tpu.memory_space<vmem>>, %arg3: memref<16x2xf32, #tpu.memory_space<vmem>>, %arg4: memref<98xf32, #tpu.memory_space<smem>>, %arg5: memref<1x16x256xf32, #tpu.memory_space<vmem>>, %arg6: memref<22x22xf32, #tpu.memory_space<vmem>>, %arg7: memref<22x22xf32, #tpu.memory_space<vmem>>, %arg8: memref<1x256xf32, #tpu.memory_space<vmem>>) attributes {dimension_semantics = [#tpu.dimension_semantics<parallel>], iteration_bounds = array<i64: 2>, scalar_prefetch = 0 : i64, scratch_operands = 3 : i64, tpu.core_type = #tpu.core_type<tc>, window_params = [{transform_indices = @transform_0, window_bounds = array<i64: 1, 16, 256>}, {pipeline_mode = #tpu.pipeline_mode<synchronous>, transform_indices = @transform_1, window_bounds = array<i64: 16, 2>}, {pipeline_mode = #tpu.pipeline_mode<synchronous>, transform_indices = @transform_2, window_bounds = array<i64: 16, 2>}, {transform_indices = @transform_3, window_bounds = array<i64: 98>}, {transform_indices = @transform_4, window_bounds = array<i64: 1, 16, 256>}]} {
    %cst = arith.constant 0.000000e+00 : f32
    %0 = vector.broadcast %cst : f32 to vector<22x22xf32>
    %c0 = arith.constant 0 : index
    %c0_0 = arith.constant 0 : index
    %1 = vector.load %arg6[%c0, %c0_0] : memref<22x22xf32, #tpu.memory_space<vmem>>, vector<22x22xf32>
    tpu.vector_store %arg6[%c0, %c0_0], %0 {strides = array<i32>} : memref<22x22xf32, #tpu.memory_space<vmem>>, vector<22x22xf32>,
    %cst_1 = arith.constant 0.000000e+00 : f32
    %2 = vector.broadcast %cst_1 : f32 to vector<22x22xf32>
    %c0_2 = arith.constant 0 : index
    %c0_3 = arith.constant 0 : index
    %3 = vector.load %arg7[%c0_2, %c0_3] : memref<22x22xf32, #tpu.memory_space<vmem>>, vector<22x22xf32>
    tpu.vector_store %arg7[%c0_2, %c0_3], %2 {strides = array<i32>} : memref<22x22xf32, #tpu.memory_space<vmem>>, vector<22x22xf32>,
    %c0_4 = arith.constant 0 : index
    %c0_5 = arith.constant 0 : index
    %4 = vector.load %arg2[%c0_4, %c0_5] : memref<16x2xf32, #tpu.memory_space<vmem>>, vector<16x2xf32>
    %c0_6 = arith.constant 0 : index
    %c0_7 = arith.constant 0 : index
    %5 = vector.load %arg3[%c0_6, %c0_7] : memref<16x2xf32, #tpu.memory_space<vmem>>, vector<16x2xf32>
    %c0_8 = arith.constant 0 : index
    %c0_9 = arith.constant 0 : index
    %c0_10 = arith.constant 0 : index
    %6 = vector.load %arg1[%c0_8, %c0_9, %c0_10] : memref<1x16x256xf32, #tpu.memory_space<vmem>>, vector<1x16x256xf32>
    %7 = vector.shape_cast %6 : vector<1x16x256xf32> to vector<16x256xf32>
    %cst_11 = arith.constant dense<0.000000e+00> : vector<16xf32>
    %8 = vector.multi_reduction <add>, %7, %cst_11 [1] : vector<16x256xf32> to vector<16xf32>
    %9 = vector.shape_cast %8 : vector<16xf32> to vector<16x1xf32>
    %cst_12 = arith.constant 3.906250e-03 : f32
    %10 = vector.broadcast %cst_12 : f32 to vector<16x1xf32>
    %11 = arith.mulf %9, %10 : vector<16x1xf32>
    %cst_13 = arith.constant dense<0xFF800000> : vector<16xf32>
    %12 = vector.multi_reduction <maximumf>, %7, %cst_13 [1] : vector<16x256xf32> to vector<16xf32>
    %13 = vector.shape_cast %12 : vector<16xf32> to vector<16x1xf32>
    %14 = vector.broadcast %11 : vector<16x1xf32> to vector<16x2xf32>
    %15 = arith.mulf %4, %14 : vector<16x2xf32>
    %cst_14 = arith.constant dense<0.000000e+00> : vector<2xf32>
    %16 = vector.multi_reduction <add>, %15, %cst_14 [0] : vector<16x2xf32> to vector<2xf32>
    %17 = vector.shape_cast %16 : vector<2xf32> to vector<1x2xf32>
    %cst_15 = arith.constant 0.000000e+00 : f32
    %18 = vector.broadcast %cst_15 : f32 to vector<1x2xf32>
    %19 = arith.maximumf %17, %18 : vector<1x2xf32>
    %20 = vector.broadcast %13 : vector<16x1xf32> to vector<16x2xf32>
    %21 = arith.mulf %4, %20 : vector<16x2xf32>
    %cst_16 = arith.constant dense<0.000000e+00> : vector<2xf32>
    %22 = vector.multi_reduction <add>, %21, %cst_16 [0] : vector<16x2xf32> to vector<2xf32>
    %23 = vector.shape_cast %22 : vector<2xf32> to vector<1x2xf32>
    %cst_17 = arith.constant 0.000000e+00 : f32
    %24 = vector.broadcast %cst_17 : f32 to vector<1x2xf32>
    %25 = arith.maximumf %23, %24 : vector<1x2xf32>
    %26 = vector.broadcast %19 : vector<1x2xf32> to vector<16x2xf32>
    %27 = arith.mulf %5, %26 : vector<16x2xf32>
    %cst_18 = arith.constant dense<0.000000e+00> : vector<16xf32>
    %28 = vector.multi_reduction <add>, %27, %cst_18 [1] : vector<16x2xf32> to vector<16xf32>
    %29 = vector.shape_cast %28 : vector<16xf32> to vector<16x1xf32>
    %30 = vector.broadcast %25 : vector<1x2xf32> to vector<16x2xf32>
    %31 = arith.mulf %5, %30 : vector<16x2xf32>
    %cst_19 = arith.constant dense<0.000000e+00> : vector<16xf32>
    %32 = vector.multi_reduction <add>, %31, %cst_19 [1] : vector<16x2xf32> to vector<16xf32>
    %33 = vector.shape_cast %32 : vector<16xf32> to vector<16x1xf32>
    %34 = arith.addf %29, %33 : vector<16x1xf32>
    %35 = arith.negf %34 : vector<16x1xf32>
    %36 = math.exp %35 : vector<16x1xf32>
    %cst_20 = arith.constant 1.000000e+00 : f32
    %37 = vector.broadcast %cst_20 : f32 to vector<16x1xf32>
    %38 = arith.addf %37, %36 : vector<16x1xf32>
    %39 = arith.divf %37, %38 : vector<16x1xf32>
    %40 = vector.broadcast %39 : vector<16x1xf32> to vector<16x256xf32>
    %41 = arith.mulf %7, %40 : vector<16x256xf32>
    %cst_21 = arith.constant dense<0.000000e+00> : vector<256xf32>
    %42 = vector.multi_reduction <add>, %41, %cst_21 [0] : vector<16x256xf32> to vector<256xf32>
    %43 = vector.shape_cast %42 : vector<256xf32> to vector<1x256xf32>
    %cst_22 = arith.constant 6.250000e-02 : f32
    %44 = vector.broadcast %cst_22 : f32 to vector<1x256xf32>
    %45 = arith.mulf %43, %44 : vector<1x256xf32>
    %cst_23 = arith.constant dense<0xFF800000> : vector<256xf32>
    %46 = vector.multi_reduction <maximumf>, %41, %cst_23 [0] : vector<16x256xf32> to vector<256xf32>
    %47 = vector.shape_cast %46 : vector<256xf32> to vector<1x256xf32>
    %48 = vector.extract_strided_slice %45 {offsets = [0, 0], sizes = [1, 16], strides = [1, 1]} : vector<1x256xf32> to vector<1x16xf32>
    %c3 = arith.constant 3 : index
    %c3_24 = arith.constant 3 : index
    %49 = vector.load %arg6[%c3, %c3_24] : memref<22x22xf32, #tpu.memory_space<vmem>>, vector<1x16xf32>
    tpu.vector_store %arg6[%c3, %c3_24], %48 {strides = array<i32>} : memref<22x22xf32, #tpu.memory_space<vmem>>, vector<1x16xf32>,
    %50 = vector.extract_strided_slice %47 {offsets = [0, 0], sizes = [1, 16], strides = [1, 1]} : vector<1x256xf32> to vector<1x16xf32>
    %c3_25 = arith.constant 3 : index
    %c3_26 = arith.constant 3 : index
    %51 = vector.load %arg7[%c3_25, %c3_26] : memref<22x22xf32, #tpu.memory_space<vmem>>, vector<1x16xf32>
    tpu.vector_store %arg7[%c3_25, %c3_26], %50 {strides = array<i32>} : memref<22x22xf32, #tpu.memory_space<vmem>>, vector<1x16xf32>,
    %52 = vector.extract_strided_slice %45 {offsets = [0, 16], sizes = [1, 16], strides = [1, 1]} : vector<1x256xf32> to vector<1x16xf32>
    %c4 = arith.constant 4 : index
    %c3_27 = arith.constant 3 : index
    %53 = vector.load %arg6[%c4, %c3_27] : memref<22x22xf32, #tpu.memory_space<vmem>>, vector<1x16xf32>
    tpu.vector_store %arg6[%c4, %c3_27], %52 {strides = array<i32>} : memref<22x22xf32, #tpu.memory_space<vmem>>, vector<1x16xf32>,
    %54 = vector.extract_strided_slice %47 {offsets = [0, 16], sizes = [1, 16], strides = [1, 1]} : vector<1x256xf32> to vector<1x16xf32>
    %c4_28 = arith.constant 4 : index
    %c3_29 = arith.constant 3 : index
    %55 = vector.load %arg7[%c4_28, %c3_29] : memref<22x22xf32, #tpu.memory_space<vmem>>, vector<1x16xf32>
    tpu.vector_store %arg7[%c4_28, %c3_29], %54 {strides = array<i32>} : memref<22x22xf32, #tpu.memory_space<vmem>>, vector<1x16xf32>,
    %56 = vector.extract_strided_slice %45 {offsets = [0, 32], sizes = [1, 16], strides = [1, 1]} : vector<1x256xf32> to vector<1x16xf32>
    %c5 = arith.constant 5 : index
    %c3_30 = arith.constant 3 : index
    %57 = vector.load %arg6[%c5, %c3_30] : memref<22x22xf32, #tpu.memory_space<vmem>>, vector<1x16xf32>
    tpu.vector_store %arg6[%c5, %c3_30], %56 {strides = array<i32>} : memref<22x22xf32, #tpu.memory_space<vmem>>, vector<1x16xf32>,
    %58 = vector.extract_strided_slice %47 {offsets = [0, 32], sizes = [1, 16], strides = [1, 1]} : vector<1x256xf32> to vector<1x16xf32>
    %c5_31 = arith.constant 5 : index
    %c3_32 = arith.constant 3 : index
    %59 = vector.load %arg7[%c5_31, %c3_32] : memref<22x22xf32, #tpu.memory_space<vmem>>, vector<1x16xf32>
    tpu.vector_store %arg7[%c5_31, %c3_32], %58 {strides = array<i32>} : memref<22x22xf32, #tpu.memory_space<vmem>>, vector<1x16xf32>,
    %60 = vector.extract_strided_slice %45 {offsets = [0, 48], sizes = [1, 16], strides = [1, 1]} : vector<1x256xf32> to vector<1x16xf32>
    %c6 = arith.constant 6 : index
    %c3_33 = arith.constant 3 : index
    %61 = vector.load %arg6[%c6, %c3_33] : memref<22x22xf32, #tpu.memory_space<vmem>>, vector<1x16xf32>
    tpu.vector_store %arg6[%c6, %c3_33], %60 {strides = array<i32>} : memref<22x22xf32, #tpu.memory_space<vmem>>, vector<1x16xf32>,
    %62 = vector.extract_strided_slice %47 {offsets = [0, 48], sizes = [1, 16], strides = [1, 1]} : vector<1x256xf32> to vector<1x16xf32>
    %c6_34 = arith.constant 6 : index
    %c3_35 = arith.constant 3 : index
    %63 = vector.load %arg7[%c6_34, %c3_35] : memref<22x22xf32, #tpu.memory_space<vmem>>, vector<1x16xf32>
    tpu.vector_store %arg7[%c6_34, %c3_35], %62 {strides = array<i32>} : memref<22x22xf32, #tpu.memory_space<vmem>>, vector<1x16xf32>,
    %64 = vector.extract_strided_slice %45 {offsets = [0, 64], sizes = [1, 16], strides = [1, 1]} : vector<1x256xf32> to vector<1x16xf32>
    %c7 = arith.constant 7 : index
    %c3_36 = arith.constant 3 : index
    %65 = vector.load %arg6[%c7, %c3_36] : memref<22x22xf32, #tpu.memory_space<vmem>>, vector<1x16xf32>
    tpu.vector_store %arg6[%c7, %c3_36], %64 {strides = array<i32>} : memref<22x22xf32, #tpu.memory_space<vmem>>, vector<1x16xf32>,
    %66 = vector.extract_strided_slice %47 {offsets = [0, 64], sizes = [1, 16], strides = [1, 1]} : vector<1x256xf32> to vector<1x16xf32>
    %c7_37 = arith.constant 7 : index
    %c3_38 = arith.constant 3 : index
    %67 = vector.load %arg7[%c7_37, %c3_38] : memref<22x22xf32, #tpu.memory_space<vmem>>, vector<1x16xf32>
    tpu.vector_store %arg7[%c7_37, %c3_38], %66 {strides = array<i32>} : memref<22x22xf32, #tpu.memory_space<vmem>>, vector<1x16xf32>,
    %68 = vector.extract_strided_slice %45 {offsets = [0, 80], sizes = [1, 16], strides = [1, 1]} : vector<1x256xf32> to vector<1x16xf32>
    %c8 = arith.constant 8 : index
    %c3_39 = arith.constant 3 : index
    %69 = vector.load %arg6[%c8, %c3_39] : memref<22x22xf32, #tpu.memory_space<vmem>>, vector<1x16xf32>
    tpu.vector_store %arg6[%c8, %c3_39], %68 {strides = array<i32>} : memref<22x22xf32, #tpu.memory_space<vmem>>, vector<1x16xf32>,
    %70 = vector.extract_strided_slice %47 {offsets = [0, 80], sizes = [1, 16], strides = [1, 1]} : vector<1x256xf32> to vector<1x16xf32>
    %c8_40 = arith.constant 8 : index
    %c3_41 = arith.constant 3 : index
    %71 = vector.load %arg7[%c8_40, %c3_41] : memref<22x22xf32, #tpu.memory_space<vmem>>, vector<1x16xf32>
    tpu.vector_store %arg7[%c8_40, %c3_41], %70 {strides = array<i32>} : memref<22x22xf32, #tpu.memory_space<vmem>>, vector<1x16xf32>,
    %72 = vector.extract_strided_slice %45 {offsets = [0, 96], sizes = [1, 16], strides = [1, 1]} : vector<1x256xf32> to vector<1x16xf32>
    %c9 = arith.constant 9 : index
    %c3_42 = arith.constant 3 : index
    %73 = vector.load %arg6[%c9, %c3_42] : memref<22x22xf32, #tpu.memory_space<vmem>>, vector<1x16xf32>
    tpu.vector_store %arg6[%c9, %c3_42], %72 {strides = array<i32>} : memref<22x22xf32, #tpu.memory_space<vmem>>, vector<1x16xf32>,
    %74 = vector.extract_strided_slice %47 {offsets = [0, 96], sizes = [1, 16], strides = [1, 1]} : vector<1x256xf32> to vector<1x16xf32>
    %c9_43 = arith.constant 9 : index
    %c3_44 = arith.constant 3 : index
    %75 = vector.load %arg7[%c9_43, %c3_44] : memref<22x22xf32, #tpu.memory_space<vmem>>, vector<1x16xf32>
    tpu.vector_store %arg7[%c9_43, %c3_44], %74 {strides = array<i32>} : memref<22x22xf32, #tpu.memory_space<vmem>>, vector<1x16xf32>,
    %76 = vector.extract_strided_slice %45 {offsets = [0, 112], sizes = [1, 16], strides = [1, 1]} : vector<1x256xf32> to vector<1x16xf32>
    %c10 = arith.constant 10 : index
    %c3_45 = arith.constant 3 : index
    %77 = vector.load %arg6[%c10, %c3_45] : memref<22x22xf32, #tpu.memory_space<vmem>>, vector<1x16xf32>
    tpu.vector_store %arg6[%c10, %c3_45], %76 {strides = array<i32>} : memref<22x22xf32, #tpu.memory_space<vmem>>, vector<1x16xf32>,
    %78 = vector.extract_strided_slice %47 {offsets = [0, 112], sizes = [1, 16], strides = [1, 1]} : vector<1x256xf32> to vector<1x16xf32>
    %c10_46 = arith.constant 10 : index
    %c3_47 = arith.constant 3 : index
    %79 = vector.load %arg7[%c10_46, %c3_47] : memref<22x22xf32, #tpu.memory_space<vmem>>, vector<1x16xf32>
    tpu.vector_store %arg7[%c10_46, %c3_47], %78 {strides = array<i32>} : memref<22x22xf32, #tpu.memory_space<vmem>>, vector<1x16xf32>,
    %80 = vector.extract_strided_slice %45 {offsets = [0, 128], sizes = [1, 16], strides = [1, 1]} : vector<1x256xf32> to vector<1x16xf32>
    %c11 = arith.constant 11 : index
    %c3_48 = arith.constant 3 : index
    %81 = vector.load %arg6[%c11, %c3_48] : memref<22x22xf32, #tpu.memory_space<vmem>>, vector<1x16xf32>
    tpu.vector_store %arg6[%c11, %c3_48], %80 {strides = array<i32>} : memref<22x22xf32, #tpu.memory_space<vmem>>, vector<1x16xf32>,
    %82 = vector.extract_strided_slice %47 {offsets = [0, 128], sizes = [1, 16], strides = [1, 1]} : vector<1x256xf32> to vector<1x16xf32>
    %c11_49 = arith.constant 11 : index
    %c3_50 = arith.constant 3 : index
    %83 = vector.load %arg7[%c11_49, %c3_50] : memref<22x22xf32, #tpu.memory_space<vmem>>, vector<1x16xf32>
    tpu.vector_store %arg7[%c11_49, %c3_50], %82 {strides = array<i32>} : memref<22x22xf32, #tpu.memory_space<vmem>>, vector<1x16xf32>,
    %84 = vector.extract_strided_slice %45 {offsets = [0, 144], sizes = [1, 16], strides = [1, 1]} : vector<1x256xf32> to vector<1x16xf32>
    %c12 = arith.constant 12 : index
    %c3_51 = arith.constant 3 : index
    %85 = vector.load %arg6[%c12, %c3_51] : memref<22x22xf32, #tpu.memory_space<vmem>>, vector<1x16xf32>
    tpu.vector_store %arg6[%c12, %c3_51], %84 {strides = array<i32>} : memref<22x22xf32, #tpu.memory_space<vmem>>, vector<1x16xf32>,
    %86 = vector.extract_strided_slice %47 {offsets = [0, 144], sizes = [1, 16], strides = [1, 1]} : vector<1x256xf32> to vector<1x16xf32>
    %c12_52 = arith.constant 12 : index
    %c3_53 = arith.constant 3 : index
    %87 = vector.load %arg7[%c12_52, %c3_53] : memref<22x22xf32, #tpu.memory_space<vmem>>, vector<1x16xf32>
    tpu.vector_store %arg7[%c12_52, %c3_53], %86 {strides = array<i32>} : memref<22x22xf32, #tpu.memory_space<vmem>>, vector<1x16xf32>,
    %88 = vector.extract_strided_slice %45 {offsets = [0, 160], sizes = [1, 16], strides = [1, 1]} : vector<1x256xf32> to vector<1x16xf32>
    %c13 = arith.constant 13 : index
    %c3_54 = arith.constant 3 : index
    %89 = vector.load %arg6[%c13, %c3_54] : memref<22x22xf32, #tpu.memory_space<vmem>>, vector<1x16xf32>
    tpu.vector_store %arg6[%c13, %c3_54], %88 {strides = array<i32>} : memref<22x22xf32, #tpu.memory_space<vmem>>, vector<1x16xf32>,
    %90 = vector.extract_strided_slice %47 {offsets = [0, 160], sizes = [1, 16], strides = [1, 1]} : vector<1x256xf32> to vector<1x16xf32>
    %c13_55 = arith.constant 13 : index
    %c3_56 = arith.constant 3 : index
    %91 = vector.load %arg7[%c13_55, %c3_56] : memref<22x22xf32, #tpu.memory_space<vmem>>, vector<1x16xf32>
    tpu.vector_store %arg7[%c13_55, %c3_56], %90 {strides = array<i32>} : memref<22x22xf32, #tpu.memory_space<vmem>>, vector<1x16xf32>,
    %92 = vector.extract_strided_slice %45 {offsets = [0, 176], sizes = [1, 16], strides = [1, 1]} : vector<1x256xf32> to vector<1x16xf32>
    %c14 = arith.constant 14 : index
    %c3_57 = arith.constant 3 : index
    %93 = vector.load %arg6[%c14, %c3_57] : memref<22x22xf32, #tpu.memory_space<vmem>>, vector<1x16xf32>
    tpu.vector_store %arg6[%c14, %c3_57], %92 {strides = array<i32>} : memref<22x22xf32, #tpu.memory_space<vmem>>, vector<1x16xf32>,
    %94 = vector.extract_strided_slice %47 {offsets = [0, 176], sizes = [1, 16], strides = [1, 1]} : vector<1x256xf32> to vector<1x16xf32>
    %c14_58 = arith.constant 14 : index
    %c3_59 = arith.constant 3 : index
    %95 = vector.load %arg7[%c14_58, %c3_59] : memref<22x22xf32, #tpu.memory_space<vmem>>, vector<1x16xf32>
    tpu.vector_store %arg7[%c14_58, %c3_59], %94 {strides = array<i32>} : memref<22x22xf32, #tpu.memory_space<vmem>>, vector<1x16xf32>,
    %96 = vector.extract_strided_slice %45 {offsets = [0, 192], sizes = [1, 16], strides = [1, 1]} : vector<1x256xf32> to vector<1x16xf32>
    %c15 = arith.constant 15 : index
    %c3_60 = arith.constant 3 : index
    %97 = vector.load %arg6[%c15, %c3_60] : memref<22x22xf32, #tpu.memory_space<vmem>>, vector<1x16xf32>
    tpu.vector_store %arg6[%c15, %c3_60], %96 {strides = array<i32>} : memref<22x22xf32, #tpu.memory_space<vmem>>, vector<1x16xf32>,
    %98 = vector.extract_strided_slice %47 {offsets = [0, 192], sizes = [1, 16], strides = [1, 1]} : vector<1x256xf32> to vector<1x16xf32>
    %c15_61 = arith.constant 15 : index
    %c3_62 = arith.constant 3 : index
    %99 = vector.load %arg7[%c15_61, %c3_62] : memref<22x22xf32, #tpu.memory_space<vmem>>, vector<1x16xf32>
    tpu.vector_store %arg7[%c15_61, %c3_62], %98 {strides = array<i32>} : memref<22x22xf32, #tpu.memory_space<vmem>>, vector<1x16xf32>,
    %100 = vector.extract_strided_slice %45 {offsets = [0, 208], sizes = [1, 16], strides = [1, 1]} : vector<1x256xf32> to vector<1x16xf32>
    %c16 = arith.constant 16 : index
    %c3_63 = arith.constant 3 : index
    %101 = vector.load %arg6[%c16, %c3_63] : memref<22x22xf32, #tpu.memory_space<vmem>>, vector<1x16xf32>
    tpu.vector_store %arg6[%c16, %c3_63], %100 {strides = array<i32>} : memref<22x22xf32, #tpu.memory_space<vmem>>, vector<1x16xf32>,
    %102 = vector.extract_strided_slice %47 {offsets = [0, 208], sizes = [1, 16], strides = [1, 1]} : vector<1x256xf32> to vector<1x16xf32>
    %c16_64 = arith.constant 16 : index
    %c3_65 = arith.constant 3 : index
    %103 = vector.load %arg7[%c16_64, %c3_65] : memref<22x22xf32, #tpu.memory_space<vmem>>, vector<1x16xf32>
    tpu.vector_store %arg7[%c16_64, %c3_65], %102 {strides = array<i32>} : memref<22x22xf32, #tpu.memory_space<vmem>>, vector<1x16xf32>,
    %104 = vector.extract_strided_slice %45 {offsets = [0, 224], sizes = [1, 16], strides = [1, 1]} : vector<1x256xf32> to vector<1x16xf32>
    %c17 = arith.constant 17 : index
    %c3_66 = arith.constant 3 : index
    %105 = vector.load %arg6[%c17, %c3_66] : memref<22x22xf32, #tpu.memory_space<vmem>>, vector<1x16xf32>
    tpu.vector_store %arg6[%c17, %c3_66], %104 {strides = array<i32>} : memref<22x22xf32, #tpu.memory_space<vmem>>, vector<1x16xf32>,
    %106 = vector.extract_strided_slice %47 {offsets = [0, 224], sizes = [1, 16], strides = [1, 1]} : vector<1x256xf32> to vector<1x16xf32>
    %c17_67 = arith.constant 17 : index
    %c3_68 = arith.constant 3 : index
    %107 = vector.load %arg7[%c17_67, %c3_68] : memref<22x22xf32, #tpu.memory_space<vmem>>, vector<1x16xf32>
    tpu.vector_store %arg7[%c17_67, %c3_68], %106 {strides = array<i32>} : memref<22x22xf32, #tpu.memory_space<vmem>>, vector<1x16xf32>,
    %108 = vector.extract_strided_slice %45 {offsets = [0, 240], sizes = [1, 16], strides = [1, 1]} : vector<1x256xf32> to vector<1x16xf32>
    %c18 = arith.constant 18 : index
    %c3_69 = arith.constant 3 : index
    %109 = vector.load %arg6[%c18, %c3_69] : memref<22x22xf32, #tpu.memory_space<vmem>>, vector<1x16xf32>
    tpu.vector_store %arg6[%c18, %c3_69], %108 {strides = array<i32>} : memref<22x22xf32, #tpu.memory_space<vmem>>, vector<1x16xf32>,
    %110 = vector.extract_strided_slice %47 {offsets = [0, 240], sizes = [1, 16], strides = [1, 1]} : vector<1x256xf32> to vector<1x16xf32>
    %c18_70 = arith.constant 18 : index
    %c3_71 = arith.constant 3 : index
    %111 = vector.load %arg7[%c18_70, %c3_71] : memref<22x22xf32, #tpu.memory_space<vmem>>, vector<1x16xf32>
    tpu.vector_store %arg7[%c18_70, %c3_71], %110 {strides = array<i32>} : memref<22x22xf32, #tpu.memory_space<vmem>>, vector<1x16xf32>,
    %cst_72 = arith.constant 0.000000e+00 : f32
    %112 = vector.broadcast %cst_72 : f32 to vector<16x16xf32>
    %cst_73 = arith.constant 0.000000e+00 : f32
    %113 = vector.broadcast %cst_73 : f32 to vector<16x16xf32>
    %cst_74 = arith.constant 0.000000e+00 : f32
    %114 = vector.broadcast %cst_74 : f32 to vector<16x16xf32>
    %cst_75 = arith.constant 0.000000e+00 : f32
    %115 = vector.broadcast %cst_75 : f32 to vector<16x16xf32>
    %c0_76 = arith.constant 0 : index
    %c0_77 = arith.constant 0 : index
    %116 = vector.load %arg6[%c0_76, %c0_77] : memref<22x22xf32, #tpu.memory_space<vmem>>, vector<22x16xf32>
    %c0_78 = arith.constant 0 : index
    %c0_79 = arith.constant 0 : index
    %117 = vector.load %arg7[%c0_78, %c0_79] : memref<22x22xf32, #tpu.memory_space<vmem>>, vector<22x16xf32>
    %c0_80 = arith.constant 0 : index
    %118 = memref.load %arg4[%c0_80] : memref<98xf32, #tpu.memory_space<smem>>
    %c49 = arith.constant 49 : index
    %119 = memref.load %arg4[%c49] : memref<98xf32, #tpu.memory_space<smem>>
    %120 = vector.extract_strided_slice %116 {offsets = [0, 0], sizes = [16, 16], strides = [1, 1]} : vector<22x16xf32> to vector<16x16xf32>
    %121 = vector.broadcast %118 : f32 to vector<16x16xf32>
    %122 = arith.mulf %121, %120 : vector<16x16xf32>
    %123 = arith.addf %112, %122 : vector<16x16xf32>
    %124 = vector.extract_strided_slice %117 {offsets = [0, 0], sizes = [16, 16], strides = [1, 1]} : vector<22x16xf32> to vector<16x16xf32>
    %125 = vector.broadcast %119 : f32 to vector<16x16xf32>
    %126 = arith.mulf %125, %124 : vector<16x16xf32>
    %127 = arith.addf %113, %126 : vector<16x16xf32>
    %c7_81 = arith.constant 7 : index
    %128 = memref.load %arg4[%c7_81] : memref<98xf32, #tpu.memory_space<smem>>
    %c56 = arith.constant 56 : index
    %129 = memref.load %arg4[%c56] : memref<98xf32, #tpu.memory_space<smem>>
    %130 = vector.extract_strided_slice %116 {offsets = [1, 0], sizes = [16, 16], strides = [1, 1]} : vector<22x16xf32> to vector<16x16xf32>
    %131 = vector.broadcast %128 : f32 to vector<16x16xf32>
    %132 = arith.mulf %131, %130 : vector<16x16xf32>
    %133 = arith.addf %114, %132 : vector<16x16xf32>
    %134 = vector.extract_strided_slice %117 {offsets = [1, 0], sizes = [16, 16], strides = [1, 1]} : vector<22x16xf32> to vector<16x16xf32>
    %135 = vector.broadcast %129 : f32 to vector<16x16xf32>
    %136 = arith.mulf %135, %134 : vector<16x16xf32>
    %137 = arith.addf %115, %136 : vector<16x16xf32>
    %c14_82 = arith.constant 14 : index
    %138 = memref.load %arg4[%c14_82] : memref<98xf32, #tpu.memory_space<smem>>
    %c63 = arith.constant 63 : index
    %139 = memref.load %arg4[%c63] : memref<98xf32, #tpu.memory_space<smem>>
    %140 = vector.extract_strided_slice %116 {offsets = [2, 0], sizes = [16, 16], strides = [1, 1]} : vector<22x16xf32> to vector<16x16xf32>
    %141 = vector.broadcast %138 : f32 to vector<16x16xf32>
    %142 = arith.mulf %141, %140 : vector<16x16xf32>
    %143 = arith.addf %123, %142 : vector<16x16xf32>
    %144 = vector.extract_strided_slice %117 {offsets = [2, 0], sizes = [16, 16], strides = [1, 1]} : vector<22x16xf32> to vector<16x16xf32>
    %145 = vector.broadcast %139 : f32 to vector<16x16xf32>
    %146 = arith.mulf %145, %144 : vector<16x16xf32>
    %147 = arith.addf %127, %146 : vector<16x16xf32>
    %c21 = arith.constant 21 : index
    %148 = memref.load %arg4[%c21] : memref<98xf32, #tpu.memory_space<smem>>
    %c70 = arith.constant 70 : index
    %149 = memref.load %arg4[%c70] : memref<98xf32, #tpu.memory_space<smem>>
    %150 = vector.extract_strided_slice %116 {offsets = [3, 0], sizes = [16, 16], strides = [1, 1]} : vector<22x16xf32> to vector<16x16xf32>
    %151 = vector.broadcast %148 : f32 to vector<16x16xf32>
    %152 = arith.mulf %151, %150 : vector<16x16xf32>
    %153 = arith.addf %133, %152 : vector<16x16xf32>
    %154 = vector.extract_strided_slice %117 {offsets = [3, 0], sizes = [16, 16], strides = [1, 1]} : vector<22x16xf32> to vector<16x16xf32>
    %155 = vector.broadcast %149 : f32 to vector<16x16xf32>
    %156 = arith.mulf %155, %154 : vector<16x16xf32>
    %157 = arith.addf %137, %156 : vector<16x16xf32>
    %c28 = arith.constant 28 : index
    %158 = memref.load %arg4[%c28] : memref<98xf32, #tpu.memory_space<smem>>
    %c77 = arith.constant 77 : index
    %159 = memref.load %arg4[%c77] : memref<98xf32, #tpu.memory_space<smem>>
    %160 = vector.extract_strided_slice %116 {offsets = [4, 0], sizes = [16, 16], strides = [1, 1]} : vector<22x16xf32> to vector<16x16xf32>
    %161 = vector.broadcast %158 : f32 to vector<16x16xf32>
    %162 = arith.mulf %161, %160 : vector<16x16xf32>
    %163 = arith.addf %143, %162 : vector<16x16xf32>
    %164 = vector.extract_strided_slice %117 {offsets = [4, 0], sizes = [16, 16], strides = [1, 1]} : vector<22x16xf32> to vector<16x16xf32>
    %165 = vector.broadcast %159 : f32 to vector<16x16xf32>
    %166 = arith.mulf %165, %164 : vector<16x16xf32>
    %167 = arith.addf %147, %166 : vector<16x16xf32>
    %c35 = arith.constant 35 : index
    %168 = memref.load %arg4[%c35] : memref<98xf32, #tpu.memory_space<smem>>
    %c84 = arith.constant 84 : index
    %169 = memref.load %arg4[%c84] : memref<98xf32, #tpu.memory_space<smem>>
    %170 = vector.extract_strided_slice %116 {offsets = [5, 0], sizes = [16, 16], strides = [1, 1]} : vector<22x16xf32> to vector<16x16xf32>
    %171 = vector.broadcast %168 : f32 to vector<16x16xf32>
    %172 = arith.mulf %171, %170 : vector<16x16xf32>
    %173 = arith.addf %153, %172 : vector<16x16xf32>
    %174 = vector.extract_strided_slice %117 {offsets = [5, 0], sizes = [16, 16], strides = [1, 1]} : vector<22x16xf32> to vector<16x16xf32>
    %175 = vector.broadcast %169 : f32 to vector<16x16xf32>
    %176 = arith.mulf %175, %174 : vector<16x16xf32>
    %177 = arith.addf %157, %176 : vector<16x16xf32>
    %c42 = arith.constant 42 : index
    %178 = memref.load %arg4[%c42] : memref<98xf32, #tpu.memory_space<smem>>
    %c91 = arith.constant 91 : index
    %179 = memref.load %arg4[%c91] : memref<98xf32, #tpu.memory_space<smem>>
    %180 = vector.extract_strided_slice %116 {offsets = [6, 0], sizes = [16, 16], strides = [1, 1]} : vector<22x16xf32> to vector<16x16xf32>
    %181 = vector.broadcast %178 : f32 to vector<16x16xf32>
    %182 = arith.mulf %181, %180 : vector<16x16xf32>
    %183 = arith.addf %163, %182 : vector<16x16xf32>
    %184 = vector.extract_strided_slice %117 {offsets = [6, 0], sizes = [16, 16], strides = [1, 1]} : vector<22x16xf32> to vector<16x16xf32>
    %185 = vector.broadcast %179 : f32 to vector<16x16xf32>
    %186 = arith.mulf %185, %184 : vector<16x16xf32>
    %187 = arith.addf %167, %186 : vector<16x16xf32>
    %c0_83 = arith.constant 0 : index
    %c1 = arith.constant 1 : index
    %188 = vector.load %arg6[%c0_83, %c1] : memref<22x22xf32, #tpu.memory_space<vmem>>, vector<22x16xf32>
    %c0_84 = arith.constant 0 : index
    %c1_85 = arith.constant 1 : index
    %189 = vector.load %arg7[%c0_84, %c1_85] : memref<22x22xf32, #tpu.memory_space<vmem>>, vector<22x16xf32>
    %c1_86 = arith.constant 1 : index
    %190 = memref.load %arg4[%c1_86] : memref<98xf32, #tpu.memory_space<smem>>
    %c50 = arith.constant 50 : index
    %191 = memref.load %arg4[%c50] : memref<98xf32, #tpu.memory_space<smem>>
    %192 = vector.extract_strided_slice %188 {offsets = [0, 0], sizes = [16, 16], strides = [1, 1]} : vector<22x16xf32> to vector<16x16xf32>
    %193 = vector.broadcast %190 : f32 to vector<16x16xf32>
    %194 = arith.mulf %193, %192 : vector<16x16xf32>
    %195 = arith.addf %173, %194 : vector<16x16xf32>
    %196 = vector.extract_strided_slice %189 {offsets = [0, 0], sizes = [16, 16], strides = [1, 1]} : vector<22x16xf32> to vector<16x16xf32>
    %197 = vector.broadcast %191 : f32 to vector<16x16xf32>
    %198 = arith.mulf %197, %196 : vector<16x16xf32>
    %199 = arith.addf %177, %198 : vector<16x16xf32>
    %c8_87 = arith.constant 8 : index
    %200 = memref.load %arg4[%c8_87] : memref<98xf32, #tpu.memory_space<smem>>
    %c57 = arith.constant 57 : index
    %201 = memref.load %arg4[%c57] : memref<98xf32, #tpu.memory_space<smem>>
    %202 = vector.extract_strided_slice %188 {offsets = [1, 0], sizes = [16, 16], strides = [1, 1]} : vector<22x16xf32> to vector<16x16xf32>
    %203 = vector.broadcast %200 : f32 to vector<16x16xf32>
    %204 = arith.mulf %203, %202 : vector<16x16xf32>
    %205 = arith.addf %183, %204 : vector<16x16xf32>
    %206 = vector.extract_strided_slice %189 {offsets = [1, 0], sizes = [16, 16], strides = [1, 1]} : vector<22x16xf32> to vector<16x16xf32>
    %207 = vector.broadcast %201 : f32 to vector<16x16xf32>
    %208 = arith.mulf %207, %206 : vector<16x16xf32>
    %209 = arith.addf %187, %208 : vector<16x16xf32>
    %c15_88 = arith.constant 15 : index
    %210 = memref.load %arg4[%c15_88] : memref<98xf32, #tpu.memory_space<smem>>
    %c64 = arith.constant 64 : index
    %211 = memref.load %arg4[%c64] : memref<98xf32, #tpu.memory_space<smem>>
    %212 = vector.extract_strided_slice %188 {offsets = [2, 0], sizes = [16, 16], strides = [1, 1]} : vector<22x16xf32> to vector<16x16xf32>
    %213 = vector.broadcast %210 : f32 to vector<16x16xf32>
    %214 = arith.mulf %213, %212 : vector<16x16xf32>
    %215 = arith.addf %195, %214 : vector<16x16xf32>
    %216 = vector.extract_strided_slice %189 {offsets = [2, 0], sizes = [16, 16], strides = [1, 1]} : vector<22x16xf32> to vector<16x16xf32>
    %217 = vector.broadcast %211 : f32 to vector<16x16xf32>
    %218 = arith.mulf %217, %216 : vector<16x16xf32>
    %219 = arith.addf %199, %218 : vector<16x16xf32>
    %c22 = arith.constant 22 : index
    %220 = memref.load %arg4[%c22] : memref<98xf32, #tpu.memory_space<smem>>
    %c71 = arith.constant 71 : index
    %221 = memref.load %arg4[%c71] : memref<98xf32, #tpu.memory_space<smem>>
    %222 = vector.extract_strided_slice %188 {offsets = [3, 0], sizes = [16, 16], strides = [1, 1]} : vector<22x16xf32> to vector<16x16xf32>
    %223 = vector.broadcast %220 : f32 to vector<16x16xf32>
    %224 = arith.mulf %223, %222 : vector<16x16xf32>
    %225 = arith.addf %205, %224 : vector<16x16xf32>
    %226 = vector.extract_strided_slice %189 {offsets = [3, 0], sizes = [16, 16], strides = [1, 1]} : vector<22x16xf32> to vector<16x16xf32>
    %227 = vector.broadcast %221 : f32 to vector<16x16xf32>
    %228 = arith.mulf %227, %226 : vector<16x16xf32>
    %229 = arith.addf %209, %228 : vector<16x16xf32>
    %c29 = arith.constant 29 : index
    %230 = memref.load %arg4[%c29] : memref<98xf32, #tpu.memory_space<smem>>
    %c78 = arith.constant 78 : index
    %231 = memref.load %arg4[%c78] : memref<98xf32, #tpu.memory_space<smem>>
    %232 = vector.extract_strided_slice %188 {offsets = [4, 0], sizes = [16, 16], strides = [1, 1]} : vector<22x16xf32> to vector<16x16xf32>
    %233 = vector.broadcast %230 : f32 to vector<16x16xf32>
    %234 = arith.mulf %233, %232 : vector<16x16xf32>
    %235 = arith.addf %215, %234 : vector<16x16xf32>
    %236 = vector.extract_strided_slice %189 {offsets = [4, 0], sizes = [16, 16], strides = [1, 1]} : vector<22x16xf32> to vector<16x16xf32>
    %237 = vector.broadcast %231 : f32 to vector<16x16xf32>
    %238 = arith.mulf %237, %236 : vector<16x16xf32>
    %239 = arith.addf %219, %238 : vector<16x16xf32>
    %c36 = arith.constant 36 : index
    %240 = memref.load %arg4[%c36] : memref<98xf32, #tpu.memory_space<smem>>
    %c85 = arith.constant 85 : index
    %241 = memref.load %arg4[%c85] : memref<98xf32, #tpu.memory_space<smem>>
    %242 = vector.extract_strided_slice %188 {offsets = [5, 0], sizes = [16, 16], strides = [1, 1]} : vector<22x16xf32> to vector<16x16xf32>
    %243 = vector.broadcast %240 : f32 to vector<16x16xf32>
    %244 = arith.mulf %243, %242 : vector<16x16xf32>
    %245 = arith.addf %225, %244 : vector<16x16xf32>
    %246 = vector.extract_strided_slice %189 {offsets = [5, 0], sizes = [16, 16], strides = [1, 1]} : vector<22x16xf32> to vector<16x16xf32>
    %247 = vector.broadcast %241 : f32 to vector<16x16xf32>
    %248 = arith.mulf %247, %246 : vector<16x16xf32>
    %249 = arith.addf %229, %248 : vector<16x16xf32>
    %c43 = arith.constant 43 : index
    %250 = memref.load %arg4[%c43] : memref<98xf32, #tpu.memory_space<smem>>
    %c92 = arith.constant 92 : index
    %251 = memref.load %arg4[%c92] : memref<98xf32, #tpu.memory_space<smem>>
    %252 = vector.extract_strided_slice %188 {offsets = [6, 0], sizes = [16, 16], strides = [1, 1]} : vector<22x16xf32> to vector<16x16xf32>
    %253 = vector.broadcast %250 : f32 to vector<16x16xf32>
    %254 = arith.mulf %253, %252 : vector<16x16xf32>
    %255 = arith.addf %235, %254 : vector<16x16xf32>
    %256 = vector.extract_strided_slice %189 {offsets = [6, 0], sizes = [16, 16], strides = [1, 1]} : vector<22x16xf32> to vector<16x16xf32>
    %257 = vector.broadcast %251 : f32 to vector<16x16xf32>
    %258 = arith.mulf %257, %256 : vector<16x16xf32>
    %259 = arith.addf %239, %258 : vector<16x16xf32>
    %c0_89 = arith.constant 0 : index
    %c2 = arith.constant 2 : index
    %260 = vector.load %arg6[%c0_89, %c2] : memref<22x22xf32, #tpu.memory_space<vmem>>, vector<22x16xf32>
    %c0_90 = arith.constant 0 : index
    %c2_91 = arith.constant 2 : index
    %261 = vector.load %arg7[%c0_90, %c2_91] : memref<22x22xf32, #tpu.memory_space<vmem>>, vector<22x16xf32>
    %c2_92 = arith.constant 2 : index
    %262 = memref.load %arg4[%c2_92] : memref<98xf32, #tpu.memory_space<smem>>
    %c51 = arith.constant 51 : index
    %263 = memref.load %arg4[%c51] : memref<98xf32, #tpu.memory_space<smem>>
    %264 = vector.extract_strided_slice %260 {offsets = [0, 0], sizes = [16, 16], strides = [1, 1]} : vector<22x16xf32> to vector<16x16xf32>
    %265 = vector.broadcast %262 : f32 to vector<16x16xf32>
    %266 = arith.mulf %265, %264 : vector<16x16xf32>
    %267 = arith.addf %245, %266 : vector<16x16xf32>
    %268 = vector.extract_strided_slice %261 {offsets = [0, 0], sizes = [16, 16], strides = [1, 1]} : vector<22x16xf32> to vector<16x16xf32>
    %269 = vector.broadcast %263 : f32 to vector<16x16xf32>
    %270 = arith.mulf %269, %268 : vector<16x16xf32>
    %271 = arith.addf %249, %270 : vector<16x16xf32>
    %c9_93 = arith.constant 9 : index
    %272 = memref.load %arg4[%c9_93] : memref<98xf32, #tpu.memory_space<smem>>
    %c58 = arith.constant 58 : index
    %273 = memref.load %arg4[%c58] : memref<98xf32, #tpu.memory_space<smem>>
    %274 = vector.extract_strided_slice %260 {offsets = [1, 0], sizes = [16, 16], strides = [1, 1]} : vector<22x16xf32> to vector<16x16xf32>
    %275 = vector.broadcast %272 : f32 to vector<16x16xf32>
    %276 = arith.mulf %275, %274 : vector<16x16xf32>
    %277 = arith.addf %255, %276 : vector<16x16xf32>
    %278 = vector.extract_strided_slice %261 {offsets = [1, 0], sizes = [16, 16], strides = [1, 1]} : vector<22x16xf32> to vector<16x16xf32>
    %279 = vector.broadcast %273 : f32 to vector<16x16xf32>
    %280 = arith.mulf %279, %278 : vector<16x16xf32>
    %281 = arith.addf %259, %280 : vector<16x16xf32>
    %c16_94 = arith.constant 16 : index
    %282 = memref.load %arg4[%c16_94] : memref<98xf32, #tpu.memory_space<smem>>
    %c65 = arith.constant 65 : index
    %283 = memref.load %arg4[%c65] : memref<98xf32, #tpu.memory_space<smem>>
    %284 = vector.extract_strided_slice %260 {offsets = [2, 0], sizes = [16, 16], strides = [1, 1]} : vector<22x16xf32> to vector<16x16xf32>
    %285 = vector.broadcast %282 : f32 to vector<16x16xf32>
    %286 = arith.mulf %285, %284 : vector<16x16xf32>
    %287 = arith.addf %267, %286 : vector<16x16xf32>
    %288 = vector.extract_strided_slice %261 {offsets = [2, 0], sizes = [16, 16], strides = [1, 1]} : vector<22x16xf32> to vector<16x16xf32>
    %289 = vector.broadcast %283 : f32 to vector<16x16xf32>
    %290 = arith.mulf %289, %288 : vector<16x16xf32>
    %291 = arith.addf %271, %290 : vector<16x16xf32>
    %c23 = arith.constant 23 : index
    %292 = memref.load %arg4[%c23] : memref<98xf32, #tpu.memory_space<smem>>
    %c72 = arith.constant 72 : index
    %293 = memref.load %arg4[%c72] : memref<98xf32, #tpu.memory_space<smem>>
    %294 = vector.extract_strided_slice %260 {offsets = [3, 0], sizes = [16, 16], strides = [1, 1]} : vector<22x16xf32> to vector<16x16xf32>
    %295 = vector.broadcast %292 : f32 to vector<16x16xf32>
    %296 = arith.mulf %295, %294 : vector<16x16xf32>
    %297 = arith.addf %277, %296 : vector<16x16xf32>
    %298 = vector.extract_strided_slice %261 {offsets = [3, 0], sizes = [16, 16], strides = [1, 1]} : vector<22x16xf32> to vector<16x16xf32>
    %299 = vector.broadcast %293 : f32 to vector<16x16xf32>
    %300 = arith.mulf %299, %298 : vector<16x16xf32>
    %301 = arith.addf %281, %300 : vector<16x16xf32>
    %c30 = arith.constant 30 : index
    %302 = memref.load %arg4[%c30] : memref<98xf32, #tpu.memory_space<smem>>
    %c79 = arith.constant 79 : index
    %303 = memref.load %arg4[%c79] : memref<98xf32, #tpu.memory_space<smem>>
    %304 = vector.extract_strided_slice %260 {offsets = [4, 0], sizes = [16, 16], strides = [1, 1]} : vector<22x16xf32> to vector<16x16xf32>
    %305 = vector.broadcast %302 : f32 to vector<16x16xf32>
    %306 = arith.mulf %305, %304 : vector<16x16xf32>
    %307 = arith.addf %287, %306 : vector<16x16xf32>
    %308 = vector.extract_strided_slice %261 {offsets = [4, 0], sizes = [16, 16], strides = [1, 1]} : vector<22x16xf32> to vector<16x16xf32>
    %309 = vector.broadcast %303 : f32 to vector<16x16xf32>
    %310 = arith.mulf %309, %308 : vector<16x16xf32>
    %311 = arith.addf %291, %310 : vector<16x16xf32>
    %c37 = arith.constant 37 : index
    %312 = memref.load %arg4[%c37] : memref<98xf32, #tpu.memory_space<smem>>
    %c86 = arith.constant 86 : index
    %313 = memref.load %arg4[%c86] : memref<98xf32, #tpu.memory_space<smem>>
    %314 = vector.extract_strided_slice %260 {offsets = [5, 0], sizes = [16, 16], strides = [1, 1]} : vector<22x16xf32> to vector<16x16xf32>
    %315 = vector.broadcast %312 : f32 to vector<16x16xf32>
    %316 = arith.mulf %315, %314 : vector<16x16xf32>
    %317 = arith.addf %297, %316 : vector<16x16xf32>
    %318 = vector.extract_strided_slice %261 {offsets = [5, 0], sizes = [16, 16], strides = [1, 1]} : vector<22x16xf32> to vector<16x16xf32>
    %319 = vector.broadcast %313 : f32 to vector<16x16xf32>
    %320 = arith.mulf %319, %318 : vector<16x16xf32>
    %321 = arith.addf %301, %320 : vector<16x16xf32>
    %c44 = arith.constant 44 : index
    %322 = memref.load %arg4[%c44] : memref<98xf32, #tpu.memory_space<smem>>
    %c93 = arith.constant 93 : index
    %323 = memref.load %arg4[%c93] : memref<98xf32, #tpu.memory_space<smem>>
    %324 = vector.extract_strided_slice %260 {offsets = [6, 0], sizes = [16, 16], strides = [1, 1]} : vector<22x16xf32> to vector<16x16xf32>
    %325 = vector.broadcast %322 : f32 to vector<16x16xf32>
    %326 = arith.mulf %325, %324 : vector<16x16xf32>
    %327 = arith.addf %307, %326 : vector<16x16xf32>
    %328 = vector.extract_strided_slice %261 {offsets = [6, 0], sizes = [16, 16], strides = [1, 1]} : vector<22x16xf32> to vector<16x16xf32>
    %329 = vector.broadcast %323 : f32 to vector<16x16xf32>
    %330 = arith.mulf %329, %328 : vector<16x16xf32>
    %331 = arith.addf %311, %330 : vector<16x16xf32>
    %c0_95 = arith.constant 0 : index
    %c3_96 = arith.constant 3 : index
    %332 = vector.load %arg6[%c0_95, %c3_96] : memref<22x22xf32, #tpu.memory_space<vmem>>, vector<22x16xf32>
    %c0_97 = arith.constant 0 : index
    %c3_98 = arith.constant 3 : index
    %333 = vector.load %arg7[%c0_97, %c3_98] : memref<22x22xf32, #tpu.memory_space<vmem>>, vector<22x16xf32>
    %c3_99 = arith.constant 3 : index
    %334 = memref.load %arg4[%c3_99] : memref<98xf32, #tpu.memory_space<smem>>
    %c52 = arith.constant 52 : index
    %335 = memref.load %arg4[%c52] : memref<98xf32, #tpu.memory_space<smem>>
    %336 = vector.extract_strided_slice %332 {offsets = [0, 0], sizes = [16, 16], strides = [1, 1]} : vector<22x16xf32> to vector<16x16xf32>
    %337 = vector.broadcast %334 : f32 to vector<16x16xf32>
    %338 = arith.mulf %337, %336 : vector<16x16xf32>
    %339 = arith.addf %317, %338 : vector<16x16xf32>
    %340 = vector.extract_strided_slice %333 {offsets = [0, 0], sizes = [16, 16], strides = [1, 1]} : vector<22x16xf32> to vector<16x16xf32>
    %341 = vector.broadcast %335 : f32 to vector<16x16xf32>
    %342 = arith.mulf %341, %340 : vector<16x16xf32>
    %343 = arith.addf %321, %342 : vector<16x16xf32>
    %c10_100 = arith.constant 10 : index
    %344 = memref.load %arg4[%c10_100] : memref<98xf32, #tpu.memory_space<smem>>
    %c59 = arith.constant 59 : index
    %345 = memref.load %arg4[%c59] : memref<98xf32, #tpu.memory_space<smem>>
    %346 = vector.extract_strided_slice %332 {offsets = [1, 0], sizes = [16, 16], strides = [1, 1]} : vector<22x16xf32> to vector<16x16xf32>
    %347 = vector.broadcast %344 : f32 to vector<16x16xf32>
    %348 = arith.mulf %347, %346 : vector<16x16xf32>
    %349 = arith.addf %327, %348 : vector<16x16xf32>
    %350 = vector.extract_strided_slice %333 {offsets = [1, 0], sizes = [16, 16], strides = [1, 1]} : vector<22x16xf32> to vector<16x16xf32>
    %351 = vector.broadcast %345 : f32 to vector<16x16xf32>
    %352 = arith.mulf %351, %350 : vector<16x16xf32>
    %353 = arith.addf %331, %352 : vector<16x16xf32>
    %c17_101 = arith.constant 17 : index
    %354 = memref.load %arg4[%c17_101] : memref<98xf32, #tpu.memory_space<smem>>
    %c66 = arith.constant 66 : index
    %355 = memref.load %arg4[%c66] : memref<98xf32, #tpu.memory_space<smem>>
    %356 = vector.extract_strided_slice %332 {offsets = [2, 0], sizes = [16, 16], strides = [1, 1]} : vector<22x16xf32> to vector<16x16xf32>
    %357 = vector.broadcast %354 : f32 to vector<16x16xf32>
    %358 = arith.mulf %357, %356 : vector<16x16xf32>
    %359 = arith.addf %339, %358 : vector<16x16xf32>
    %360 = vector.extract_strided_slice %333 {offsets = [2, 0], sizes = [16, 16], strides = [1, 1]} : vector<22x16xf32> to vector<16x16xf32>
    %361 = vector.broadcast %355 : f32 to vector<16x16xf32>
    %362 = arith.mulf %361, %360 : vector<16x16xf32>
    %363 = arith.addf %343, %362 : vector<16x16xf32>
    %c24 = arith.constant 24 : index
    %364 = memref.load %arg4[%c24] : memref<98xf32, #tpu.memory_space<smem>>
    %c73 = arith.constant 73 : index
    %365 = memref.load %arg4[%c73] : memref<98xf32, #tpu.memory_space<smem>>
    %366 = vector.extract_strided_slice %332 {offsets = [3, 0], sizes = [16, 16], strides = [1, 1]} : vector<22x16xf32> to vector<16x16xf32>
    %367 = vector.broadcast %364 : f32 to vector<16x16xf32>
    %368 = arith.mulf %367, %366 : vector<16x16xf32>
    %369 = arith.addf %349, %368 : vector<16x16xf32>
    %370 = vector.extract_strided_slice %333 {offsets = [3, 0], sizes = [16, 16], strides = [1, 1]} : vector<22x16xf32> to vector<16x16xf32>
    %371 = vector.broadcast %365 : f32 to vector<16x16xf32>
    %372 = arith.mulf %371, %370 : vector<16x16xf32>
    %373 = arith.addf %353, %372 : vector<16x16xf32>
    %c31 = arith.constant 31 : index
    %374 = memref.load %arg4[%c31] : memref<98xf32, #tpu.memory_space<smem>>
    %c80 = arith.constant 80 : index
    %375 = memref.load %arg4[%c80] : memref<98xf32, #tpu.memory_space<smem>>
    %376 = vector.extract_strided_slice %332 {offsets = [4, 0], sizes = [16, 16], strides = [1, 1]} : vector<22x16xf32> to vector<16x16xf32>
    %377 = vector.broadcast %374 : f32 to vector<16x16xf32>
    %378 = arith.mulf %377, %376 : vector<16x16xf32>
    %379 = arith.addf %359, %378 : vector<16x16xf32>
    %380 = vector.extract_strided_slice %333 {offsets = [4, 0], sizes = [16, 16], strides = [1, 1]} : vector<22x16xf32> to vector<16x16xf32>
    %381 = vector.broadcast %375 : f32 to vector<16x16xf32>
    %382 = arith.mulf %381, %380 : vector<16x16xf32>
    %383 = arith.addf %363, %382 : vector<16x16xf32>
    %c38 = arith.constant 38 : index
    %384 = memref.load %arg4[%c38] : memref<98xf32, #tpu.memory_space<smem>>
    %c87 = arith.constant 87 : index
    %385 = memref.load %arg4[%c87] : memref<98xf32, #tpu.memory_space<smem>>
    %386 = vector.extract_strided_slice %332 {offsets = [5, 0], sizes = [16, 16], strides = [1, 1]} : vector<22x16xf32> to vector<16x16xf32>
    %387 = vector.broadcast %384 : f32 to vector<16x16xf32>
    %388 = arith.mulf %387, %386 : vector<16x16xf32>
    %389 = arith.addf %369, %388 : vector<16x16xf32>
    %390 = vector.extract_strided_slice %333 {offsets = [5, 0], sizes = [16, 16], strides = [1, 1]} : vector<22x16xf32> to vector<16x16xf32>
    %391 = vector.broadcast %385 : f32 to vector<16x16xf32>
    %392 = arith.mulf %391, %390 : vector<16x16xf32>
    %393 = arith.addf %373, %392 : vector<16x16xf32>
    %c45 = arith.constant 45 : index
    %394 = memref.load %arg4[%c45] : memref<98xf32, #tpu.memory_space<smem>>
    %c94 = arith.constant 94 : index
    %395 = memref.load %arg4[%c94] : memref<98xf32, #tpu.memory_space<smem>>
    %396 = vector.extract_strided_slice %332 {offsets = [6, 0], sizes = [16, 16], strides = [1, 1]} : vector<22x16xf32> to vector<16x16xf32>
    %397 = vector.broadcast %394 : f32 to vector<16x16xf32>
    %398 = arith.mulf %397, %396 : vector<16x16xf32>
    %399 = arith.addf %379, %398 : vector<16x16xf32>
    %400 = vector.extract_strided_slice %333 {offsets = [6, 0], sizes = [16, 16], strides = [1, 1]} : vector<22x16xf32> to vector<16x16xf32>
    %401 = vector.broadcast %395 : f32 to vector<16x16xf32>
    %402 = arith.mulf %401, %400 : vector<16x16xf32>
    %403 = arith.addf %383, %402 : vector<16x16xf32>
    %c0_102 = arith.constant 0 : index
    %c4_103 = arith.constant 4 : index
    %404 = vector.load %arg6[%c0_102, %c4_103] : memref<22x22xf32, #tpu.memory_space<vmem>>, vector<22x16xf32>
    %c0_104 = arith.constant 0 : index
    %c4_105 = arith.constant 4 : index
    %405 = vector.load %arg7[%c0_104, %c4_105] : memref<22x22xf32, #tpu.memory_space<vmem>>, vector<22x16xf32>
    %c4_106 = arith.constant 4 : index
    %406 = memref.load %arg4[%c4_106] : memref<98xf32, #tpu.memory_space<smem>>
    %c53 = arith.constant 53 : index
    %407 = memref.load %arg4[%c53] : memref<98xf32, #tpu.memory_space<smem>>
    %408 = vector.extract_strided_slice %404 {offsets = [0, 0], sizes = [16, 16], strides = [1, 1]} : vector<22x16xf32> to vector<16x16xf32>
    %409 = vector.broadcast %406 : f32 to vector<16x16xf32>
    %410 = arith.mulf %409, %408 : vector<16x16xf32>
    %411 = arith.addf %389, %410 : vector<16x16xf32>
    %412 = vector.extract_strided_slice %405 {offsets = [0, 0], sizes = [16, 16], strides = [1, 1]} : vector<22x16xf32> to vector<16x16xf32>
    %413 = vector.broadcast %407 : f32 to vector<16x16xf32>
    %414 = arith.mulf %413, %412 : vector<16x16xf32>
    %415 = arith.addf %393, %414 : vector<16x16xf32>
    %c11_107 = arith.constant 11 : index
    %416 = memref.load %arg4[%c11_107] : memref<98xf32, #tpu.memory_space<smem>>
    %c60 = arith.constant 60 : index
    %417 = memref.load %arg4[%c60] : memref<98xf32, #tpu.memory_space<smem>>
    %418 = vector.extract_strided_slice %404 {offsets = [1, 0], sizes = [16, 16], strides = [1, 1]} : vector<22x16xf32> to vector<16x16xf32>
    %419 = vector.broadcast %416 : f32 to vector<16x16xf32>
    %420 = arith.mulf %419, %418 : vector<16x16xf32>
    %421 = arith.addf %399, %420 : vector<16x16xf32>
    %422 = vector.extract_strided_slice %405 {offsets = [1, 0], sizes = [16, 16], strides = [1, 1]} : vector<22x16xf32> to vector<16x16xf32>
    %423 = vector.broadcast %417 : f32 to vector<16x16xf32>
    %424 = arith.mulf %423, %422 : vector<16x16xf32>
    %425 = arith.addf %403, %424 : vector<16x16xf32>
    %c18_108 = arith.constant 18 : index
    %426 = memref.load %arg4[%c18_108] : memref<98xf32, #tpu.memory_space<smem>>
    %c67 = arith.constant 67 : index
    %427 = memref.load %arg4[%c67] : memref<98xf32, #tpu.memory_space<smem>>
    %428 = vector.extract_strided_slice %404 {offsets = [2, 0], sizes = [16, 16], strides = [1, 1]} : vector<22x16xf32> to vector<16x16xf32>
    %429 = vector.broadcast %426 : f32 to vector<16x16xf32>
    %430 = arith.mulf %429, %428 : vector<16x16xf32>
    %431 = arith.addf %411, %430 : vector<16x16xf32>
    %432 = vector.extract_strided_slice %405 {offsets = [2, 0], sizes = [16, 16], strides = [1, 1]} : vector<22x16xf32> to vector<16x16xf32>
    %433 = vector.broadcast %427 : f32 to vector<16x16xf32>
    %434 = arith.mulf %433, %432 : vector<16x16xf32>
    %435 = arith.addf %415, %434 : vector<16x16xf32>
    %c25 = arith.constant 25 : index
    %436 = memref.load %arg4[%c25] : memref<98xf32, #tpu.memory_space<smem>>
    %c74 = arith.constant 74 : index
    %437 = memref.load %arg4[%c74] : memref<98xf32, #tpu.memory_space<smem>>
    %438 = vector.extract_strided_slice %404 {offsets = [3, 0], sizes = [16, 16], strides = [1, 1]} : vector<22x16xf32> to vector<16x16xf32>
    %439 = vector.broadcast %436 : f32 to vector<16x16xf32>
    %440 = arith.mulf %439, %438 : vector<16x16xf32>
    %441 = arith.addf %421, %440 : vector<16x16xf32>
    %442 = vector.extract_strided_slice %405 {offsets = [3, 0], sizes = [16, 16], strides = [1, 1]} : vector<22x16xf32> to vector<16x16xf32>
    %443 = vector.broadcast %437 : f32 to vector<16x16xf32>
    %444 = arith.mulf %443, %442 : vector<16x16xf32>
    %445 = arith.addf %425, %444 : vector<16x16xf32>
    %c32 = arith.constant 32 : index
    %446 = memref.load %arg4[%c32] : memref<98xf32, #tpu.memory_space<smem>>
    %c81 = arith.constant 81 : index
    %447 = memref.load %arg4[%c81] : memref<98xf32, #tpu.memory_space<smem>>
    %448 = vector.extract_strided_slice %404 {offsets = [4, 0], sizes = [16, 16], strides = [1, 1]} : vector<22x16xf32> to vector<16x16xf32>
    %449 = vector.broadcast %446 : f32 to vector<16x16xf32>
    %450 = arith.mulf %449, %448 : vector<16x16xf32>
    %451 = arith.addf %431, %450 : vector<16x16xf32>
    %452 = vector.extract_strided_slice %405 {offsets = [4, 0], sizes = [16, 16], strides = [1, 1]} : vector<22x16xf32> to vector<16x16xf32>
    %453 = vector.broadcast %447 : f32 to vector<16x16xf32>
    %454 = arith.mulf %453, %452 : vector<16x16xf32>
    %455 = arith.addf %435, %454 : vector<16x16xf32>
    %c39 = arith.constant 39 : index
    %456 = memref.load %arg4[%c39] : memref<98xf32, #tpu.memory_space<smem>>
    %c88 = arith.constant 88 : index
    %457 = memref.load %arg4[%c88] : memref<98xf32, #tpu.memory_space<smem>>
    %458 = vector.extract_strided_slice %404 {offsets = [5, 0], sizes = [16, 16], strides = [1, 1]} : vector<22x16xf32> to vector<16x16xf32>
    %459 = vector.broadcast %456 : f32 to vector<16x16xf32>
    %460 = arith.mulf %459, %458 : vector<16x16xf32>
    %461 = arith.addf %441, %460 : vector<16x16xf32>
    %462 = vector.extract_strided_slice %405 {offsets = [5, 0], sizes = [16, 16], strides = [1, 1]} : vector<22x16xf32> to vector<16x16xf32>
    %463 = vector.broadcast %457 : f32 to vector<16x16xf32>
    %464 = arith.mulf %463, %462 : vector<16x16xf32>
    %465 = arith.addf %445, %464 : vector<16x16xf32>
    %c46 = arith.constant 46 : index
    %466 = memref.load %arg4[%c46] : memref<98xf32, #tpu.memory_space<smem>>
    %c95 = arith.constant 95 : index
    %467 = memref.load %arg4[%c95] : memref<98xf32, #tpu.memory_space<smem>>
    %468 = vector.extract_strided_slice %404 {offsets = [6, 0], sizes = [16, 16], strides = [1, 1]} : vector<22x16xf32> to vector<16x16xf32>
    %469 = vector.broadcast %466 : f32 to vector<16x16xf32>
    %470 = arith.mulf %469, %468 : vector<16x16xf32>
    %471 = arith.addf %451, %470 : vector<16x16xf32>
    %472 = vector.extract_strided_slice %405 {offsets = [6, 0], sizes = [16, 16], strides = [1, 1]} : vector<22x16xf32> to vector<16x16xf32>
    %473 = vector.broadcast %467 : f32 to vector<16x16xf32>
    %474 = arith.mulf %473, %472 : vector<16x16xf32>
    %475 = arith.addf %455, %474 : vector<16x16xf32>
    %c0_109 = arith.constant 0 : index
    %c5_110 = arith.constant 5 : index
    %476 = vector.load %arg6[%c0_109, %c5_110] : memref<22x22xf32, #tpu.memory_space<vmem>>, vector<22x16xf32>
    %c0_111 = arith.constant 0 : index
    %c5_112 = arith.constant 5 : index
    %477 = vector.load %arg7[%c0_111, %c5_112] : memref<22x22xf32, #tpu.memory_space<vmem>>, vector<22x16xf32>
    %c5_113 = arith.constant 5 : index
    %478 = memref.load %arg4[%c5_113] : memref<98xf32, #tpu.memory_space<smem>>
    %c54 = arith.constant 54 : index
    %479 = memref.load %arg4[%c54] : memref<98xf32, #tpu.memory_space<smem>>
    %480 = vector.extract_strided_slice %476 {offsets = [0, 0], sizes = [16, 16], strides = [1, 1]} : vector<22x16xf32> to vector<16x16xf32>
    %481 = vector.broadcast %478 : f32 to vector<16x16xf32>
    %482 = arith.mulf %481, %480 : vector<16x16xf32>
    %483 = arith.addf %461, %482 : vector<16x16xf32>
    %484 = vector.extract_strided_slice %477 {offsets = [0, 0], sizes = [16, 16], strides = [1, 1]} : vector<22x16xf32> to vector<16x16xf32>
    %485 = vector.broadcast %479 : f32 to vector<16x16xf32>
    %486 = arith.mulf %485, %484 : vector<16x16xf32>
    %487 = arith.addf %465, %486 : vector<16x16xf32>
    %c12_114 = arith.constant 12 : index
    %488 = memref.load %arg4[%c12_114] : memref<98xf32, #tpu.memory_space<smem>>
    %c61 = arith.constant 61 : index
    %489 = memref.load %arg4[%c61] : memref<98xf32, #tpu.memory_space<smem>>
    %490 = vector.extract_strided_slice %476 {offsets = [1, 0], sizes = [16, 16], strides = [1, 1]} : vector<22x16xf32> to vector<16x16xf32>
    %491 = vector.broadcast %488 : f32 to vector<16x16xf32>
    %492 = arith.mulf %491, %490 : vector<16x16xf32>
    %493 = arith.addf %471, %492 : vector<16x16xf32>
    %494 = vector.extract_strided_slice %477 {offsets = [1, 0], sizes = [16, 16], strides = [1, 1]} : vector<22x16xf32> to vector<16x16xf32>
    %495 = vector.broadcast %489 : f32 to vector<16x16xf32>
    %496 = arith.mulf %495, %494 : vector<16x16xf32>
    %497 = arith.addf %475, %496 : vector<16x16xf32>
    %c19 = arith.constant 19 : index
    %498 = memref.load %arg4[%c19] : memref<98xf32, #tpu.memory_space<smem>>
    %c68 = arith.constant 68 : index
    %499 = memref.load %arg4[%c68] : memref<98xf32, #tpu.memory_space<smem>>
    %500 = vector.extract_strided_slice %476 {offsets = [2, 0], sizes = [16, 16], strides = [1, 1]} : vector<22x16xf32> to vector<16x16xf32>
    %501 = vector.broadcast %498 : f32 to vector<16x16xf32>
    %502 = arith.mulf %501, %500 : vector<16x16xf32>
    %503 = arith.addf %483, %502 : vector<16x16xf32>
    %504 = vector.extract_strided_slice %477 {offsets = [2, 0], sizes = [16, 16], strides = [1, 1]} : vector<22x16xf32> to vector<16x16xf32>
    %505 = vector.broadcast %499 : f32 to vector<16x16xf32>
    %506 = arith.mulf %505, %504 : vector<16x16xf32>
    %507 = arith.addf %487, %506 : vector<16x16xf32>
    %c26 = arith.constant 26 : index
    %508 = memref.load %arg4[%c26] : memref<98xf32, #tpu.memory_space<smem>>
    %c75 = arith.constant 75 : index
    %509 = memref.load %arg4[%c75] : memref<98xf32, #tpu.memory_space<smem>>
    %510 = vector.extract_strided_slice %476 {offsets = [3, 0], sizes = [16, 16], strides = [1, 1]} : vector<22x16xf32> to vector<16x16xf32>
    %511 = vector.broadcast %508 : f32 to vector<16x16xf32>
    %512 = arith.mulf %511, %510 : vector<16x16xf32>
    %513 = arith.addf %493, %512 : vector<16x16xf32>
    %514 = vector.extract_strided_slice %477 {offsets = [3, 0], sizes = [16, 16], strides = [1, 1]} : vector<22x16xf32> to vector<16x16xf32>
    %515 = vector.broadcast %509 : f32 to vector<16x16xf32>
    %516 = arith.mulf %515, %514 : vector<16x16xf32>
    %517 = arith.addf %497, %516 : vector<16x16xf32>
    %c33 = arith.constant 33 : index
    %518 = memref.load %arg4[%c33] : memref<98xf32, #tpu.memory_space<smem>>
    %c82 = arith.constant 82 : index
    %519 = memref.load %arg4[%c82] : memref<98xf32, #tpu.memory_space<smem>>
    %520 = vector.extract_strided_slice %476 {offsets = [4, 0], sizes = [16, 16], strides = [1, 1]} : vector<22x16xf32> to vector<16x16xf32>
    %521 = vector.broadcast %518 : f32 to vector<16x16xf32>
    %522 = arith.mulf %521, %520 : vector<16x16xf32>
    %523 = arith.addf %503, %522 : vector<16x16xf32>
    %524 = vector.extract_strided_slice %477 {offsets = [4, 0], sizes = [16, 16], strides = [1, 1]} : vector<22x16xf32> to vector<16x16xf32>
    %525 = vector.broadcast %519 : f32 to vector<16x16xf32>
    %526 = arith.mulf %525, %524 : vector<16x16xf32>
    %527 = arith.addf %507, %526 : vector<16x16xf32>
    %c40 = arith.constant 40 : index
    %528 = memref.load %arg4[%c40] : memref<98xf32, #tpu.memory_space<smem>>
    %c89 = arith.constant 89 : index
    %529 = memref.load %arg4[%c89] : memref<98xf32, #tpu.memory_space<smem>>
    %530 = vector.extract_strided_slice %476 {offsets = [5, 0], sizes = [16, 16], strides = [1, 1]} : vector<22x16xf32> to vector<16x16xf32>
    %531 = vector.broadcast %528 : f32 to vector<16x16xf32>
    %532 = arith.mulf %531, %530 : vector<16x16xf32>
    %533 = arith.addf %513, %532 : vector<16x16xf32>
    %534 = vector.extract_strided_slice %477 {offsets = [5, 0], sizes = [16, 16], strides = [1, 1]} : vector<22x16xf32> to vector<16x16xf32>
    %535 = vector.broadcast %529 : f32 to vector<16x16xf32>
    %536 = arith.mulf %535, %534 : vector<16x16xf32>
    %537 = arith.addf %517, %536 : vector<16x16xf32>
    %c47 = arith.constant 47 : index
    %538 = memref.load %arg4[%c47] : memref<98xf32, #tpu.memory_space<smem>>
    %c96 = arith.constant 96 : index
    %539 = memref.load %arg4[%c96] : memref<98xf32, #tpu.memory_space<smem>>
    %540 = vector.extract_strided_slice %476 {offsets = [6, 0], sizes = [16, 16], strides = [1, 1]} : vector<22x16xf32> to vector<16x16xf32>
    %541 = vector.broadcast %538 : f32 to vector<16x16xf32>
    %542 = arith.mulf %541, %540 : vector<16x16xf32>
    %543 = arith.addf %523, %542 : vector<16x16xf32>
    %544 = vector.extract_strided_slice %477 {offsets = [6, 0], sizes = [16, 16], strides = [1, 1]} : vector<22x16xf32> to vector<16x16xf32>
    %545 = vector.broadcast %539 : f32 to vector<16x16xf32>
    %546 = arith.mulf %545, %544 : vector<16x16xf32>
    %547 = arith.addf %527, %546 : vector<16x16xf32>
    %c0_115 = arith.constant 0 : index
    %c6_116 = arith.constant 6 : index
    %548 = vector.load %arg6[%c0_115, %c6_116] : memref<22x22xf32, #tpu.memory_space<vmem>>, vector<22x16xf32>
    %c0_117 = arith.constant 0 : index
    %c6_118 = arith.constant 6 : index
    %549 = vector.load %arg7[%c0_117, %c6_118] : memref<22x22xf32, #tpu.memory_space<vmem>>, vector<22x16xf32>
    %c6_119 = arith.constant 6 : index
    %550 = memref.load %arg4[%c6_119] : memref<98xf32, #tpu.memory_space<smem>>
    %c55 = arith.constant 55 : index
    %551 = memref.load %arg4[%c55] : memref<98xf32, #tpu.memory_space<smem>>
    %552 = vector.extract_strided_slice %548 {offsets = [0, 0], sizes = [16, 16], strides = [1, 1]} : vector<22x16xf32> to vector<16x16xf32>
    %553 = vector.broadcast %550 : f32 to vector<16x16xf32>
    %554 = arith.mulf %553, %552 : vector<16x16xf32>
    %555 = arith.addf %533, %554 : vector<16x16xf32>
    %556 = vector.extract_strided_slice %549 {offsets = [0, 0], sizes = [16, 16], strides = [1, 1]} : vector<22x16xf32> to vector<16x16xf32>
    %557 = vector.broadcast %551 : f32 to vector<16x16xf32>
    %558 = arith.mulf %557, %556 : vector<16x16xf32>
    %559 = arith.addf %537, %558 : vector<16x16xf32>
    %c13_120 = arith.constant 13 : index
    %560 = memref.load %arg4[%c13_120] : memref<98xf32, #tpu.memory_space<smem>>
    %c62 = arith.constant 62 : index
    %561 = memref.load %arg4[%c62] : memref<98xf32, #tpu.memory_space<smem>>
    %562 = vector.extract_strided_slice %548 {offsets = [1, 0], sizes = [16, 16], strides = [1, 1]} : vector<22x16xf32> to vector<16x16xf32>
    %563 = vector.broadcast %560 : f32 to vector<16x16xf32>
    %564 = arith.mulf %563, %562 : vector<16x16xf32>
    %565 = arith.addf %543, %564 : vector<16x16xf32>
    %566 = vector.extract_strided_slice %549 {offsets = [1, 0], sizes = [16, 16], strides = [1, 1]} : vector<22x16xf32> to vector<16x16xf32>
    %567 = vector.broadcast %561 : f32 to vector<16x16xf32>
    %568 = arith.mulf %567, %566 : vector<16x16xf32>
    %569 = arith.addf %547, %568 : vector<16x16xf32>
    %c20 = arith.constant 20 : index
    %570 = memref.load %arg4[%c20] : memref<98xf32, #tpu.memory_space<smem>>
    %c69 = arith.constant 69 : index
    %571 = memref.load %arg4[%c69] : memref<98xf32, #tpu.memory_space<smem>>
    %572 = vector.extract_strided_slice %548 {offsets = [2, 0], sizes = [16, 16], strides = [1, 1]} : vector<22x16xf32> to vector<16x16xf32>
    %573 = vector.broadcast %570 : f32 to vector<16x16xf32>
    %574 = arith.mulf %573, %572 : vector<16x16xf32>
    %575 = arith.addf %555, %574 : vector<16x16xf32>
    %576 = vector.extract_strided_slice %549 {offsets = [2, 0], sizes = [16, 16], strides = [1, 1]} : vector<22x16xf32> to vector<16x16xf32>
    %577 = vector.broadcast %571 : f32 to vector<16x16xf32>
    %578 = arith.mulf %577, %576 : vector<16x16xf32>
    %579 = arith.addf %559, %578 : vector<16x16xf32>
    %c27 = arith.constant 27 : index
    %580 = memref.load %arg4[%c27] : memref<98xf32, #tpu.memory_space<smem>>
    %c76 = arith.constant 76 : index
    %581 = memref.load %arg4[%c76] : memref<98xf32, #tpu.memory_space<smem>>
    %582 = vector.extract_strided_slice %548 {offsets = [3, 0], sizes = [16, 16], strides = [1, 1]} : vector<22x16xf32> to vector<16x16xf32>
    %583 = vector.broadcast %580 : f32 to vector<16x16xf32>
    %584 = arith.mulf %583, %582 : vector<16x16xf32>
    %585 = arith.addf %565, %584 : vector<16x16xf32>
    %586 = vector.extract_strided_slice %549 {offsets = [3, 0], sizes = [16, 16], strides = [1, 1]} : vector<22x16xf32> to vector<16x16xf32>
    %587 = vector.broadcast %581 : f32 to vector<16x16xf32>
    %588 = arith.mulf %587, %586 : vector<16x16xf32>
    %589 = arith.addf %569, %588 : vector<16x16xf32>
    %c34 = arith.constant 34 : index
    %590 = memref.load %arg4[%c34] : memref<98xf32, #tpu.memory_space<smem>>
    %c83 = arith.constant 83 : index
    %591 = memref.load %arg4[%c83] : memref<98xf32, #tpu.memory_space<smem>>
    %592 = vector.extract_strided_slice %548 {offsets = [4, 0], sizes = [16, 16], strides = [1, 1]} : vector<22x16xf32> to vector<16x16xf32>
    %593 = vector.broadcast %590 : f32 to vector<16x16xf32>
    %594 = arith.mulf %593, %592 : vector<16x16xf32>
    %595 = arith.addf %575, %594 : vector<16x16xf32>
    %596 = vector.extract_strided_slice %549 {offsets = [4, 0], sizes = [16, 16], strides = [1, 1]} : vector<22x16xf32> to vector<16x16xf32>
    %597 = vector.broadcast %591 : f32 to vector<16x16xf32>
    %598 = arith.mulf %597, %596 : vector<16x16xf32>
    %599 = arith.addf %579, %598 : vector<16x16xf32>
    %c41 = arith.constant 41 : index
    %600 = memref.load %arg4[%c41] : memref<98xf32, #tpu.memory_space<smem>>
    %c90 = arith.constant 90 : index
    %601 = memref.load %arg4[%c90] : memref<98xf32, #tpu.memory_space<smem>>
    %602 = vector.extract_strided_slice %548 {offsets = [5, 0], sizes = [16, 16], strides = [1, 1]} : vector<22x16xf32> to vector<16x16xf32>
    %603 = vector.broadcast %600 : f32 to vector<16x16xf32>
    %604 = arith.mulf %603, %602 : vector<16x16xf32>
    %605 = arith.addf %585, %604 : vector<16x16xf32>
    %606 = vector.extract_strided_slice %549 {offsets = [5, 0], sizes = [16, 16], strides = [1, 1]} : vector<22x16xf32> to vector<16x16xf32>
    %607 = vector.broadcast %601 : f32 to vector<16x16xf32>
    %608 = arith.mulf %607, %606 : vector<16x16xf32>
    %609 = arith.addf %589, %608 : vector<16x16xf32>
    %c48 = arith.constant 48 : index
    %610 = memref.load %arg4[%c48] : memref<98xf32, #tpu.memory_space<smem>>
    %c97 = arith.constant 97 : index
    %611 = memref.load %arg4[%c97] : memref<98xf32, #tpu.memory_space<smem>>
    %612 = vector.extract_strided_slice %548 {offsets = [6, 0], sizes = [16, 16], strides = [1, 1]} : vector<22x16xf32> to vector<16x16xf32>
    %613 = vector.broadcast %610 : f32 to vector<16x16xf32>
    %614 = arith.mulf %613, %612 : vector<16x16xf32>
    %615 = arith.addf %595, %614 : vector<16x16xf32>
    %616 = vector.extract_strided_slice %549 {offsets = [6, 0], sizes = [16, 16], strides = [1, 1]} : vector<22x16xf32> to vector<16x16xf32>
    %617 = vector.broadcast %611 : f32 to vector<16x16xf32>
    %618 = arith.mulf %617, %616 : vector<16x16xf32>
    %619 = arith.addf %599, %618 : vector<16x16xf32>
    %620 = arith.addf %615, %619 : vector<16x16xf32>
    %621 = arith.addf %605, %609 : vector<16x16xf32>
    %622 = arith.addf %620, %621 : vector<16x16xf32>
    %623 = arith.negf %622 : vector<16x16xf32>
    %624 = math.exp %623 : vector<16x16xf32>
    %cst_121 = arith.constant 1.000000e+00 : f32
    %625 = vector.broadcast %cst_121 : f32 to vector<16x16xf32>
    %626 = arith.addf %625, %624 : vector<16x16xf32>
    %627 = arith.divf %625, %626 : vector<16x16xf32>
    %628 = vector.extract_strided_slice %627 {offsets = [0, 0], sizes = [1, 16], strides = [1, 1]} : vector<16x16xf32> to vector<1x16xf32>
    %c0_122 = arith.constant 0 : index
    %c0_123 = arith.constant 0 : index
    %629 = vector.load %arg8[%c0_122, %c0_123] : memref<1x256xf32, #tpu.memory_space<vmem>>, vector<1x16xf32>
    tpu.vector_store %arg8[%c0_122, %c0_123], %628 {strides = array<i32>} : memref<1x256xf32, #tpu.memory_space<vmem>>, vector<1x16xf32>,
    %630 = vector.extract_strided_slice %627 {offsets = [1, 0], sizes = [1, 16], strides = [1, 1]} : vector<16x16xf32> to vector<1x16xf32>
    %c0_124 = arith.constant 0 : index
    %c16_125 = arith.constant 16 : index
    %631 = vector.load %arg8[%c0_124, %c16_125] : memref<1x256xf32, #tpu.memory_space<vmem>>, vector<1x16xf32>
    tpu.vector_store %arg8[%c0_124, %c16_125], %630 {strides = array<i32>} : memref<1x256xf32, #tpu.memory_space<vmem>>, vector<1x16xf32>,
    %632 = vector.extract_strided_slice %627 {offsets = [2, 0], sizes = [1, 16], strides = [1, 1]} : vector<16x16xf32> to vector<1x16xf32>
    %c0_126 = arith.constant 0 : index
    %c32_127 = arith.constant 32 : index
    %633 = vector.load %arg8[%c0_126, %c32_127] : memref<1x256xf32, #tpu.memory_space<vmem>>, vector<1x16xf32>
    tpu.vector_store %arg8[%c0_126, %c32_127], %632 {strides = array<i32>} : memref<1x256xf32, #tpu.memory_space<vmem>>, vector<1x16xf32>,
    %634 = vector.extract_strided_slice %627 {offsets = [3, 0], sizes = [1, 16], strides = [1, 1]} : vector<16x16xf32> to vector<1x16xf32>
    %c0_128 = arith.constant 0 : index
    %c48_129 = arith.constant 48 : index
    %635 = vector.load %arg8[%c0_128, %c48_129] : memref<1x256xf32, #tpu.memory_space<vmem>>, vector<1x16xf32>
    tpu.vector_store %arg8[%c0_128, %c48_129], %634 {strides = array<i32>} : memref<1x256xf32, #tpu.memory_space<vmem>>, vector<1x16xf32>,
    %636 = vector.extract_strided_slice %627 {offsets = [4, 0], sizes = [1, 16], strides = [1, 1]} : vector<16x16xf32> to vector<1x16xf32>
    %c0_130 = arith.constant 0 : index
    %c64_131 = arith.constant 64 : index
    %637 = vector.load %arg8[%c0_130, %c64_131] : memref<1x256xf32, #tpu.memory_space<vmem>>, vector<1x16xf32>
    tpu.vector_store %arg8[%c0_130, %c64_131], %636 {strides = array<i32>} : memref<1x256xf32, #tpu.memory_space<vmem>>, vector<1x16xf32>,
    %638 = vector.extract_strided_slice %627 {offsets = [5, 0], sizes = [1, 16], strides = [1, 1]} : vector<16x16xf32> to vector<1x16xf32>
    %c0_132 = arith.constant 0 : index
    %c80_133 = arith.constant 80 : index
    %639 = vector.load %arg8[%c0_132, %c80_133] : memref<1x256xf32, #tpu.memory_space<vmem>>, vector<1x16xf32>
    tpu.vector_store %arg8[%c0_132, %c80_133], %638 {strides = array<i32>} : memref<1x256xf32, #tpu.memory_space<vmem>>, vector<1x16xf32>,
    %640 = vector.extract_strided_slice %627 {offsets = [6, 0], sizes = [1, 16], strides = [1, 1]} : vector<16x16xf32> to vector<1x16xf32>
    %c0_134 = arith.constant 0 : index
    %c96_135 = arith.constant 96 : index
    %641 = vector.load %arg8[%c0_134, %c96_135] : memref<1x256xf32, #tpu.memory_space<vmem>>, vector<1x16xf32>
    tpu.vector_store %arg8[%c0_134, %c96_135], %640 {strides = array<i32>} : memref<1x256xf32, #tpu.memory_space<vmem>>, vector<1x16xf32>,
    %642 = vector.extract_strided_slice %627 {offsets = [7, 0], sizes = [1, 16], strides = [1, 1]} : vector<16x16xf32> to vector<1x16xf32>
    %c0_136 = arith.constant 0 : index
    %c112 = arith.constant 112 : index
    %643 = vector.load %arg8[%c0_136, %c112] : memref<1x256xf32, #tpu.memory_space<vmem>>, vector<1x16xf32>
    tpu.vector_store %arg8[%c0_136, %c112], %642 {strides = array<i32>} : memref<1x256xf32, #tpu.memory_space<vmem>>, vector<1x16xf32>,
    %644 = vector.extract_strided_slice %627 {offsets = [8, 0], sizes = [1, 16], strides = [1, 1]} : vector<16x16xf32> to vector<1x16xf32>
    %c0_137 = arith.constant 0 : index
    %c128 = arith.constant 128 : index
    %645 = vector.load %arg8[%c0_137, %c128] : memref<1x256xf32, #tpu.memory_space<vmem>>, vector<1x16xf32>
    tpu.vector_store %arg8[%c0_137, %c128], %644 {strides = array<i32>} : memref<1x256xf32, #tpu.memory_space<vmem>>, vector<1x16xf32>,
    %646 = vector.extract_strided_slice %627 {offsets = [9, 0], sizes = [1, 16], strides = [1, 1]} : vector<16x16xf32> to vector<1x16xf32>
    %c0_138 = arith.constant 0 : index
    %c144 = arith.constant 144 : index
    %647 = vector.load %arg8[%c0_138, %c144] : memref<1x256xf32, #tpu.memory_space<vmem>>, vector<1x16xf32>
    tpu.vector_store %arg8[%c0_138, %c144], %646 {strides = array<i32>} : memref<1x256xf32, #tpu.memory_space<vmem>>, vector<1x16xf32>,
    %648 = vector.extract_strided_slice %627 {offsets = [10, 0], sizes = [1, 16], strides = [1, 1]} : vector<16x16xf32> to vector<1x16xf32>
    %c0_139 = arith.constant 0 : index
    %c160 = arith.constant 160 : index
    %649 = vector.load %arg8[%c0_139, %c160] : memref<1x256xf32, #tpu.memory_space<vmem>>, vector<1x16xf32>
    tpu.vector_store %arg8[%c0_139, %c160], %648 {strides = array<i32>} : memref<1x256xf32, #tpu.memory_space<vmem>>, vector<1x16xf32>,
    %650 = vector.extract_strided_slice %627 {offsets = [11, 0], sizes = [1, 16], strides = [1, 1]} : vector<16x16xf32> to vector<1x16xf32>
    %c0_140 = arith.constant 0 : index
    %c176 = arith.constant 176 : index
    %651 = vector.load %arg8[%c0_140, %c176] : memref<1x256xf32, #tpu.memory_space<vmem>>, vector<1x16xf32>
    tpu.vector_store %arg8[%c0_140, %c176], %650 {strides = array<i32>} : memref<1x256xf32, #tpu.memory_space<vmem>>, vector<1x16xf32>,
    %652 = vector.extract_strided_slice %627 {offsets = [12, 0], sizes = [1, 16], strides = [1, 1]} : vector<16x16xf32> to vector<1x16xf32>
    %c0_141 = arith.constant 0 : index
    %c192 = arith.constant 192 : index
    %653 = vector.load %arg8[%c0_141, %c192] : memref<1x256xf32, #tpu.memory_space<vmem>>, vector<1x16xf32>
    tpu.vector_store %arg8[%c0_141, %c192], %652 {strides = array<i32>} : memref<1x256xf32, #tpu.memory_space<vmem>>, vector<1x16xf32>,
    %654 = vector.extract_strided_slice %627 {offsets = [13, 0], sizes = [1, 16], strides = [1, 1]} : vector<16x16xf32> to vector<1x16xf32>
    %c0_142 = arith.constant 0 : index
    %c208 = arith.constant 208 : index
    %655 = vector.load %arg8[%c0_142, %c208] : memref<1x256xf32, #tpu.memory_space<vmem>>, vector<1x16xf32>
    tpu.vector_store %arg8[%c0_142, %c208], %654 {strides = array<i32>} : memref<1x256xf32, #tpu.memory_space<vmem>>, vector<1x16xf32>,
    %656 = vector.extract_strided_slice %627 {offsets = [14, 0], sizes = [1, 16], strides = [1, 1]} : vector<16x16xf32> to vector<1x16xf32>
    %c0_143 = arith.constant 0 : index
    %c224 = arith.constant 224 : index
    %657 = vector.load %arg8[%c0_143, %c224] : memref<1x256xf32, #tpu.memory_space<vmem>>, vector<1x16xf32>
    tpu.vector_store %arg8[%c0_143, %c224], %656 {strides = array<i32>} : memref<1x256xf32, #tpu.memory_space<vmem>>, vector<1x16xf32>,
    %658 = vector.extract_strided_slice %627 {offsets = [15, 0], sizes = [1, 16], strides = [1, 1]} : vector<16x16xf32> to vector<1x16xf32>
    %c0_144 = arith.constant 0 : index
    %c240 = arith.constant 240 : index
    %659 = vector.load %arg8[%c0_144, %c240] : memref<1x256xf32, #tpu.memory_space<vmem>>, vector<1x16xf32>
    tpu.vector_store %arg8[%c0_144, %c240], %658 {strides = array<i32>} : memref<1x256xf32, #tpu.memory_space<vmem>>, vector<1x16xf32>,
    %c0_145 = arith.constant 0 : index
    %c0_146 = arith.constant 0 : index
    %660 = vector.load %arg8[%c0_145, %c0_146] : memref<1x256xf32, #tpu.memory_space<vmem>>, vector<1x256xf32>
    %661 = vector.broadcast %660 : vector<1x256xf32> to vector<16x256xf32>
    %662 = arith.mulf %41, %661 : vector<16x256xf32>
    %c0_147 = arith.constant 0 : index
    %c0_148 = arith.constant 0 : index
    %c0_149 = arith.constant 0 : index
    %663 = vector.load %arg5[%c0_147, %c0_148, %c0_149] : memref<1x16x256xf32, #tpu.memory_space<vmem>>, vector<1x16x256xf32>
    %664 = vector.shape_cast %663 : vector<1x16x256xf32> to vector<16x256xf32>
    %665 = vector.shape_cast %662 : vector<16x256xf32> to vector<1x16x256xf32>
    tpu.vector_store %arg5[%c0_147, %c0_148, %c0_149], %665 {strides = array<i32>} : memref<1x16x256xf32, #tpu.memory_space<vmem>>, vector<1x16x256xf32>,
    return
  }
  func.func @transform_0(%arg0: i32) -> (i32, i32, i32) {
    %c0_i32 = arith.constant 0 : i32
    %c0_i32_0 = arith.constant 0 : i32
    %c0_i32_1 = arith.constant 0 : i32
    return %arg0, %c0_i32, %c0_i32_0 : i32, i32, i32
  }
  func.func @transform_1(%arg0: i32) -> (i32, i32) {
    %c0_i32 = arith.constant 0 : i32
    %c0_i32_0 = arith.constant 0 : i32
    %c0_i32_1 = arith.constant 0 : i32
    return %c0_i32, %c0_i32_0 : i32, i32
  }
  func.func @transform_2(%arg0: i32) -> (i32, i32) {
    %c0_i32 = arith.constant 0 : i32
    %c0_i32_0 = arith.constant 0 : i32
    %c0_i32_1 = arith.constant 0 : i32
    return %c0_i32, %c0_i32_0 : i32, i32
  }
  func.func @transform_3(%arg0: i32) -> i32 {
    %c0_i32 = arith.constant 0 : i32
    %c0_i32_0 = arith.constant 0 : i32
    return %c0_i32 : i32
  }
  func.func @transform_4(%arg0: i32) -> (i32, i32, i32) {
    %c0_i32 = arith.constant 0 : i32
    %c0_i32_0 = arith.constant 0 : i32
    %c0_i32_1 = arith.constant 0 : i32
    return %arg0, %c0_i32, %c0_i32_0 : i32, i32, i32
  }
}

</mosaic_0001>

<bundles_post_ra>
// kernel: tpu_custom_call.1
= control target key start
LH: loop header
LB: loop body
LE: loop exit
PB: predicated region body
PF: predicated region fallthrough
CT: control target
= control target key end

     0   :  { %s5694_s0 = inlined_call_operand.hbm [shape: f32[2,16,256], index: 0, kind: input, shape index: {}]   ;;  %s5695_s1 = inlined_call_operand.vmem [shape: f32[16,2], index: 1, kind: input, shape index: {}]   ;;  %s5696_s2 = inlined_call_operand.vmem [shape: f32[16,2], index: 2, kind: input, shape index: {}]   ;;  %s5697_s3 = inlined_call_operand.vmem [shape: f32[98], index: 3, kind: input, shape index: {}]   ;;  %s5698_s4 = inlined_call_operand.hbm [shape: f32[2,16,256], index: 4, kind: output, shape index: {}]  }
   0x1   :  { %5788 = sst [smem:[#allocation112_spill]] %s5697_s3 }
   0x2   :  { %9 = vsyncpa [#allocation6], 0 }
   0x3   :  { %11 = vsyncpa [#allocation6 + $0x1], 0 }
   0x4   :  { %12 = vsyncpa [#allocation8], 0 }
   0x5   :  { %13 = vsyncpa [#allocation7], 0 }
   0x6   :  { %15 = vsyncpa [#allocation7 + $0x1], 0  ;;  %s3259_s15 = smov 0   ;;  %s3261_s16 = smov 0  }
   0x7   :  { %s3263_s17 = smov 0   ;;  %s3265_s18 = smov 0  }
   0x8 LB: > { %s3280_s19 = sadd.s32 4294967295, %s3206_s18   ;;  %s2862_s20 = sadd.s32 4294967294, %s3206_s18   ;;  %s3206_s18 = sphi %s3265_s18, %s6091_s18   ;;  %s3202_s17 = sphi %s3263_s17, %s6090_s17   ;;  %s3198_s16 = sphi %s3261_s16, %s6089_s16   ;;  %s3194_s15 = sphi %s3259_s15, %s6088_s15  }
   0x9   : > { %s3284_s21 = sadd.s32 1, %s3206_s18   ;;  %s28_s22 = sadd.s32 1, %s3202_s17 }
   0xa   : > { %s25_s23 = ssub.s32 %s3206_s18, %s3284_s21  ;;  %p35_p0 = scmp.ne.s32.totalorder %s3202_s17, %s3198_s16 }
   0xb   : > { %p26_p1 = scmp.eq.s32.totalorder %s25_s23, 0  ;;  %p36_p2 = scmp.eq.s32.totalorder %s3206_s18, 0 }
   0xc   : > { %p41_p3 = scmp.ne.s32.totalorder %s3198_s16, %s3194_s15  ;;  %p42_p4 = scmp.eq.s32.totalorder %s3280_s19, 0 }
   0xd   : > { %s3296_s24 = scalar_select %p26_p1, %s3202_s17, %s28_s22  }
   0xe   : > { %p3298_p5 = por %p36_p2, %p35_p0  ;;  %p3304_p6 = por %p42_p4, %p41_p3 }
   0xf   : > { %p128_p7 = scmp.eq.s32.totalorder %s3280_s19, 1  ;;  %p134_p8 = scmp.eq.s32.totalorder %s2862_s20, 1 }
  0x10   : > { %p2863_p9 = scmp.ge.s32.totalorder %s3206_s18, 1  ;;  %p141_p10 = scmp.lt.s32.totalorder %s3206_s18, 3 }
  0x11   : > { %p3311_p11 = por %p128_p7, %p35_p0  ;;  %p3315_p12 = por %p134_p8, %p41_p3 }
  0x12   : > { %p3319_p13 = pnand %p2863_p9, %p141_p10  ;;  %s5794_s3 = sld [smem:[#allocation112_spill]] }
  0x13   : > { %p3002_p2 = scmp.lt.s32.totalorder %s3206_s18, 2  ;;  %s170_s7 = sand.u32 1, %s3202_s17  }
  0x14   : > { %p2989_p1 = pneg %p3319_p13  ;;  %s2866_s9 = sshll.u32 %s170_s7, 5 }
  0x15   : > { %p3335_p3 = pnand %p3002_p2, %p3298_p5  ;;  %s3208_s10 = smov [#allocation9]  }
  0x16   : > { %p2990_p7 = pnand %p2989_p1, %p42_p4  ;;  %s2979_s11 = sshll.u32 %s3206_s18, 5 }
  0x17   : > { %s174_s12 = scalar_lea.vmem [#allocation5], %s2866_s9  ;;  %s179_s22 = scalar_lea.hbm %s5694_s0, %s2979_s11 }
  0x18   : > { %s159_s6 = sshll.u32 %s5794_s3, 4  ;;  %s182_s13 = sshll.u32 %s174_s12, 4  ;;  %s160_s6 = int_to_ptr.vmem [resolvable:$true] %s159_s6  ;;  %s183_s13 = int_to_ptr.vmem [resolvable:$true] %s182_s13 }
  0x19   : > { %2992 = dma.vmem_to_smem (!%p2990_p7), %s160_s6, 16, %s3208_s10, [#allocation8]  }
  0x1a   : > { %s180_s23 = sshll.u32 %s179_s22, 4  ;;  %s171_s30 = scalar_lea.sflag [#allocation6], %s170_s7  ;;  %s181_s23 = int_to_ptr.hbm [resolvable:$true] %s180_s23 }
  0x1b   : > { %s3106_s25 = sshra.s32 %s181_s23, 4  ;;  %p3110_p8 = pneg %p3335_p3  ;;  %s3107_s25 = int_to_ptr.hbm [resolvable:$true] %s3106_s25 }
  0x1c   : > { %s3108_s5 = scalar_lea.hbm %s3107_s25, 32  ;;  %s3113_s9 = scalar_lea.hbm %s5694_s0, 64 }
  0x1d   : > { %p3109_p5 = scmp.ne.s32.totalorder %s3107_s25, %s3108_s5  ;;  %p3114_p1 = scmp.lt.s32.totalorder %s3107_s25, %s5694_s0 }
  0x1e   : > { %p3115_p2 = scmp.lt.s32.totalorder %s3113_s9, %s3108_s5 }
  0x1f   : > { %p3111_p9 = pnand %p3110_p8, %p3109_p5 }
  0x20   : > { %p3116_p7 = por %p3115_p2, %p3114_p1 }
  0x21   : > { %p3112_p10 = pneg %p3111_p9 }
  0x23   : > { %p3117_p0 = pnand %p3116_p7, %p3112_p10 }
  0x25   : > { %3120 = shalt.err (!%p3117_p0)
}
  0x26   : > { %s3209_s7 = smov 256   ;;  %s3210_s11 = smov 16  }
  0x27   : > { %2996 = dma.hbm_to_vmem [thread:$0]  (!%p3335_p3), %s181_s23, 512, %s183_s13, %s171_s30, %s3209_s7, %s3209_s7, %s3210_s11  }
  0x28   : > { %194 = sbr.rel (%p3319_p13) target bundleno = 1432 (0x598), region = 36 }
  0x2d   : > { %s3356_s14 = sand.u32 1, %s3198_s16  }
  0x2e   : > { %s2870_s3 = sshll.u32 %s3356_s14, 5  ;;  %s197_s20 = scalar_lea.sflag [#allocation6], %s3356_s14 }
  0x2f   : > { %s200_s22 = scalar_lea.vmem [#allocation5], %s2870_s3 }
  0x30   : > { %3181 = dma.done.wait (%p3304_p6), %s197_s20, 512  }
  0x31   : > { %3183 = vsyncadd (%p3304_p6), %s197_s20, 4294966784 }
  0x32   : > { %3185 = dma.done.wait (%p42_p4), [#allocation8], 16  }
  0x33   : > { %3187 = vsyncadd (%p42_p4), [#allocation8], 4294967280 }
  0x34   : > { %211 = sfence }
  0x35   : > { %v3370_v0 = vld [vmem:[%s200_s22] sm:$0xff]  ;;  %v3372_v1 = vld [vmem:[%s200_s22 + $0x8] sm:$0xff]  ;;  %v3378_v4 = vld [vmem:[%s200_s22 + $0x10] sm:$0xff]  ;;  %vm264_vm0 = vcmask 15360   ;;  %s3211_s6 = smov 67   ;;  %s3212_s10 = smov 115  }
  0x36   : > { %v256_v2 = vmax.f32 %v3370_v0, %v3372_v1  ;;  %v248_v3 = vadd.f32 %v3372_v1, %v3370_v0  ;;  %v3380_v5 = vld [vmem:[%s200_s22 + $0x18] sm:$0xff]  ;;  %v240_v10 = vld [vmem:[%s5695_s1] sm:$0xff]  ;;  %v241_v13 = vld [vmem:[%s5695_s1 + $0x8] sm:$0xff]  ;;  %s3213_s9 = smov 3   ;;  %s3214_s12 = smov 19   ;;  %vm232_vm9 = vcmask 179200  }
  0x37   : > { %v259_v6 = vmax.f32 %v3378_v4, %v3380_v5  ;;  %v251_v7 = vadd.f32 %v3380_v5, %v3378_v4  ;;  %v243_v37 = vld [vmem:[%s5696_s2 + $0x8] sm:$0xff]  ;;  %v242_v38 = vld [vmem:[%s5696_s2] sm:$0xff]  ;;  %s3215_s7 = smov 99   ;;  %s3216_s11 = smov 83   ;;  %vm381_vm10 = vcmask 147480   ;;  %vm235_vm11 = vcmask 177152  }
  0x38   : > { %257 = vmax.xlane.f32.xlu1 %v256_v2  ;;  %249 = vadd.xlane.f32.xlu0 %v248_v3  ;;  %s3217_s20 = smov 51   ;;  %s3218_s22 = smov 35   ;;  %vm732_vm12 = vcmask 1040384   ;;  %vm870_vm13 = vcmask 1044480   ;;  %vm963_vm14 = vcmask 1042432   ;;  %vm626_vm15 = vcmask 1043456  }
  0x39   : > { %s2905_s26 = sld [smem:[#allocation9 + $0x3a]]  ;;  %s3220_s8 = smov 126  }
  0x3a   : > { %s3464_s29 = sld [smem:[#allocation9 + $0x33]]  ;;  %s3221_s5 = smov 124  }
  0x3b   : > { %s2889_s13 = sld [smem:[#allocation9 + $0x32]] }
  0x3c   : > { %s3483_s23 = sld [smem:[#allocation9 + $0x35]] }
  0x3d   : > { %s2933_s30 = sld [smem:[#allocation9 + $0x3c]] }
  0x3e   : > { %s2897_s25 = sld [smem:[#allocation9 + $0x4e]] }
  0x40   : > { %260 = vmax.xlane.f32.xlu1 %v259_v6  ;;  %252 = vadd.xlane.f32.xlu0 %v251_v7 }
  0xab   : > { %v258_v8 = vpop.xlane.xlu1 %257  ;;  %v250_v9 = vpop.xlane.xlu0 %249 }
  0xac   : > { %v275_v11 = vmul.f32 %v258_v8, %v240_v10  ;;  %v254_v12 = vmul.f32 0.00390625, %v250_v9 }
  0xae   : > { %v277_v16 = vsel %vm264_vm0, %v275_v11, 0.0  ;;  %v262_v17 = vmul.f32 %v254_v12, %v240_v10 }
  0xb0   : > { %v265_v23 = vsel %vm264_vm0, %v262_v17, 0.0 }
  0xb3   : > { %v261_v14 = vpop.xlane.xlu1 %260  ;;  %v253_v15 = vpop.xlane.xlu0 %252 }
  0xb4   : > { %v276_v18 = vmul.f32 %v261_v14, %v241_v13  ;;  %v255_v19 = vmul.f32 0.00390625, %v253_v15 }
  0xb6   : > { %v278_v20 = vsel %vm264_vm0, %v276_v18, 0.0  ;;  %v263_v21 = vmul.f32 %v255_v19, %v241_v13 }
  0xb7   : > { %v279_v22 = vadd.f32 %v278_v20, %v277_v16 }
  0xb8   : > { %v266_v24 = vsel %vm264_vm0, %v263_v21, 0.0 }
  0xb9   : > { %v280_v25 = vrot.slane %v279_v22, 4  ;;  %v267_v26 = vadd.f32 %v266_v24, %v265_v23 }
  0xbb   : > { %v281_v27 = vadd.f32 %v280_v25, %v279_v22  ;;  %v268_v28 = vrot.slane %v267_v26, 4 }
  0xbd   : > { %v282_v29 = vrot.slane %v281_v27, 2  ;;  %v269_v30 = vadd.f32 %v268_v28, %v267_v26 }
  0xbf   : > { %v283_v31 = vadd.f32 %v282_v29, %v281_v27  ;;  %v270_v32 = vrot.slane %v269_v30, 2 }
  0xc1   : > { %v284_v33 = vrot.slane %v283_v31, 1  ;;  %v271_v34 = vadd.f32 %v270_v32, %v269_v30 }
  0xc3   : > { %v285_v35 = vadd.f32 %v284_v33, %v283_v31  ;;  %v272_v36 = vrot.slane %v271_v34, 1 }
  0xc5   : > { %v286_v39 = vmax.f32 %v285_v35, 0.0  ;;  %v273_v40 = vadd.f32 %v272_v36, %v271_v34 }
  0xc7   : > { %v296_v41 = vmul.f32 %v286_v39, %v243_v37  ;;  %v295_v42 = vmul.f32 %v286_v39, %v242_v38  ;;  %v274_v43 = vmax.f32 %v273_v40, 0.0 }
  0xc9   : > { %v300_v44 = vsel %vm264_vm0, %v296_v41, 0.0  ;;  %v297_v45 = vsel %vm264_vm0, %v295_v42, 0.0  ;;  %v287_v46 = vmul.f32 %v274_v43, %v242_v38  ;;  %v288_v48 = vmul.f32 %v274_v43, %v243_v37 }
  0xca   : > { %301 = vadd.xlane.f32.xlu1 %v300_v44  ;;  %298 = vadd.xlane.f32.xlu0 %v297_v45 }
  0xcb   : > { %v289_v47 = vsel %vm264_vm0, %v287_v46, 0.0  ;;  %v292_v49 = vsel %vm264_vm0, %v288_v48, 0.0  ;;  %vm777_vm0 = vcmask 1046528  }
  0xcc   : > { %290 = vadd.xlane.f32.xlu2 %v289_v47 }
  0xd4   : > { %293 = vadd.xlane.f32.xlu2 %v292_v49 }
 0x13d   : > { %v299_v50 = vpop.xlane.xlu0 %298  ;;  %v302_v54 = vpop.xlane.xlu1 %301 }
 0x13f   : > { %v291_v51 = vpop.xlane.xlu2 %290 }
 0x140   : > { %v303_v52 = vadd.f32 %v299_v50, %v291_v51 }
 0x142   : > { %v2873_v53 = vmul.f32 -1.442695, %v303_v52  ;;  %v3219_v52 = vmov 0.0  }
 0x143   : > { %237 = vst.msk [vmem:[#allocation3] sm:$0xff] %vm232_vm9, %v3219_v52 }
 0x144   : > { %3063 = vpow2.f32 %v2873_v53  ;;  %233 = vst.msk [vmem:[#allocation2] sm:$0xff] %vm232_vm9, %v3219_v52 }
 0x145   : > { %234 = vst.msk [vmem:[#allocation2 + $0x8] sm:$0xff] %vm232_vm9, %v3219_v52 }
 0x146   : > { %238 = vst.msk [vmem:[#allocation3 + $0x8] sm:$0xff] %vm232_vm9, %v3219_v52 }
 0x147   : > { %v294_v55 = vpop.xlane.xlu2 %293  ;;  %239 = vst.msk [vmem:[#allocation3 + $0x10] sm:$0x3f] %vm235_vm11, %v3219_v52 }
 0x148   : > { %v304_v56 = vadd.f32 %v302_v54, %v294_v55  ;;  %236 = vst.msk [vmem:[#allocation2 + $0x10] sm:$0x3f] %vm235_vm11, %v3219_v52 }
 0x14a   : > { %v3064_v57 = vpop.eup %3063  ;;  %v2874_v58 = vmul.f32 -1.442695, %v304_v56 }
 0x14b   : > { %v311_v59 = vadd.f32 1.0, %v3064_v57 }
 0x14c   : > { %3065 = vpow2.f32 %v2874_v58 }
 0x14d   : > { %3067 = vrcp.f32 %v311_v59  ;;  %v324_v9 = vand.u32 2147483648, %v311_v59  ;;  %vm318_vm2 = vweird.f32 %v311_v59  ;;  %v322_v10 = vand.u32 2147483647, %v311_v59 }
 0x14f   : > { %v325_v16 = vor.u32 1.1754944e-38, %v324_v9  ;;  %vm323_vm5 = vcmp.eq.f32.partialorder %v322_v10, 8.507059e+37 }
 0x152   : > { %v3066_v60 = vpop.eup %3065 }
 0x153   : > { %v3068_v61 = vpop.eup %3067  ;;  %v312_v62 = vadd.f32 1.0, %v3066_v60 }
 0x154   : > { %v314_v63 = vmul.f32 %v3068_v61, %v311_v59  ;;  %vm319_vm1 = vweird.f32 %v3068_v61 }
 0x155   : > { %3069 = vrcp.f32 %v312_v62  ;;  %vm320_vm3 = vmor %vm318_vm2, %vm319_vm1  ;;  %v339_v12 = vand.u32 2147483648, %v312_v62  ;;  %v337_v15 = vand.u32 2147483647, %v312_v62  ;;  %vm333_vm6 = vweird.f32 %v312_v62 }
 0x156   : > { %v315_v2 = vsub.f32 1.0, %v314_v63  ;;  %vm553_vm1 = vcmask 1045504   ;;  %vm699_vm2 = vcmask 1041408  }
 0x157   : > { %v340_v19 = vor.u32 1.1754944e-38, %v339_v12  ;;  %vm338_vm8 = vcmp.eq.f32.partialorder %v337_v15, 8.507059e+37 }
 0x158   : > { %v316_v3 = vmul.f32 %v3068_v61, %v315_v2  ;;  %v1096_v2 = vstv %s2905_s26  ;;  %s3563_s26 = sld [smem:[#allocation9 + $0x5e]] }
 0x15a   : > { %v317_v7 = vadd.f32 %v3068_v61, %v316_v3  ;;  %v1062_v3 = vstv %s3464_s29  ;;  %s3222_s29 = smov 127  }
 0x15b   : > { %v3070_v6 = vpop.eup %3069 }
 0x15c   : > { %v329_v8 = vmul.f32 %v3070_v6, %v312_v62  ;;  %v321_v13 = vsel %vm320_vm3, %v3068_v61, %v317_v7  ;;  %vm334_vm4 = vweird.f32 %v3070_v6 }
 0x15d   : > { %v326_v18 = vsel %vm323_vm5, %v325_v16, %v321_v13  ;;  %vm335_vm7 = vmor %vm333_vm6, %vm334_vm4  ;;  %v748_v16 = vstv %s2889_s13  ;;  %s3624_s13 = sld [smem:[#allocation9 + $0x3f]] }
 0x15e   : > { %v330_v11 = vsub.f32 1.0, %v329_v8  ;;  %v3407_v22 = vmul.f32 %v326_v18, %v3370_v0  ;;  %v3418_v26 = vmul.f32 %v326_v18, %v3372_v1 }
 0x160   : > { %v331_v14 = vmul.f32 %v3070_v6, %v330_v11  ;;  %5796 = vst [vmem:[#allocation14_spill] sm:$0xff] %v3407_v22 }
 0x161   : > { %5799 = vst [vmem:[#allocation17_spill] sm:$0xff] %v3418_v26 }
 0x162   : > { %v332_v17 = vadd.f32 %v3070_v6, %v331_v14 }
 0x164   : > { %v336_v20 = vsel %vm335_vm7, %v3070_v6, %v332_v17 }
 0x165   : > { %v341_v21 = vsel %vm338_vm8, %v340_v19, %v336_v20 }
 0x166   : > { %v3410_v23 = vmul.f32 %v341_v21, %v3378_v4  ;;  %v3413_v24 = vmul.f32 %v341_v21, %v3380_v5 }
 0x168   : > { %5797 = vst [vmem:[#allocation15_spill] sm:$0xff] %v3410_v23  ;;  %v363_v25 = vmax.f32 %v3407_v22, %v3410_v23  ;;  %v370_v29 = vmax.f32 %v3418_v26, %v3413_v24  ;;  %v347_v1 = vadd.f32 %v3410_v23, %v3407_v22  ;;  %v354_v43 = vadd.f32 %v3413_v24, %v3418_v26 }
 0x169   : > { %5798 = vst [vmem:[#allocation16_spill] sm:$0xff] %v3413_v24 }
 0x16a   : > { %v364_v27 = vrot.slane %v363_v25, 4  ;;  %v371_v31 = vrot.slane %v370_v29, 4  ;;  %v348_v34 = vrot.slane %v347_v1, 4  ;;  %v355_v44 = vrot.slane %v354_v43, 4 }
 0x16c   : > { %v365_v28 = vmax.f32 %v363_v25, %v364_v27  ;;  %v372_v33 = vmax.f32 %v370_v29, %v371_v31  ;;  %v349_v36 = vadd.f32 %v348_v34, %v347_v1  ;;  %v356_v46 = vadd.f32 %v355_v44, %v354_v43 }
 0x16d   : > { %v1674_v25 = vstv %s3483_s23  ;;  %v3511_v1 = vstv %s2933_s30  ;;  %s3636_s23 = sld [smem:[#allocation9 + $0x31]] }
 0x16e   : > { %v366_v30 = vrot.slane %v365_v28, 2  ;;  %v373_v5 = vrot.slane %v372_v33, 2  ;;  %v350_v38 = vrot.slane %v349_v36, 2  ;;  %v357_v47 = vrot.slane %v356_v46, 2  ;;  %s3647_s30 = sld [smem:[#allocation9 + $0x4d]] }
 0x170   : > { %v367_v0 = vmax.f32 %v365_v28, %v366_v30  ;;  %v374_v35 = vmax.f32 %v372_v33, %v373_v5  ;;  %v351_v40 = vadd.f32 %v350_v38, %v349_v36  ;;  %v358_v48 = vadd.f32 %v357_v47, %v356_v46 }
 0x171   : > { %v3513_v5 = vstv %s2897_s25  ;;  %s3654_s25 = sld [smem:[#allocation9 + $0x5b]] }
 0x172   : > { %v368_v32 = vrot.slane %v367_v0, 1  ;;  %v375_v37 = vrot.slane %v374_v35, 1  ;;  %v352_v41 = vrot.slane %v351_v40, 1  ;;  %v359_v49 = vrot.slane %v358_v48, 1 }
 0x174   : > { %v369_v4 = vmax.f32 %v367_v0, %v368_v32  ;;  %v376_v39 = vmax.f32 %v374_v35, %v375_v37  ;;  %v353_v42 = vadd.f32 %v352_v41, %v351_v40  ;;  %v360_v50 = vadd.f32 %v359_v49, %v358_v48 }
 0x176   : > { %416 = vrot.lane.b32.xlu1 %v369_v4, %s3211_s6  ;;  %392 = vrot.lane.b32.xlu2 %v369_v4, %s3212_s10  ;;  %v361_v45 = vmul.f32 0.0625, %v353_v42  ;;  %v362_v51 = vmul.f32 0.0625, %v360_v50 }
 0x177   : > { %384 = vrot.lane.b32.xlu0 %v369_v4, %s3213_s9 }
 0x17e   : > { %440 = vrot.lane.b32.xlu1 %v369_v4, %s3214_s12  ;;  %400 = vrot.lane.b32.xlu2 %v369_v4, %s3215_s7 }
 0x17f   : > { %408 = vrot.lane.b32.xlu0 %v369_v4, %s3216_s11 }
 0x186   : > { %466 = vrot.lane.b32.xlu1 %v376_v39, %s3215_s7  ;;  %424 = vrot.lane.b32.xlu2 %v369_v4, %s3217_s20 }
 0x187   : > { %432 = vrot.lane.b32.xlu0 %v369_v4, %s3218_s22 }
 0x18e   : > { %490 = vrot.lane.b32.xlu1 %v376_v39, %s3217_s20  ;;  %450 = vrot.lane.b32.xlu2 %v376_v39, %s3213_s9 }
 0x18f   : > { %458 = vrot.lane.b32.xlu0 %v376_v39, %s3212_s10 }
 0x196   : > { %474 = vrot.lane.b32.xlu2 %v376_v39, %s3216_s11  ;;  %388 = vrot.lane.b32.xlu1 %v361_v45, %s3212_s10 }
 0x197   : > { %482 = vrot.lane.b32.xlu0 %v376_v39, %s3211_s6 }
 0x19e   : > { %498 = vrot.lane.b32.xlu2 %v376_v39, %s3218_s22  ;;  %404 = vrot.lane.b32.xlu1 %v361_v45, %s3216_s11 }
 0x19f   : > { %506 = vrot.lane.b32.xlu0 %v376_v39, %s3214_s12 }
 0x1a6   : > { %428 = vrot.lane.b32.xlu1 %v361_v45, %s3218_s22  ;;  %378 = vrot.lane.b32.xlu2 %v361_v45, %s3213_s9 }
 0x1a7   : > { %396 = vrot.lane.b32.xlu0 %v361_v45, %s3215_s7 }
 0x1ae   : > { %454 = vrot.lane.b32.xlu1 %v362_v51, %s3212_s10  ;;  %412 = vrot.lane.b32.xlu2 %v361_v45, %s3211_s6  ;;  %s3504_s10 = sld [smem:[#allocation9 + $0x34]] }
 0x1af   : > { %420 = vrot.lane.b32.xlu0 %v361_v45, %s3217_s20 }
 0x1b6   : > { %478 = vrot.lane.b32.xlu1 %v362_v51, %s3211_s6  ;;  %436 = vrot.lane.b32.xlu2 %v361_v45, %s3214_s12  ;;  %s2901_s6 = sld [smem:[#allocation9 + $0x5c]]  ;;  %v1363_v45 = vstv %s3504_s10 }
 0x1b7   : > { %445 = vrot.lane.b32.xlu0 %v362_v51, %s3213_s9  ;;  %s3531_s9 = sld [smem:[#allocation9 + $0x56]] }
 0x1b8   : > { %s3687_s10 = sld [smem:[#allocation9 + $0x9]] }
 0x1bc   : > { %v3535_v42 = vstv %s2901_s6  ;;  %s2893_s6 = sld [smem:[#allocation9 + $0x40]] }
 0x1be   : > { %502 = vrot.lane.b32.xlu1 %v362_v51, %s3214_s12  ;;  %462 = vrot.lane.b32.xlu2 %v362_v51, %s3215_s7  ;;  %s2921_s12 = sld [smem:[#allocation9 + $0x42]] }
 0x1bf   : > { %470 = vrot.lane.b32.xlu0 %v362_v51, %s3216_s11  ;;  %s2881_s7 = sld [smem:[#allocation9 + $0x46]] }
 0x1c0   : > { %s2885_s11 = sld [smem:[#allocation9 + $0x54]] }
 0x1c6   : > { %486 = vrot.lane.b32.xlu2 %v362_v51, %s3217_s20  ;;  %s2877_s20 = sld [smem:[#allocation9 + $0x38]] }
 0x1c7   : > { %494 = vrot.lane.b32.xlu0 %v362_v51, %s3218_s22  ;;  %s3556_s22 = sld [smem:[#allocation9 + $0x50]] }
 0x1d0   : > { %v393_v53 = vpop.permute.xlu2 %392 }
 0x1d1   : > { %395 = vst.msk [vmem:[#allocation3 + $0x4] sm:$0x1] %vm381_vm10, %v393_v53 }
 0x1d8   : > { %v401_v54 = vpop.permute.xlu2 %400 }
 0x1d9   : > { %403 = vst.msk [vmem:[#allocation3 + $0x5] sm:$0x1] %vm381_vm10, %v401_v54 }
 0x1e0   : > { %v425_v55 = vpop.permute.xlu2 %424 }
 0x1e1   : > { %427 = vst.msk [vmem:[#allocation3 + $0x8] sm:$0x1] %vm381_vm10, %v425_v55 }
 0x1e8   : > { %v417_v56 = vpop.permute.xlu1 %416  ;;  %v451_v57 = vpop.permute.xlu2 %450 }
 0x1e9   : > { %419 = vst.msk [vmem:[#allocation3 + $0x7] sm:$0x1] %vm381_vm10, %v417_v56  ;;  %v385_v58 = vpop.permute.xlu0 %384 }
 0x1ea   : > { %453 = vst.msk [vmem:[#allocation3 + $0xb] sm:$0x1] %vm381_vm10, %v451_v57  ;;  %v3573_v57 = vstv %s3531_s9  ;;  %s3694_s9 = sld [smem:[#allocation9 + $0x2]] }
 0x1eb   : > { %387 = vst.msk [vmem:[#allocation3 + $0x3] sm:$0x1] %vm381_vm10, %v385_v58  ;;  %v3575_v58 = vstv %s2921_s12  ;;  %s2909_s12 = sld [smem:[#allocation9 + $0x48]] }
 0x1f0   : > { %v441_v59 = vpop.permute.xlu1 %440  ;;  %v475_v60 = vpop.permute.xlu2 %474 }
 0x1f1   : > { %443 = vst.msk [vmem:[#allocation3 + $0xa] sm:$0x1] %vm381_vm10, %v441_v59  ;;  %v409_v61 = vpop.permute.xlu0 %408 }
 0x1f2   : > { %477 = vst.msk [vmem:[#allocation3 + $0xe] sm:$0x1] %vm381_vm10, %v475_v60 }
 0x1f3   : > { %411 = vst.msk [vmem:[#allocation3 + $0x6] sm:$0x1] %vm381_vm10, %v409_v61  ;;  %v3583_v61 = vstv %s2881_s7  ;;  %s2930_s7 = sld [smem:[#allocation9 + $0x4]] }
 0x1f4   : > { %5800 = vst [vmem:[#allocation18_spill] sm:$0xff] %v3583_v61 }
 0x1f8   : > { %v467_v62 = vpop.permute.xlu1 %466  ;;  %v499_v63 = vpop.permute.xlu2 %498 }
 0x1f9   : > { %469 = vst.msk [vmem:[#allocation3 + $0xd] sm:$0x1] %vm381_vm10, %v467_v62  ;;  %v433_v6 = vpop.permute.xlu0 %432 }
 0x1fa   : > { %v3471_v7 = vld [vmem:[#allocation3] sm:$0xff]  ;;  %501 = vst.msk [vmem:[#allocation3 + $0x11] sm:$0x1] %vm381_vm10, %v499_v63 }
 0x1fb   : > { %435 = vst.msk [vmem:[#allocation3 + $0x9] sm:$0x1] %vm381_vm10, %v433_v6  ;;  %v1097_v8 = vmul.f32 %v1096_v2, %v3471_v7  ;;  %v1063_v9 = vmul.f32 %v1062_v3, %v3471_v7  ;;  %v3488_v19 = vmul.f32 %v748_v16, %v3471_v7  ;;  %v1709_v40 = vmul.f32 %v3511_v1, %v3471_v7 }
 0x1fc   : > { %v3561_v53 = vmul.f32 %v1363_v45, %v3471_v7  ;;  %v1675_v54 = vmul.f32 %v1674_v25, %v3471_v7  ;;  %v3600_v6 = vstv %s2877_s20  ;;  %s2932_s20 = sld [smem:[#allocation9 + $0xb]] }
 0x1fd   : > { %1103 = vrot.lane.b32.xlu1 %v1097_v8, %s3220_s8  ;;  %1067 = vrot.lane.b32.xlu0 %v1063_v9, %s3220_s8  ;;  %v753_v31 = vrot.slane %v3488_v19, 7  ;;  %5803 = vst [vmem:[#allocation21_spill] sm:$0xff] %v3600_v6 }
 0x1fe   : > { %v5710_v60 = vrot.slane %v3561_v53, 7 }
 0x200   : > { %v491_v10 = vpop.permute.xlu1 %490  ;;  %v379_v11 = vpop.permute.xlu2 %378 }
 0x201   : > { %493 = vst.msk [vmem:[#allocation3 + $0x10] sm:$0x1] %vm381_vm10, %v491_v10  ;;  %v459_v12 = vpop.permute.xlu0 %458 }
 0x202   : > { %461 = vst.msk [vmem:[#allocation3 + $0xc] sm:$0x1] %vm381_vm10, %v459_v12 }
 0x203   : > { %382 = vst.msk [vmem:[#allocation2 + $0x3] sm:$0x1] %vm381_vm10, %v379_v11 }
 0x208   : > { %v389_v13 = vpop.permute.xlu1 %388  ;;  %v413_v14 = vpop.permute.xlu2 %412 }
 0x209   : > { %v483_v15 = vpop.permute.xlu0 %482  ;;  %391 = vst.msk [vmem:[#allocation2 + $0x4] sm:$0x1] %vm381_vm10, %v389_v13 }
 0x20a   : > { %485 = vst.msk [vmem:[#allocation3 + $0xf] sm:$0x1] %vm381_vm10, %v483_v15 }
 0x20b   : > { %415 = vst.msk [vmem:[#allocation2 + $0x7] sm:$0x1] %vm381_vm10, %v413_v14 }
 0x210   : > { %v405_v17 = vpop.permute.xlu1 %404  ;;  %v437_v18 = vpop.permute.xlu2 %436 }
 0x211   : > { %v3490_v20 = vld [vmem:[#allocation3 + $0x8] sm:$0xff]  ;;  %v507_v21 = vpop.permute.xlu0 %506  ;;  %407 = vst.msk [vmem:[#allocation2 + $0x6] sm:$0x1] %vm381_vm10, %v405_v17 }
 0x212   : > { %509 = vst.msk [vmem:[#allocation3 + $0x12] sm:$0x1] %vm381_vm10, %v507_v21  ;;  %v1064_v27 = vmul.f32 %v1062_v3, %v3490_v20  ;;  %v1676_v28 = vmul.f32 %v1674_v25, %v3490_v20  ;;  %v1098_v29 = vmul.f32 %v1096_v2, %v3490_v20  ;;  %v750_v30 = vmul.f32 %v748_v16, %v3490_v20 }
 0x213   : > { %439 = vst.msk [vmem:[#allocation2 + $0xa] sm:$0x1] %vm381_vm10, %v437_v18  ;;  %v3520_v36 = vmul.f32 %v3513_v5, %v3490_v20  ;;  %v3545_v46 = vmul.f32 %v1363_v45, %v3490_v20  ;;  %v3554_v48 = vmul.f32 %v3535_v42, %v3490_v20  ;;  %v3618_v13 = vmul.f32 %v3573_v57, %v3490_v20 }
 0x214   : > { %1069 = vrot.lane.b32.xlu2 %v1064_v27, %s3220_s8  ;;  %1681 = vrot.lane.b32.xlu1 %v1676_v28, %s3221_s5  ;;  %v754_v0 = vrot.slane %v750_v30, 7  ;;  %v3622_v14 = vmul.f32 %v3575_v58, %v3490_v20  ;;  %v1710_v16 = vmul.f32 %v3511_v1, %v3490_v20  ;;  %v3631_v18 = vstv %s3556_s22  ;;  %s2891_s22 = sld [smem:[#allocation9 + $0x39]] }
 0x215   : > { %1105 = vrot.lane.b32.xlu0 %v1098_v29, %s3220_s8  ;;  %v5706_v44 = vrot.slane %v3520_v36, 3  ;;  %v5711_v55 = vrot.slane %v3545_v46, 7  ;;  %v5705_v56 = vrot.slane %v3554_v48, 5  ;;  %v3634_v21 = vstv %s3563_s26  ;;  %s2880_s26 = sld [smem:[#allocation9 + $0x15]] }
 0x216   : > { %v3509_v32 = vsel %vm732_vm12, %v753_v31, %v754_v0  ;;  %v3691_v45 = vstv %s3624_s13  ;;  %s2884_s13 = sld [smem:[#allocation9 + $0x23]] }
 0x217   : > { %v3611_v9 = vsel %vm732_vm12, %v5710_v60, %v5711_v55  ;;  %5806 = vst [vmem:[#allocation24_spill] sm:$0xff] %v3691_v45  ;;  %v1077_v55 = vstv %s3687_s10  ;;  %s2911_s10 = sld [smem:[#allocation9 + $0x4f]] }
 0x218   : > { %v429_v4 = vpop.permute.xlu1 %428  ;;  %v463_v33 = vpop.permute.xlu2 %462 }
 0x219   : > { %v3515_v34 = vld [vmem:[#allocation3 + $0x10] sm:$0x3f]  ;;  %v397_v35 = vpop.permute.xlu0 %396  ;;  %431 = vst.msk [vmem:[#allocation2 + $0x9] sm:$0x1] %vm381_vm10, %v429_v4 }
 0x21a   : > { %399 = vst.msk [vmem:[#allocation2 + $0x5] sm:$0x1] %vm381_vm10, %v397_v35  ;;  %v1099_v37 = vmul.f32 %v1096_v2, %v3515_v34  ;;  %v1711_v38 = vmul.f32 %v3511_v1, %v3515_v34  ;;  %v933_v39 = vmul.f32 %v3513_v5, %v3515_v34  ;;  %v3540_v43 = vmul.f32 %v3535_v42, %v3515_v34 }
 0x21b   : > { %465 = vst.msk [vmem:[#allocation2 + $0xd] sm:$0x1] %vm381_vm10, %v463_v33  ;;  %v3580_v59 = vmul.f32 %v3573_v57, %v3515_v34  ;;  %v3592_v63 = vmul.f32 %v3575_v58, %v3515_v34  ;;  %v3594_v2 = vstv %s2885_s11  ;;  %v3598_v3 = vmul.f32 %v3583_v61, %v3515_v34  ;;  %s3223_s11 = smov 125  }
 0x21c   : > { %1107 = vrot.lane.b32.xlu2 %v1099_v37, %s3220_s8  ;;  %1719 = vrot.lane.b32.xlu1 %v1711_v38, %s3221_s5  ;;  %v940_v41 = vrot.slane %v933_v39, 3  ;;  %v1033_v52 = vrot.slane %v3540_v43, 5  ;;  %5801 = vst [vmem:[#allocation19_spill] sm:$0xff] %v3594_v2  ;;  %v3604_v8 = vmul.f32 %v3594_v2, %v3515_v34  ;;  %v540_v11 = vmul.f32 %v3600_v6, %v3515_v34 }
 0x21d   : > { %1715 = vrot.lane.b32.xlu0 %v1709_v40, %s3221_s5  ;;  %5802 = vst [vmem:[#allocation20_spill] sm:$0xff] %v3598_v3  ;;  %v5700_v12 = vrot.slane %v3598_v3, 2  ;;  %v5713_v17 = vrot.slane %v3580_v59, 4  ;;  %v5707_v25 = vrot.slane %v3592_v63, 1  ;;  %v3642_v27 = vmul.f32 %v3634_v21, %v3515_v34 }
 0x21e   : > { %v3550_v47 = vsel %vm870_vm13, %v5706_v44, %v940_v41  ;;  %v3588_v62 = vsel %vm963_vm14, %v5705_v56, %v1033_v52  ;;  %5804 = vst [vmem:[#allocation22_spill] sm:$0xff] %v3604_v8  ;;  %v5699_v29 = vrot.slane %v3604_v8, 4  ;;  %v3651_v30 = vmul.f32 %v3631_v18, %v3515_v34 }
 0x21f   : > { %v616_v28 = vadd.f32 %v5700_v12, %v540_v11  ;;  %v5703_v33 = vrot.slane %v3622_v14, 1  ;;  %v5709_v35 = vrot.slane %v3642_v27, 5  ;;  %v3680_v38 = vmul.f32 %v3634_v21, %v3490_v20 }
 0x220   : > { %v455_v49 = vpop.permute.xlu1 %454  ;;  %v487_v50 = vpop.permute.xlu2 %486  ;;  %v5712_v39 = vrot.slane %v3651_v30, 3  ;;  %v3685_v40 = vmul.f32 %v3631_v18, %v3490_v20 }
 0x221   : > { %v421_v51 = vpop.permute.xlu0 %420  ;;  %457 = vst.msk [vmem:[#allocation2 + $0xc] sm:$0x1] %vm381_vm10, %v455_v49  ;;  %v3659_v4 = vadd.f32 %v5699_v29, %v616_v28  ;;  %v3676_v37 = vsel %vm777_vm0, %v5703_v33, %v5707_v25  ;;  %v5701_v43 = vrot.slane %v3680_v38, 5  ;;  %v3724_v28 = vstv %s3654_s25  ;;  %s2895_s25 = sld [smem:[#allocation9 + $0x47]] }
 0x222   : > { %423 = vst.msk [vmem:[#allocation2 + $0x8] sm:$0x1] %vm381_vm10, %v421_v51  ;;  %v3699_v51 = vmul.f32 %v3691_v45, %v3490_v20  ;;  %v3737_v12 = vmul.f32 %v3724_v28, %v3490_v20 }
 0x223   : > { %489 = vst.msk [vmem:[#allocation2 + $0x10] sm:$0x1] %vm381_vm10, %v487_v50  ;;  %v5702_v50 = vrot.slane %v3685_v40, 3 }
 0x224   : > { %1679 = vrot.lane.b32.xlu2 %v1675_v54, %s3221_s5  ;;  %946 = vrot.lane.b32.xlu1 %v940_v41, %s3222_s29  ;;  %5805 = vst [vmem:[#allocation23_spill] sm:$0xff] %v3659_v4  ;;  %v5708_v54 = vstv %s3636_s23  ;;  %v5714_v44 = vrot.slane %v3737_v12, 6 }
 0x225   : > { %760 = vrot.lane.b32.xlu0 %v754_v0, %s3222_s29  ;;  %v5704_v0 = vrot.slane %v3618_v13, 4  ;;  %5807 = vst [vmem:[#allocation25_spill] sm:$0xff] %v3699_v51  ;;  %v3717_v11 = vsel %vm870_vm13, %v5702_v50, %v5712_v39  ;;  %v525_v19 = vmul.f32 %v5708_v54, %v3490_v20  ;;  %v1049_v39 = vstv %s3694_s9  ;;  %s2907_s9 = sld [smem:[#allocation9 + $0x41]] }
 0x226   : > { %5809 = vst [vmem:[#allocation27_spill] sm:$0xff] %v3724_v28 }
 0x227   : > { %v3668_v1 = vsel %vm626_vm15, %v5704_v0, %v5713_v17  ;;  %5811 = vst [vmem:[#allocation29_spill] sm:$0xff] %v3737_v12 }
 0x228   : > { %v479_v10 = vpop.permute.xlu1 %478 }
 0x229   : > { %v446_v15 = vpop.permute.xlu0 %445  ;;  %481 = vst.msk [vmem:[#allocation2 + $0xf] sm:$0x1] %vm381_vm10, %v479_v10  ;;  %v566_v10 = vmul.f32 %v3691_v45, %v3515_v34 }
 0x22a   : > { %448 = vst.msk [vmem:[#allocation2 + $0xb] sm:$0x1] %vm381_vm10, %v446_v15  ;;  %v5716_v15 = vrot.slane %v3699_v51, 2 }
 0x22c   : > { %1717 = vrot.lane.b32.xlu2 %v1710_v16, %s3221_s5  ;;  %v3721_v16 = vstv %s3647_s30  ;;  %s2876_s30 = sld [smem:[#allocation9 + $0x7]] }
 0x22d   : > { %1039 = vrot.lane.b32.xlu0 %v1033_v52, %s3222_s29  ;;  %v3707_v52 = vsel %vm963_vm14, %v5701_v43, %v5709_v35  ;;  %5808 = vst [vmem:[#allocation26_spill] sm:$0xff] %v3721_v16  ;;  %v639_v29 = vmul.f32 %v3721_v16, %v3515_v34  ;;  %v3739_v43 = vstv %s2893_s6  ;;  %s2899_s6 = sld [smem:[#allocation9 + $0x55]] }
 0x22f   : > { %v646_v0 = vrot.slane %v639_v29, 4 }
 0x230   : > { %v503_v41 = vpop.permute.xlu1 %502 }
 0x231   : > { %v471_v49 = vpop.permute.xlu0 %470  ;;  %505 = vst.msk [vmem:[#allocation2 + $0x12] sm:$0x1] %vm381_vm10, %v503_v41  ;;  %v573_v41 = vrot.slane %v566_v10, 2  ;;  %v3748_v10 = vmul.f32 %v3739_v43, %v3515_v34 }
 0x232   : > { %473 = vst.msk [vmem:[#allocation2 + $0xe] sm:$0x1] %vm381_vm10, %v471_v49  ;;  %v3731_v49 = vmul.f32 %v3721_v16, %v3490_v20 }
 0x233   : > { %v574_v50 = vsel %vm553_vm1, %v5716_v15, %v573_v41  ;;  %v5718_v29 = vrot.slane %v3748_v10, 1  ;;  %v5818_v24 = vrot.slane %v3748_v10, 1 }
 0x234   : > { %756 = vrot.lane.b32.xlu2 %v753_v31, %s3222_s29  ;;  %5810 = vst [vmem:[#allocation28_spill] sm:$0xff] %v3731_v49  ;;  %v712_v31 = vmul.f32 %v3724_v28, %v3515_v34  ;;  %v5715_v33 = vrot.slane %v3731_v49, 4  ;;  %v578_v56 = vadd.f32 %v574_v50, %v525_v19 }
 0x236   : > { %v719_v25 = vrot.slane %v712_v31, 6  ;;  %v647_v54 = vsel %vm626_vm15, %v5715_v33, %v646_v0  ;;  %v5812_v0 = vrot.slane %v3580_v59, 4  ;;  %v5813_v59 = vrot.slane %v3651_v30, 3 }
 0x237   : > { %v651_v17 = vadd.f32 %v647_v54, %v578_v56  ;;  %v3776_v56 = vld [vmem:[#allocation2] sm:$0xff]  ;;  %v5815_v30 = vrot.slane %v3561_v53, 7  ;;  %v5817_v53 = vrot.slane %v3592_v63, 1 }
 0x238   : > { %v720_v41 = vsel %vm699_vm2, %v5714_v44, %v719_v25  ;;  %v1078_v25 = vmul.f32 %v1077_v55, %v3776_v56 }
 0x239   : > { %v3758_v35 = vld [vmem:[#allocation2 + $0x8] sm:$0xff]  ;;  %v495_v60 = vpop.permute.xlu0 %494  ;;  %v3769_v31 = vadd.f32 %v720_v41, %v651_v17  ;;  %v3785_v17 = vstv %s2909_s12  ;;  %s2915_s12 = sld [smem:[#allocation9 + $0x5d]] }
 0x23a   : > { %497 = vst.msk [vmem:[#allocation2 + $0x11] sm:$0x1] %vm381_vm10, %v495_v60  ;;  %v1079_v50 = vmul.f32 %v1077_v55, %v3758_v35  ;;  %v1051_v19 = vmul.f32 %v1049_v39, %v3758_v35  ;;  %v1050_v60 = vmul.f32 %v1049_v39, %v3776_v56  ;;  %v3791_v41 = vmul.f32 %v3785_v17, %v3515_v34 }
 0x23c   : > { %853 = vrot.lane.b32.xlu2 %v5718_v29, %s3222_s29  ;;  %1086 = vrot.lane.b32.xlu0 %v1079_v50, %s3220_s8  ;;  %v5717_v50 = vrot.slane %v3791_v41, 2  ;;  %v884_v29 = vstv %s2895_s25  ;;  %s2927_s25 = sld [smem:[#allocation9 + $0x57]] }
 0x23d   : > { %1056 = vrot.lane.b32.xlu1 %v1051_v19, %s3220_s8  ;;  %v1661_v19 = vstv %s2930_s7  ;;  %v886_v22 = vmul.f32 %v884_v29, %v3490_v20  ;;  %s2878_s7 = sld [smem:[#allocation9 + $0xe]] }
 0x241   : > { %v3787_v54 = vld [vmem:[#allocation2 + $0x10] sm:$0x3f] }
 0x242   : > { %v1080_v39 = vmul.f32 %v1077_v55, %v3787_v54  ;;  %v5814_v55 = vrot.slane %v3545_v46, 7 }
 0x244   : > { %1291 = vrot.lane.b32.xlu0 %v5812_v0, %s3220_s8  ;;  %1054 = vrot.lane.b32.xlu2 %v1050_v60, %s3220_s8  ;;  %v1663_v60 = vmul.f32 %v1661_v19, %v3758_v35  ;;  %v791_v0 = vstv %s2891_s22  ;;  %s2886_s22 = sld [smem:[#allocation9 + $0x2a]] }
 0x245   : > { %1084 = vrot.lane.b32.xlu1 %v1078_v25, %s3220_s8  ;;  %v1689_v25 = vstv %s2932_s20  ;;  %v792_v46 = vmul.f32 %v791_v0, %v3471_v7  ;;  %v794_v15 = vmul.f32 %v791_v0, %v3515_v34  ;;  %s2882_s20 = sld [smem:[#allocation9 + $0x1c]] }
 0x246   : > { %v1691_v33 = vmul.f32 %v1689_v25, %v3758_v35  ;;  %v1692_v26 = vmul.f32 %v1689_v25, %v3787_v54 }
 0x24c   : > { %1559 = vrot.lane.b32.xlu0 %v5813_v59, %s3223_s11  ;;  %1088 = vrot.lane.b32.xlu2 %v1080_v39, %s3220_s8  ;;  %v1690_v39 = vmul.f32 %v1689_v25, %v3776_v56  ;;  %v793_v59 = vmul.f32 %v791_v0, %v3490_v20  ;;  %v3841_v0 = vstv %s2876_s30  ;;  %s3952_s30 = sld [smem:[#allocation9]] }
 0x24d   : > { %1199 = vrot.lane.b32.xlu1 %v5717_v50, %s3220_s8 }
 0x254   : > { %1668 = vrot.lane.b32.xlu0 %v1663_v60, %s3221_s5  ;;  %1375 = vrot.lane.b32.xlu2 %v5814_v55, %s3223_s11  ;;  %v5816_v60 = vrot.slane %v3642_v27, 5  ;;  %v799_v55 = vrot.slane %v793_v59, 1  ;;  %v3824_v27 = vstv %s2880_s26  ;;  %s2923_s26 = sld [smem:[#allocation9 + $0x49]] }
 0x255   : > { %1371 = vrot.lane.b32.xlu1 %v5815_v30, %s3223_s11  ;;  %v798_v30 = vrot.slane %v792_v46, 1  ;;  %v3832_v63 = vmul.f32 %v3824_v27, %v3787_v54  ;;  %v801_v46 = vrot.slane %v794_v15, 1 }
 0x257   : > { %v800_v44 = vsel %vm777_vm0, %v798_v30, %v799_v55  ;;  %v802_v15 = vsel %vm777_vm0, %v799_v55, %v801_v46  ;;  %v5820_v55 = vrot.slane %v3520_v36, 3 }
 0x25c   : > { %1696 = vrot.lane.b32.xlu0 %v1690_v39, %s3221_s5  ;;  %1651 = vrot.lane.b32.xlu2 %v5816_v60, %s3223_s11  ;;  %v1662_v39 = vmul.f32 %v1661_v19, %v3776_v56  ;;  %v3826_v60 = vstv %s2884_s13  ;;  %v839_v19 = vmul.f32 %v3739_v43, %v3490_v20  ;;  %s2919_s13 = sld [smem:[#allocation9 + $0x3b]] }
 0x25d   : > { %1467 = vrot.lane.b32.xlu1 %v5817_v53, %s3223_s11  ;;  %v3836_v59 = vmul.f32 %v3826_v60, %v3787_v54 }
 0x25e   : > { %v845_v50 = vrot.slane %v839_v19, 1  ;;  %v931_v19 = vmul.f32 %v3513_v5, %v3471_v7  ;;  %v838_v5 = vmul.f32 %v3739_v43, %v3471_v7  ;;  %v1184_v43 = vmul.f32 %v3785_v17, %v3471_v7 }
 0x25f   : > { %v5723_v30 = vrot.slane %v3836_v59, 4 }
 0x260   : > { %v848_v23 = vsel %vm777_vm0, %v845_v50, %v5818_v24  ;;  %v892_v24 = vrot.slane %v886_v22, 3 }
 0x264   : > { %803 = vrot.lane.b32.xlu0 %v800_v44, %s3222_s29  ;;  %1698 = vrot.lane.b32.xlu2 %v1691_v33, %s3221_s5  ;;  %v533_v44 = vmul.f32 %v3841_v0, %v3787_v54  ;;  %v5724_v33 = vrot.slane %v3832_v63, 2 }
 0x265   : > { %1666 = vrot.lane.b32.xlu1 %v1662_v39, %s3221_s5 }
 0x266   : > { %v598_v53 = vadd.f32 %v5724_v33, %v533_v44  ;;  %v885_v44 = vmul.f32 %v884_v29, %v3471_v7 }
 0x268   : > { %v3851_v39 = vadd.f32 %v5723_v30, %v598_v53  ;;  %v937_v53 = vrot.slane %v931_v19, 3  ;;  %v891_v25 = vrot.slane %v885_v44, 3  ;;  %v977_v30 = vstv %s2899_s6  ;;  %s2947_s6 = sld [smem:[#allocation9 + $0x3d]] }
 0x269   : > { %v979_v22 = vmul.f32 %v977_v30, %v3490_v20  ;;  %v844_v44 = vrot.slane %v838_v5, 1 }
 0x26a   : > { %v939_v46 = vsel %vm870_vm13, %v937_v53, %v5820_v55  ;;  %v887_v55 = vmul.f32 %v884_v29, %v3515_v34 }
 0x26b   : > { %v985_v19 = vrot.slane %v979_v22, 5 }
 0x26c   : > { %851 = vrot.lane.b32.xlu0 %v848_v23, %s3222_s29  ;;  %805 = vrot.lane.b32.xlu2 %v802_v15, %s3222_s29  ;;  %v893_v23 = vsel %vm870_vm13, %v891_v25, %v892_v24  ;;  %v980_v15 = vmul.f32 %v977_v30, %v3515_v34  ;;  %v1185_v25 = vmul.f32 %v3785_v17, %v3490_v20  ;;  %v894_v5 = vrot.slane %v887_v55, 3 }
 0x26d   : > { %1700 = vrot.lane.b32.xlu1 %v1692_v26, %s3221_s5 }
 0x26e   : > { %v3865_v10 = vpop.permute.xlu2 %1069  ;;  %v987_v36 = vrot.slane %v980_v15, 5  ;;  %v1191_v15 = vrot.slane %v1185_v25, 2  ;;  %v895_v25 = vsel %vm870_vm13, %v892_v24, %v894_v5 }
 0x26f   : > { %5819 = vst [vmem:[#allocation30_spill] sm:$0xff] %v3865_v10  ;;  %v3896_v22 = vpop.permute.xlu0 %1067  ;;  %v3918_v33 = vpop.permute.xlu1 %1103 }
 0x270   : > { %v988_v53 = vsel %vm963_vm14, %v985_v19, %v987_v36  ;;  %5823 = vst [vmem:[#allocation33_spill] sm:$0xff] %v3896_v22 }
 0x271   : > { %5827 = vst [vmem:[#allocation36_spill] sm:$0xff] %v3918_v33  ;;  %v5728_v33 = vstv %s3952_s30 }
 0x274   : > { %942 = vrot.lane.b32.xlu0 %v939_v46, %s3222_s29  ;;  %896 = vrot.lane.b32.xlu2 %v893_v23, %s3222_s29  ;;  %v1024_v46 = vmul.f32 %v3535_v42, %v3471_v7 }
 0x275   : > { %758 = vrot.lane.b32.xlu1 %v3509_v32, %s3222_s29  ;;  %v846_v32 = vsel %vm777_vm0, %v844_v44, %v845_v50  ;;  %v1190_v50 = vrot.slane %v1184_v43, 2  ;;  %v1229_v44 = vstv %s2911_s10  ;;  %s2951_s10 = sld [smem:[#allocation9 + $0x4b]] }
 0x276   : > { %v3877_v26 = vpop.permute.xlu2 %1107  ;;  %v1030_v36 = vrot.slane %v1024_v46, 5  ;;  %v3909_v55 = vmul.f32 %v1229_v44, %v3490_v20  ;;  %v978_v46 = vmul.f32 %v977_v30, %v3471_v7 }
 0x277   : > { %5821 = vst [vmem:[#allocation31_spill] sm:$0xff] %v3877_v26  ;;  %v1192_v29 = vsel %vm553_vm1, %v1190_v50, %v1191_v15 }
 0x278   : > { %v984_v5 = vrot.slane %v978_v46, 5  ;;  %v5839_v26 = vrot.slane %v3909_v55, 4 }
 0x27a   : > { %v986_v30 = vsel %vm963_vm14, %v984_v5, %v985_v19 }
 0x27c   : > { %991 = vrot.lane.b32.xlu0 %v988_v53, %s3222_s29  ;;  %944 = vrot.lane.b32.xlu2 %v3550_v47, %s3222_s29  ;;  %v1137_v47 = vstv %s2907_s9  ;;  %v5824_v53 = vrot.slane %v3554_v48, 5  ;;  %s2955_s9 = sld [smem:[#allocation9 + $0x59]] }
 0x27d   : > { %849 = vrot.lane.b32.xlu1 %v846_v32, %s3222_s29  ;;  %v1232_v32 = vmul.f32 %v1229_v44, %v3515_v34  ;;  %v1139_v42 = vmul.f32 %v1137_v47, %v3490_v20  ;;  %v1138_v43 = vmul.f32 %v1137_v47, %v3471_v7 }
 0x27e   : > { %v3894_v23 = vpop.permute.xlu2 %1679  ;;  %v1032_v17 = vsel %vm963_vm14, %v1030_v36, %v5824_v53 }
 0x27f   : > { %5822 = vst [vmem:[#allocation32_spill] sm:$0xff] %v3894_v23  ;;  %v1239_v50 = vrot.slane %v1232_v32, 4  ;;  %v1145_v36 = vrot.slane %v1139_v42, 2  ;;  %v1144_v24 = vrot.slane %v1138_v43, 2 }
 0x281   : > { %v1146_v23 = vsel %vm553_vm1, %v1144_v24, %v1145_v36 }
 0x284   : > { %1195 = vrot.lane.b32.xlu0 %v1192_v29, %s3220_s8  ;;  %1035 = vrot.lane.b32.xlu2 %v1032_v17, %s3222_s29  ;;  %v5725_v29 = vrot.slane %v3909_v55, 4  ;;  %v1321_v17 = vstv %s2915_s12  ;;  %s2963_s12 = sld [smem:[#allocation9 + $0x45]] }
 0x285   : > { %898 = vrot.lane.b32.xlu1 %v895_v25, %s3222_s29  ;;  %v1322_v32 = vmul.f32 %v1321_v17, %v3471_v7 }
 0x286   : > { %v3912_v48 = vpop.permute.xlu2 %1717  ;;  %v1240_v25 = vsel %vm626_vm15, %v5725_v29, %v1239_v50  ;;  %v3937_v24 = vpop.permute.xlu1 %1681 }
 0x287   : > { %5825 = vst [vmem:[#allocation34_spill] sm:$0xff] %v3912_v48  ;;  %v3915_v53 = vpop.permute.xlu0 %1105  ;;  %v3925_v48 = vmul.f32 %v1321_v17, %v3490_v20  ;;  %v1328_v46 = vrot.slane %v1322_v32, 6  ;;  %v3960_v32 = vstv %s2878_s7  ;;  %s2967_s7 = sld [smem:[#allocation9 + $0x53]] }
 0x288   : > { %5826 = vst [vmem:[#allocation35_spill] sm:$0xff] %v3915_v53 }
 0x289   : > { %v1329_v43 = vrot.slane %v3925_v48, 6  ;;  %5830 = vst [vmem:[#allocation39_spill] sm:$0xff] %v3937_v24  ;;  %v1276_v48 = vmul.f32 %v3573_v57, %v3471_v7 }
 0x28a   : > { %v4088_v6 = vstv %s2963_s12  ;;  %s2954_s12 = sld [smem:[#allocation9 + $0x28]] }
 0x28b   : > { %v1330_v29 = vsel %vm699_vm2, %v1328_v46, %v1329_v43  ;;  %5847 = vst [vmem:[#allocation49_spill] sm:$0xff] %v4088_v6 }
 0x28c   : > { %1243 = vrot.lane.b32.xlu0 %v1240_v25, %s3220_s8  ;;  %1149 = vrot.lane.b32.xlu2 %v1146_v23, %s3220_s8  ;;  %v5831_v25 = vrot.slane %v3791_v41, 2  ;;  %v1140_v23 = vmul.f32 %v1137_v47, %v3515_v34 }
 0x28d   : > { %989 = vrot.lane.b32.xlu1 %v986_v30, %s3222_s29  ;;  %v1452_v30 = vmul.f32 %v3575_v58, %v3471_v7  ;;  %v3973_v58 = vstv %s2882_s20  ;;  %s4091_s20 = sld [smem:[#allocation9 + $0x1]] }
 0x28e   : > { %v3932_v42 = vpop.permute.xlu2 %756  ;;  %v1194_v19 = vsel %vm553_vm1, %v1191_v15, %v5831_v25  ;;  %v1147_v41 = vrot.slane %v1140_v23, 2  ;;  %v1282_v15 = vrot.slane %v1276_v48, 4  ;;  %v3971_v25 = vmul.f32 %v3960_v32, %v3758_v35 }
 0x28f   : > { %5828 = vst [vmem:[#allocation37_spill] sm:$0xff] %v3932_v42  ;;  %v3935_v50 = vpop.permute.xlu0 %1715  ;;  %v549_v23 = vmul.f32 %v3960_v32, %v3787_v54  ;;  %v622_v48 = vmul.f32 %v3973_v58, %v3787_v54 }
 0x290   : > { %5829 = vst [vmem:[#allocation38_spill] sm:$0xff] %v3935_v50  ;;  %v1148_v46 = vsel %vm553_vm1, %v1145_v36, %v1147_v41  ;;  %v3982_v36 = vstv %s2886_s22  ;;  %s2900_s22 = sld [smem:[#allocation9 + $0x2b]] }
 0x291   : > { %v557_v42 = vrot.slane %v549_v23, 2  ;;  %v630_v22 = vrot.slane %v622_v48, 4  ;;  %v5837_v23 = vrot.slane %v3971_v25, 2 }
 0x293   : > { %v558_v48 = vsel %vm553_vm1, %v5837_v23, %v557_v42 }
 0x294   : > { %1333 = vrot.lane.b32.xlu0 %v1330_v29, %s3220_s8  ;;  %1197 = vrot.lane.b32.xlu2 %v1194_v19, %s3220_s8  ;;  %v5833_v29 = vrot.slane %v3618_v13, 4  ;;  %v1230_v13 = vmul.f32 %v1229_v44, %v3471_v7  ;;  %v3988_v44 = vmul.f32 %v3982_v36, %v3758_v35 }
 0x295   : > { %1037 = vrot.lane.b32.xlu1 %v3588_v62, %s3222_s29  ;;  %v1324_v62 = vmul.f32 %v1321_v17, %v3515_v34  ;;  %v3975_v17 = vpop.permute.xlu1 %1719 }
 0x296   : > { %v3950_v5 = vpop.permute.xlu2 %853  ;;  %v1284_v47 = vsel %vm626_vm15, %v1282_v15, %v5833_v29  ;;  %5835 = vst [vmem:[#allocation42_spill] sm:$0xff] %v3975_v17  ;;  %v3994_v15 = vstv %s2923_s26  ;;  %v1405_v29 = vstv %s2919_s13  ;;  %v1236_v50 = vrot.slane %v1230_v13, 4  ;;  %s2935_s26 = sld [smem:[#allocation9 + $0x43]] }
 0x297   : > { %5832 = vst [vmem:[#allocation40_spill] sm:$0xff] %v3950_v5  ;;  %v3962_v57 = vpop.permute.xlu0 %760  ;;  %v1331_v41 = vrot.slane %v1324_v62, 6  ;;  %v1500_v62 = vmul.f32 %v3994_v15, %v3515_v34  ;;  %v1407_v8 = vmul.f32 %v1405_v29, %v3490_v20  ;;  %v5836_v13 = vrot.slane %v3622_v14, 1  ;;  %s2912_s13 = sld [smem:[#allocation9 + $0x25]] }
 0x298   : > { %5834 = vst [vmem:[#allocation41_spill] sm:$0xff] %v3962_v57  ;;  %v4029_v42 = vmul.f32 %v3994_v15, %v3490_v20 }
 0x299   : > { %v1332_v53 = vsel %vm699_vm2, %v1329_v43, %v1331_v41  ;;  %v1413_v41 = vrot.slane %v1407_v8, 1 }
 0x29c   : > { %1373 = vrot.lane.b32.xlu0 %v3611_v9, %s3223_s11  ;;  %1287 = vrot.lane.b32.xlu2 %v1284_v47, %s3220_s8  ;;  %v3980_v9 = vmul.f32 %v3973_v58, %v3758_v35  ;;  %v695_v47 = vmul.f32 %v3982_v36, %v3787_v54 }
 0x29d   : > { %1151 = vrot.lane.b32.xlu1 %v1148_v46, %s3220_s8  ;;  %v1458_v46 = vrot.slane %v1452_v30, 1  ;;  %v520_v30 = vmul.f32 %v5728_v33, %v3758_v35  ;;  %v1238_v33 = vsel %vm626_vm15, %v1236_v50, %v5839_v26  ;;  %v1507_v50 = vrot.slane %v1500_v62, 3 }
 0x29e   : > { %v3984_v19 = vpop.permute.xlu2 %1054  ;;  %v703_v24 = vrot.slane %v695_v47, 6  ;;  %v5838_v47 = vrot.slane %v3980_v9, 4 }
 0x29f   : > { %v1460_v17 = vsel %vm777_vm0, %v1458_v46, %v5836_v13  ;;  %v562_v14 = vadd.f32 %v558_v48, %v520_v30  ;;  %v5840_v46 = vrot.slane %v3988_v44, 6  ;;  %v1589_v13 = vstv %s2927_s25  ;;  %s2892_s25 = sld [smem:[#allocation9 + $0xf]] }
 0x2a0   : > { %v631_v3 = vsel %vm626_vm15, %v5838_v47, %v630_v22  ;;  %v1406_v22 = vmul.f32 %v1405_v29, %v3471_v7  ;;  %v1408_v47 = vmul.f32 %v1405_v29, %v3515_v34  ;;  %v1590_v8 = vmul.f32 %v1589_v13, %v3471_v7 }
 0x2a1   : > { %v704_v43 = vsel %vm699_vm2, %v5840_v46, %v703_v24  ;;  %v635_v26 = vadd.f32 %v631_v3, %v562_v14  ;;  %v4046_v3 = vmul.f32 %v1589_v13, %v3490_v20  ;;  %v4058_v46 = vstv %s2947_s6  ;;  %s2924_s6 = sld [smem:[#allocation9 + $0x1f]] }
 0x2a2   : > { %v1412_v30 = vrot.slane %v1406_v22, 1  ;;  %v1415_v22 = vrot.slane %v1408_v47, 1 }
 0x2a3   : > { %v4038_v24 = vadd.f32 %v704_v43, %v635_v26  ;;  %v1597_v29 = vrot.slane %v4046_v3, 5  ;;  %v4065_v26 = vmul.f32 %v4058_v46, %v3490_v20 }
 0x2a4   : > { %1463 = vrot.lane.b32.xlu0 %v1460_v17, %s3223_s11  ;;  %1335 = vrot.lane.b32.xlu2 %v1332_v53, %s3220_s8  ;;  %v4032_v17 = vpop.permute.xlu0 %1039  ;;  %v4036_v53 = vpop.permute.xlu1 %946  ;;  %v1414_v48 = vsel %vm777_vm0, %v1412_v30, %v1413_v41  ;;  %v1596_v30 = vrot.slane %v1590_v8, 5  ;;  %v1416_v47 = vsel %vm777_vm0, %v1413_v41, %v1415_v22  ;;  %v4099_v22 = vmul.f32 %v4088_v6, %v3490_v20 }
 0x2a5   : > { %1241 = vrot.lane.b32.xlu1 %v1238_v33, %s3220_s8  ;;  %5841 = vst [vmem:[#allocation43_spill] sm:$0xff] %v4032_v17  ;;  %v5729_v33 = vrot.slane %v4029_v42, 3 }
 0x2a6   : > { %v4034_v55 = vpop.permute.xlu2 %1088  ;;  %5842 = vst [vmem:[#allocation44_spill] sm:$0xff] %v4036_v53  ;;  %v1598_v3 = vsel %vm963_vm14, %v1596_v30, %v1597_v29 }
 0x2a7   : > { %v1508_v23 = vsel %vm870_vm13, %v5729_v33, %v1507_v50  ;;  %v4067_v50 = vstv %s2951_s10  ;;  %5849 = vst [vmem:[#allocation51_spill] sm:$0xff] %v4099_v22  ;;  %s4199_s10 = sld [smem:[#allocation9 + $0x1d]] }
 0x2a8   : > { %5844 = vst [vmem:[#allocation46_spill] sm:$0xff] %v4067_v50 }
 0x2ac   : > { %1511 = vrot.lane.b32.xlu0 %v1508_v23, %s3223_s11  ;;  %1417 = vrot.lane.b32.xlu2 %v1414_v48, %s3223_s11  ;;  %v1544_v23 = vmul.f32 %v3631_v18, %v3471_v7  ;;  %v2112_v48 = vmul.f32 %v4067_v50, %v3515_v34  ;;  %v4086_v18 = vstv %s2955_s9  ;;  %s4214_s9 = sld [smem:[#allocation9 + $0x3]] }
 0x2ad   : > { %1289 = vrot.lane.b32.xlu1 %v3668_v1, %s3220_s8  ;;  %v4071_v1 = vmul.f32 %v4067_v50, %v3490_v20  ;;  %5846 = vst [vmem:[#allocation48_spill] sm:$0xff] %v4086_v18  ;;  %v4095_v41 = vmul.f32 %v4086_v18, %v3490_v20 }
 0x2ae   : > { %v4054_v62 = vpop.permute.xlu0 %1086  ;;  %v4056_v14 = vpop.permute.xlu2 %1375  ;;  %v2119_v12 = vrot.slane %v2112_v48, 3  ;;  %v1498_v48 = vmul.f32 %v3994_v15, %v3471_v7  ;;  %v2364_v15 = vmul.f32 %v4088_v6, %v3515_v34  ;;  %v1550_v53 = vrot.slane %v1544_v23, 3 }
 0x2af   : > { %5843 = vst [vmem:[#allocation45_spill] sm:$0xff] %v4056_v14  ;;  %v4060_v43 = vpop.permute.xlu1 %1056  ;;  %v2020_v14 = vmul.f32 %v4058_v46, %v3515_v34  ;;  %v5736_v8 = vrot.slane %v4071_v1, 3  ;;  %v1592_v23 = vmul.f32 %v1589_v13, %v3515_v34 }
 0x2b0   : > { %5845 = vst [vmem:[#allocation47_spill] sm:$0xff] %v4071_v1  ;;  %v2371_v5 = vrot.slane %v2364_v15, 2  ;;  %v1504_v1 = vrot.slane %v1498_v48, 3 }
 0x2b1   : > { %5848 = vst [vmem:[#allocation50_spill] sm:$0xff] %v4095_v41  ;;  %v2027_v30 = vrot.slane %v2020_v14, 1  ;;  %v4116_v17 = vsel %vm870_vm13, %v5736_v8, %v2119_v12  ;;  %v5855_v14 = vrot.slane %v4065_v26, 1  ;;  %v5742_v12 = vrot.slane %v4095_v41, 5 }
 0x2b2   : > { %5854 = vst [vmem:[#allocation56_spill] sm:$0xff] %v4116_v17  ;;  %v5741_v8 = vrot.slane %v4099_v22, 2  ;;  %v1599_v13 = vrot.slane %v1592_v23, 5 }
 0x2b4   : > { %1601 = vrot.lane.b32.xlu0 %v1598_v3, %s3223_s11  ;;  %1465 = vrot.lane.b32.xlu2 %v3676_v37, %s3223_s11  ;;  %v4101_v37 = vstv %s2967_s7  ;;  %s2962_s7 = sld [smem:[#allocation9 + $0x14]] }
 0x2b5   : > { %1419 = vrot.lane.b32.xlu1 %v1416_v47, %s3223_s11  ;;  %5850 = vst [vmem:[#allocation52_spill] sm:$0xff] %v4101_v37  ;;  %v4111_v47 = vmul.f32 %v4101_v37, %v3490_v20  ;;  %v2456_v49 = vmul.f32 %v4101_v37, %v3515_v34 }
 0x2b6   : > { %v4103_v3 = vpop.permute.xlu0 %1291  ;;  %v4105_v33 = vpop.permute.xlu2 %1651 }
 0x2b7   : > { %5851 = vst [vmem:[#allocation53_spill] sm:$0xff] %v4103_v3  ;;  %v4118_v2 = vpop.permute.xlu1 %1084  ;;  %v4123_v3 = vsel %vm777_vm0, %v5855_v14, %v2027_v30  ;;  %v5740_v30 = vrot.slane %v4111_v47, 4  ;;  %v2463_v14 = vrot.slane %v2456_v49, 4  ;;  %v5860_v49 = vrot.slane %v4029_v42, 3 }
 0x2b8   : > { %5852 = vst [vmem:[#allocation54_spill] sm:$0xff] %v4105_v33  ;;  %v2204_v33 = vmul.f32 %v4086_v18, %v3515_v34 }
 0x2b9   : > { %5853 = vst [vmem:[#allocation55_spill] sm:$0xff] %v4111_v47  ;;  %v4157_v34 = vsel %vm626_vm15, %v5740_v30, %v2463_v14  ;;  %v1636_v14 = vmul.f32 %v3634_v21, %v3471_v7  ;;  %v5867_v7 = vrot.slane %v3680_v38, 5  ;;  %v4219_v30 = vstv %s2892_s25  ;;  %s2890_s25 = sld [smem:[#allocation9 + $0x8]] }
 0x2ba   : > { %5856 = vst [vmem:[#allocation57_spill] sm:$0xff] %v4123_v3  ;;  %v2211_v17 = vrot.slane %v2204_v33, 5  ;;  %v5857_v3 = vrot.slane %v3685_v40, 3  ;;  %v4146_v33 = vsel %vm553_vm1, %v5741_v8, %v2371_v5  ;;  %v1506_v40 = vsel %vm870_vm13, %v1504_v1, %v5860_v49 }
 0x2bb   : > { %5859 = vst [vmem:[#allocation59_spill] sm:$0xff] %v4146_v33  ;;  %v1343_v47 = vstv %s4214_s9  ;;  %s2906_s9 = sld [smem:[#allocation9 + $0x10]] }
 0x2bc   : > { %v1552_v18 = vsel %vm870_vm13, %v1550_v53, %v5857_v3  ;;  %v4141_v37 = vsel %vm963_vm14, %v5742_v12, %v2211_v17  ;;  %1649 = vrot.lane.b32.xlu0 %v3707_v52, %s3223_s11  ;;  %5861 = vst [vmem:[#allocation60_spill] sm:$0xff] %v4157_v34  ;;  %v727_v17 = vstv %s4091_s20  ;;  %v4178_v3 = vstv %s2900_s22  ;;  %s2970_s20 = sld [smem:[#allocation9 + $0x30]] }
 0x2bd   : > { %5858 = vst [vmem:[#allocation58_spill] sm:$0xff] %v4141_v37  ;;  %1555 = vrot.lane.b32.xlu2 %v1552_v18, %s3223_s11  ;;  %1509 = vrot.lane.b32.xlu1 %v1506_v40, %s3223_s11  ;;  %v4166_v52 = vmul.f32 %v727_v17, %v3758_v35  ;;  %v1600_v18 = vsel %vm963_vm14, %v1597_v29, %v1599_v13  ;;  %v1642_v40 = vrot.slane %v1636_v14, 5  ;;  %v4217_v14 = vstv %s2912_s13  ;;  %s4253_s22 = sld [smem:[#allocation9 + $0x2d]] }
 0x2be   : > { %v4161_v5 = vpop.permute.xlu0 %1559  ;;  %v4163_v53 = vpop.permute.xlu2 %1698  ;;  %v4186_v29 = vmul.f32 %v4178_v3, %v3787_v54  ;;  %v4191_v23 = vmul.f32 %v727_v17, %v3776_v56  ;;  %v4250_v37 = vstv %s2924_s6  ;;  %s2894_s13 = sld [smem:[#allocation9 + $0x16]] }
 0x2bf   : > { %5862 = vst [vmem:[#allocation61_spill] sm:$0xff] %v4161_v5  ;;  %v4168_v42 = vpop.permute.xlu1 %1199  ;;  %v5745_v1 = vrot.slane %v4166_v52, 7  ;;  %v1644_v21 = vsel %vm963_vm14, %v1642_v40, %v5867_v7  ;;  %v4227_v7 = vmul.f32 %v4217_v14, %v3787_v54  ;;  %s2920_s6 = sld [smem:[#allocation9 + $0x11]] }
 0x2c0   : > { %5863 = vst [vmem:[#allocation62_spill] sm:$0xff] %v4163_v53  ;;  %v5744_v13 = vrot.slane %v4191_v23, 7  ;;  %v4283_v53 = vstv %s2962_s7  ;;  %s2918_s7 = sld [smem:[#allocation9 + $0xa]] }
 0x2c1   : > { %5864 = vst [vmem:[#allocation63_spill] sm:$0xff] %v4168_v42  ;;  %v4438_v45 = vstv %s2906_s9  ;;  %s2942_s9 = sld [smem:[#allocation9 + $0x2e]] }
 0x2c2   : > { %5876 = vst [vmem:[#allocation74_spill] sm:$0xff] %v4283_v53 }
 0x2c4   : > { %740 = vrot.lane.b32.xlu0 %v5745_v1, %s3222_s29  ;;  %v4357_v57 = vstv %s2894_s13  ;;  %s2937_s13 = sld [smem:[#allocation9 + $0x4a]] }
 0x2c5   : > { %1603 = vrot.lane.b32.xlu2 %v1600_v18, %s3223_s11  ;;  %1557 = vrot.lane.b32.xlu1 %v3717_v11, %s3223_s11  ;;  %v5743_v11 = vrot.slane %v4186_v29, 5  ;;  %v4197_v18 = vstv %s2935_s26  ;;  %s4269_s26 = sld [smem:[#allocation9 + $0x17]] }
 0x2c6   : > { %v4180_v48 = vpop.permute.xlu0 %1668  ;;  %v4182_v15 = vpop.permute.xlu2 %805  ;;  %v4212_v17 = vmul.f32 %v4197_v18, %v3490_v20  ;;  %v4229_v20 = vld [vmem:[#allocation3] sm:$0xff] }
 0x2c7   : > { %5865 = vst [vmem:[#allocation64_spill] sm:$0xff] %v4180_v48  ;;  %v4193_v49 = vpop.permute.xlu1 %1371  ;;  %v1750_v8 = vmul.f32 %v4229_v20, %v4197_v18 }
 0x2c8   : > { %5866 = vst [vmem:[#allocation65_spill] sm:$0xff] %v4193_v49  ;;  %v4264_v49 = vstv %s4199_s10  ;;  %s2898_s10 = sld [smem:[#allocation9 + $0x24]] }
 0x2c9   : > { %v1756_v1 = vrot.slane %v1750_v8, 2  ;;  %v4277_v22 = vmul.f32 %v4264_v49, %v3787_v54 }
 0x2cb   : > { %v5760_v42 = vrot.slane %v4277_v22, 3 }
 0x2cc   : > { %1015 = vrot.lane.b32.xlu0 %v5743_v11, %s3222_s29  ;;  %v5748_v11 = vrot.slane %v4212_v17, 2 }
 0x2cd   : > { %736 = vrot.lane.b32.xlu2 %v5744_v13, %s3222_s29  ;;  %1647 = vrot.lane.b32.xlu1 %v1644_v21, %s3223_s11  ;;  %v4235_v21 = vmul.f32 %v4219_v30, %v3787_v54  ;;  %v5747_v13 = vrot.slane %v4227_v7, 4 }
 0x2ce   : > { %v4221_v38 = vpop.permute.xlu0 %1696  ;;  %v4223_v40 = vpop.permute.xlu2 %896  ;;  %v1758_v33 = vsel %vm553_vm1, %v1756_v1, %v5748_v11  ;;  %v4267_v1 = vmul.f32 %v1343_v47, %v3758_v35 }
 0x2cf   : > { %5868 = vst [vmem:[#allocation66_spill] sm:$0xff] %v4221_v38  ;;  %v4237_v12 = vpop.permute.xlu1 %1467  ;;  %v823_v34 = vrot.slane %v4235_v21, 1  ;;  %v4285_v38 = vstv %s2970_s20  ;;  %s2914_s20 = sld [smem:[#allocation9 + $0x2c]] }
 0x2d0   : > { %5869 = vst [vmem:[#allocation67_spill] sm:$0xff] %v4223_v40  ;;  %v4293_v5 = vmul.f32 %v4285_v38, %v3758_v35  ;;  %v5759_v41 = vrot.slane %v4267_v1, 7  ;;  %v2344_v40 = vmul.f32 %v4283_v53, %v3787_v54 }
 0x2d1   : > { %5870 = vst [vmem:[#allocation68_spill] sm:$0xff] %v4237_v12 }
 0x2d2   : > { %5877 = vst [vmem:[#allocation75_spill] sm:$0xff] %v4285_v38  ;;  %v2351_v61 = vrot.slane %v2344_v40, 2  ;;  %v4333_v40 = vstv %s4269_s26  ;;  %s2926_s26 = sld [smem:[#allocation9 + $0x26]] }
 0x2d3   : > { %5879 = vst [vmem:[#allocation77_spill] sm:$0xff] %v4293_v5 }
 0x2d4   : > { %1267 = vrot.lane.b32.xlu0 %v5747_v13, %s3220_s8  ;;  %v4261_v13 = vmul.f32 %v4250_v37, %v3787_v54 }
 0x2d5   : > { %829 = vrot.lane.b32.xlu2 %v823_v34, %s3222_s29  ;;  %1761 = vrot.lane.b32.xlu1 %v1758_v33, %s3221_s5  ;;  %v4271_v33 = vstv %s2954_s12  ;;  %s2910_s12 = sld [smem:[#allocation9 + $0x1e]] }
 0x2d6   : > { %v4255_v8 = vpop.permute.xlu0 %803  ;;  %v4257_v21 = vpop.permute.xlu2 %944  ;;  %5873 = vst [vmem:[#allocation71_spill] sm:$0xff] %v4271_v33  ;;  %v4281_v6 = vmul.f32 %v4271_v33, %v3758_v35  ;;  %v2184_v48 = vmul.f32 %v4271_v33, %v3787_v54  ;;  %v5758_v12 = vrot.slane %v4261_v13, 3 }
 0x2d7   : > { %5871 = vst [vmem:[#allocation69_spill] sm:$0xff] %v4255_v8  ;;  %v4273_v11 = vpop.permute.xlu1 %1666  ;;  %v2528_v8 = vmul.f32 %v4285_v38, %v3787_v54 }
 0x2d8   : > { %5872 = vst [vmem:[#allocation70_spill] sm:$0xff] %v4257_v21  ;;  %v4289_v21 = vmul.f32 %v4283_v53, %v3758_v35  ;;  %v2191_v28 = vrot.slane %v2184_v48, 5  ;;  %v4318_v48 = vmul.f32 %v4219_v30, %v3758_v35 }
 0x2d9   : > { %5874 = vst [vmem:[#allocation72_spill] sm:$0xff] %v4273_v11  ;;  %v2535_v38 = vrot.slane %v2528_v8, 6  ;;  %v4321_v11 = vstv %s4253_s22  ;;  %s2934_s22 = sld [smem:[#allocation9 + $0x12]] }
 0x2da   : > { %5875 = vst [vmem:[#allocation73_spill] sm:$0xff] %v4281_v6  ;;  %v4337_v8 = vmul.f32 %v4321_v11, %v3787_v54 }
 0x2db   : > { %5878 = vst [vmem:[#allocation76_spill] sm:$0xff] %v4289_v21 }
 0x2dc   : > { %1535 = vrot.lane.b32.xlu0 %v5758_v12, %s3223_s11  ;;  %v5880_v12 = vrot.slane %v4281_v6, 5  ;;  %v5886_v6 = vrot.slane %v4293_v5, 6 }
 0x2dd   : > { %1355 = vrot.lane.b32.xlu2 %v5759_v41, %s3223_s11  ;;  %922 = vrot.lane.b32.xlu1 %v5760_v42, %s3222_s29  ;;  %v5884_v42 = vrot.slane %v4289_v21, 2  ;;  %v770_v21 = vstv %s2890_s25  ;;  %s2939_s25 = sld [smem:[#allocation9 + $0x51]] }
 0x2de   : > { %v4326_v41 = vsel %vm963_vm14, %v5880_v12, %v2191_v28  ;;  %v4328_v33 = vpop.permute.xlu0 %851  ;;  %v4330_v53 = vpop.permute.xlu2 %1035  ;;  %v4347_v28 = vsel %vm699_vm2, %v5886_v6, %v2535_v38  ;;  %v4366_v38 = vmul.f32 %v770_v21, %v3758_v35 }
 0x2df   : > { %5881 = vst [vmem:[#allocation78_spill] sm:$0xff] %v4326_v41  ;;  %v4342_v16 = vsel %vm553_vm1, %v5884_v42, %v2351_v61  ;;  %v4349_v12 = vpop.permute.xlu1 %1700  ;;  %v4353_v41 = vmul.f32 %v4333_v40, %v3787_v54  ;;  %v866_v42 = vmul.f32 %v4357_v57, %v3787_v54 }
 0x2e0   : > { %5882 = vst [vmem:[#allocation79_spill] sm:$0xff] %v4328_v33  ;;  %v5766_v33 = vrot.slane %v4337_v8, 5 }
 0x2e1   : > { %5883 = vst [vmem:[#allocation80_spill] sm:$0xff] %v4330_v53  ;;  %v5764_v53 = vrot.slane %v4318_v48, 1  ;;  %v5767_v6 = vrot.slane %v4353_v41, 2  ;;  %v874_v5 = vrot.slane %v866_v42, 3 }
 0x2e2   : > { %5885 = vst [vmem:[#allocation81_spill] sm:$0xff] %v4342_v16 }
 0x2e3   : > { %5887 = vst [vmem:[#allocation82_spill] sm:$0xff] %v4347_v28  ;;  %v824_v61 = vsel %vm777_vm0, %v5764_v53, %v823_v34  ;;  %v4377_v34 = vmul.f32 %v4357_v57, %v3758_v35  ;;  %v771_v53 = vmul.f32 %v770_v21, %v3776_v56 }
 0x2e4   : > { %5888 = vst [vmem:[#allocation83_spill] sm:$0xff] %v4349_v12  ;;  %827 = vrot.lane.b32.xlu0 %v824_v61, %s3222_s29  ;;  %v5770_v12 = vrot.slane %v4366_v38, 1 }
 0x2e5   : > { %1627 = vrot.lane.b32.xlu2 %v5766_v33, %s3223_s11  ;;  %1175 = vrot.lane.b32.xlu1 %v5767_v6, %s3220_s8  ;;  %v4387_v33 = vmul.f32 %v1343_v47, %v3776_v56  ;;  %v5769_v6 = vrot.slane %v4377_v34, 3  ;;  %v778_v4 = vrot.slane %v771_v53, 1  ;;  %v908_v47 = vmul.f32 %v4264_v49, %v3758_v35 }
 0x2e6   : > { %v4380_v28 = vpop.permute.xlu0 %942  ;;  %v4382_v16 = vpop.permute.xlu2 %1149 }
 0x2e7   : > { %5889 = vst [vmem:[#allocation84_spill] sm:$0xff] %v4380_v28  ;;  %v4384_v61 = vpop.permute.xlu1 %758  ;;  %v875_v51 = vsel %vm870_vm13, %v5769_v6, %v874_v5  ;;  %v5771_v28 = vrot.slane %v4387_v33, 7  ;;  %v907_v5 = vmul.f32 %v4264_v49, %v3776_v56  ;;  %v4411_v6 = vstv %s2920_s6  ;;  %s2938_s6 = sld [smem:[#allocation9 + $0x20]] }
 0x2e8   : > { %5890 = vst [vmem:[#allocation85_spill] sm:$0xff] %v4382_v16  ;;  %v780_v16 = vsel %vm777_vm0, %v778_v4, %v5770_v12 }
 0x2e9   : > { %5891 = vst [vmem:[#allocation86_spill] sm:$0xff] %v4384_v61  ;;  %v913_v12 = vrot.slane %v907_v5, 3  ;;  %v956_v61 = vstv %s2898_s10  ;;  %s2940_s10 = sld [smem:[#allocation9 + $0x27]] }
 0x2ec   : > { %878 = vrot.lane.b32.xlu0 %v875_v51, %s3222_s29  ;;  %v4417_v51 = vmul.f32 %v4411_v6, %v3787_v54 }
 0x2ed   : > { %783 = vrot.lane.b32.xlu2 %v780_v16, %s3222_s29  ;;  %1351 = vrot.lane.b32.xlu1 %v5771_v28, %s3223_s11  ;;  %v914_v16 = vrot.slane %v908_v47, 3  ;;  %v958_v28 = vmul.f32 %v956_v61, %v3758_v35  ;;  %v957_v47 = vmul.f32 %v956_v61, %v3776_v56 }
 0x2ee   : > { %v4407_v53 = vpop.permute.xlu0 %991  ;;  %v4409_v42 = vpop.permute.xlu2 %1197  ;;  %v5774_v49 = vrot.slane %v4417_v51, 1 }
 0x2ef   : > { %5892 = vst [vmem:[#allocation87_spill] sm:$0xff] %v4407_v53  ;;  %v4413_v4 = vpop.permute.xlu1 %849  ;;  %v915_v10 = vsel %vm870_vm13, %v913_v12, %v914_v16 }
 0x2f0   : > { %5893 = vst [vmem:[#allocation88_spill] sm:$0xff] %v4409_v42  ;;  %v5895_v42 = vrot.slane %v4277_v22, 3  ;;  %v965_v22 = vrot.slane %v958_v28, 5  ;;  %v5898_v28 = vrot.slane %v4166_v52, 7 }
 0x2f1   : > { %5894 = vst [vmem:[#allocation89_spill] sm:$0xff] %v4413_v4  ;;  %v959_v4 = vmul.f32 %v956_v61, %v3787_v54  ;;  %v4446_v61 = vmul.f32 %v4178_v3, %v3758_v35 }
 0x2f2   : > { %v917_v50 = vsel %vm870_vm13, %v914_v16, %v5895_v42  ;;  %v964_v16 = vrot.slane %v957_v47, 5 }
 0x2f3   : > { %v967_v42 = vrot.slane %v959_v4, 5  ;;  %v5899_v4 = vrot.slane %v4191_v23, 7 }
 0x2f4   : > { %918 = vrot.lane.b32.xlu0 %v915_v10, %s3222_s29  ;;  %v966_v10 = vsel %vm963_vm14, %v964_v16, %v965_v22  ;;  %v773_v16 = vmul.f32 %v770_v21, %v3787_v54 }
 0x2f5   : > { %920 = vrot.lane.b32.xlu2 %v917_v50, %s3222_s29  ;;  %1443 = vrot.lane.b32.xlu1 %v5774_v49, %s3223_s11  ;;  %v968_v50 = vsel %vm963_vm14, %v965_v22, %v967_v42  ;;  %v1120_v49 = vmul.f32 %v4438_v45, %v3787_v54  ;;  %v735_v47 = vsel %vm732_vm12, %v5899_v4, %v5898_v28  ;;  %v5776_v28 = vrot.slane %v4446_v61, 5 }
 0x2f6   : > { %v4432_v5 = vpop.permute.xlu0 %1195  ;;  %v4434_v53 = vpop.permute.xlu2 %1287  ;;  %v4459_v22 = vmul.f32 %v4438_v45, %v3758_v35  ;;  %v1000_v42 = vmul.f32 %v4178_v3, %v3776_v56  ;;  %v781_v4 = vrot.slane %v773_v16, 1 }
 0x2f7   : > { %5896 = vst [vmem:[#allocation90_spill] sm:$0xff] %v4432_v5  ;;  %v4436_v12 = vpop.permute.xlu1 %898  ;;  %v1127_v23 = vrot.slane %v1120_v49, 2  ;;  %v1161_v5 = vmul.f32 %v4333_v40, %v3758_v35  ;;  %v5901_v49 = vrot.slane %v4366_v38, 1  ;;  %v1209_v38 = vstv %s2910_s12  ;;  %s4780_s12 = sld [smem:[#allocation9 + $0x5f]] }
 0x2f8   : > { %5897 = vst [vmem:[#allocation91_spill] sm:$0xff] %v4434_v53  ;;  %v5775_v21 = vrot.slane %v4459_v22, 2 }
 0x2f9   : > { %v782_v16 = vsel %vm777_vm0, %v5901_v49, %v781_v4  ;;  %v5905_v49 = vrot.slane %v4353_v41, 2 }
 0x2fa   : > { %v1128_v53 = vsel %vm553_vm1, %v5775_v21, %v1127_v23 }
 0x2fc   : > { %969 = vrot.lane.b32.xlu0 %v966_v10, %s3222_s29 }
 0x2fd   : > { %971 = vrot.lane.b32.xlu2 %v968_v50, %s3222_s29  ;;  %738 = vrot.lane.b32.xlu1 %v735_v47, %s3222_s29  ;;  %v1006_v47 = vrot.slane %v1000_v42, 5  ;;  %v1160_v42 = vmul.f32 %v4333_v40, %v3776_v56  ;;  %v1211_v40 = vmul.f32 %v1209_v38, %v3758_v35 }
 0x2fe   : > { %v4463_v10 = vpop.permute.xlu0 %1243  ;;  %v4465_v50 = vpop.permute.xlu2 %1335 }
 0x2ff   : > { %v4467_v52 = vpop.permute.xlu1 %989  ;;  %v1008_v3 = vsel %vm963_vm14, %v1006_v47, %v5776_v28  ;;  %v814_v47 = vmul.f32 %v4219_v30, %v3776_v56  ;;  %v5906_v30 = vrot.slane %v4318_v48, 1 }
 0x300   : > { %5900 = vst [vmem:[#allocation92_spill] sm:$0xff] %v4467_v52 }
 0x301   : > { %v820_v52 = vrot.slane %v814_v47, 1 }
 0x304   : > { %1131 = vrot.lane.b32.xlu0 %v1128_v53, %s3220_s8  ;;  %v1167_v53 = vrot.slane %v1161_v5, 2  ;;  %v822_v5 = vsel %vm777_vm0, %v820_v52, %v5906_v30 }
 0x305   : > { %1011 = vrot.lane.b32.xlu2 %v1008_v3, %s3222_s29  ;;  %785 = vrot.lane.b32.xlu1 %v782_v16, %s3222_s29  ;;  %v1166_v3 = vrot.slane %v1160_v42, 2  ;;  %v1210_v42 = vmul.f32 %v1209_v38, %v3776_v56 }
 0x306   : > { %v4487_v23 = vpop.permute.xlu0 %1333  ;;  %v4489_v21 = vpop.permute.xlu2 %1417  ;;  %v1170_v16 = vsel %vm553_vm1, %v1167_v53, %v5905_v49 }
 0x307   : > { %5902 = vst [vmem:[#allocation93_spill] sm:$0xff] %v4487_v23  ;;  %v4493_v28 = vpop.permute.xlu1 %1037  ;;  %v1168_v4 = vsel %vm553_vm1, %v1166_v3, %v1167_v53  ;;  %v1212_v23 = vmul.f32 %v1209_v38, %v3787_v54  ;;  %v864_v53 = vmul.f32 %v4357_v57, %v3776_v56  ;;  %v1253_v38 = vmul.f32 %v4217_v14, %v3758_v35 }
 0x308   : > { %5903 = vst [vmem:[#allocation94_spill] sm:$0xff] %v4489_v21  ;;  %v5909_v57 = vrot.slane %v4377_v34, 3  ;;  %v5913_v34 = vrot.slane %v4267_v1, 7  ;;  %v5916_v1 = vrot.slane %v4446_v61, 5  ;;  %v1821_v21 = vstv %s2938_s6  ;;  %s4970_s6 = sld [smem:[#allocation9 + $0x1a]] }
 0x309   : > { %5904 = vst [vmem:[#allocation95_spill] sm:$0xff] %v4493_v28  ;;  %v1219_v49 = vrot.slane %v1212_v23, 4  ;;  %v871_v48 = vrot.slane %v864_v53, 3  ;;  %v1252_v23 = vmul.f32 %v4217_v14, %v3776_v56  ;;  %v1259_v35 = vrot.slane %v1253_v38, 4  ;;  %v4544_v14 = vld [vmem:[#allocation2 + $0x8] sm:$0xff] }
 0x30a   : > { %v5915_v38 = vrot.slane %v4186_v29, 5 }
 0x30c   : > { %1171 = vrot.lane.b32.xlu0 %v1168_v4, %s3220_s8  ;;  %v1217_v4 = vrot.slane %v1211_v40, 4  ;;  %v873_v40 = vsel %vm870_vm13, %v871_v48, %v5909_v57  ;;  %v5914_v48 = vrot.slane %v4387_v33, 7  ;;  %v1010_v33 = vsel %vm963_vm14, %v5916_v1, %v5915_v38 }
 0x30d   : > { %1173 = vrot.lane.b32.xlu2 %v1170_v16, %s3220_s8  ;;  %825 = vrot.lane.b32.xlu1 %v822_v5, %s3222_s29  ;;  %v1216_v16 = vrot.slane %v1210_v42, 4 }
 0x30e   : > { %v4508_v47 = vpop.permute.xlu0 %1373  ;;  %v4510_v41 = vpop.permute.xlu2 %1465  ;;  %v1220_v30 = vsel %vm626_vm15, %v1217_v4, %v1219_v49  ;;  %v4534_v49 = vstv %s2918_s7  ;;  %s4786_s7 = sld [smem:[#allocation9 + $0x5]] }
 0x30f   : > { %5907 = vst [vmem:[#allocation96_spill] sm:$0xff] %v4508_v47  ;;  %v4514_v3 = vpop.permute.xlu1 %1151  ;;  %v1218_v52 = vsel %vm626_vm15, %v1216_v16, %v1217_v4  ;;  %v1258_v4 = vrot.slane %v1252_v23, 4  ;;  %v1301_v16 = vstv %s2914_s20  ;;  %v1388_v56 = vmul.f32 %v4534_v49, %v3787_v54  ;;  %v4559_v54 = vld [vmem:[#allocation2] sm:$0xff]  ;;  %s4818_s20 = sld [smem:[#allocation9 + $0x36]] }
 0x310   : > { %5908 = vst [vmem:[#allocation97_spill] sm:$0xff] %v4510_v41  ;;  %v1303_v57 = vmul.f32 %v4544_v14, %v1301_v16  ;;  %v1302_v23 = vmul.f32 %v4559_v54, %v1301_v16  ;;  %v1118_v29 = vmul.f32 %v4559_v54, %v4438_v45  ;;  %v5920_v45 = vrot.slane %v4459_v22, 2 }
 0x311   : > { %v5923_v22 = vrot.slane %v4417_v51, 1 }
 0x312   : > { %v1308_v38 = vrot.slane %v1302_v23, 6  ;;  %v1124_v1 = vrot.slane %v1118_v29, 2 }
 0x314   : > { %1221 = vrot.lane.b32.xlu0 %v1218_v52, %s3220_s8  ;;  %v1350_v52 = vsel %vm732_vm12, %v5914_v48, %v5913_v34  ;;  %v1395_v48 = vrot.slane %v1388_v56, 1  ;;  %v1126_v56 = vsel %vm553_vm1, %v1124_v1, %v5920_v45 }
 0x315   : > { %1223 = vrot.lane.b32.xlu2 %v1220_v30, %s3220_s8  ;;  %876 = vrot.lane.b32.xlu1 %v873_v40, %s3222_s29  ;;  %v1260_v30 = vsel %vm626_vm15, %v1258_v4, %v1259_v35  ;;  %v4557_v40 = vmul.f32 %v4544_v14, %v4534_v49 }
 0x316   : > { %v4528_v5 = vpop.permute.xlu0 %1463 }
 0x317   : > { %5910 = vst [vmem:[#allocation98_spill] sm:$0xff] %v4528_v5  ;;  %v4530_v42 = vpop.permute.xlu2 %1555  ;;  %v4532_v53 = vpop.permute.xlu1 %1241  ;;  %v1429_v5 = vmul.f32 %v4544_v14, %v4411_v6 }
 0x318   : > { %5911 = vst [vmem:[#allocation99_spill] sm:$0xff] %v4530_v42 }
 0x319   : > { %5912 = vst [vmem:[#allocation100_spill] sm:$0xff] %v4532_v53  ;;  %v1863_v53 = vstv %s2940_s10  ;;  %s5105_s10 = sld [smem:[#allocation9 + $0xd]] }
 0x31c   : > { %1353 = vrot.lane.b32.xlu0 %v1350_v52, %s3223_s11  ;;  %v1309_v52 = vrot.slane %v1303_v57, 6  ;;  %v1428_v57 = vmul.f32 %v4559_v54, %v4411_v6 }
 0x31d   : > { %1263 = vrot.lane.b32.xlu2 %v1260_v30, %s3220_s8  ;;  %1013 = vrot.lane.b32.xlu1 %v1010_v33, %s3222_s29  ;;  %v5777_v30 = vrot.slane %v4557_v40, 1  ;;  %s2922_s29 = sld [smem:[#allocation9 + $0x18]] }
 0x31e   : > { %v4562_v4 = vpop.permute.xlu0 %1511  ;;  %v1310_v42 = vsel %vm699_vm2, %v1308_v38, %v1309_v52  ;;  %v1435_v38 = vrot.slane %v1429_v5, 1  ;;  %v5924_v5 = vrot.slane %v4227_v7, 4 }
 0x31f   : > { %5917 = vst [vmem:[#allocation101_spill] sm:$0xff] %v4562_v4  ;;  %v4564_v34 = vpop.permute.xlu2 %1603  ;;  %v4568_v61 = vpop.permute.xlu1 %1289  ;;  %v1396_v33 = vsel %vm777_vm0, %v5777_v30, %v1395_v48  ;;  %v1434_v30 = vrot.slane %v1428_v57, 1 }
 0x320   : > { %5918 = vst [vmem:[#allocation102_spill] sm:$0xff] %v4564_v34  ;;  %v1438_v1 = vsel %vm777_vm0, %v1435_v38, %v5923_v22  ;;  %v1262_v57 = vsel %vm626_vm15, %v1259_v35, %v5924_v5 }
 0x321   : > { %5919 = vst [vmem:[#allocation103_spill] sm:$0xff] %v4568_v61 }
 0x324   : > { %1399 = vrot.lane.b32.xlu0 %v1396_v33, %s3223_s11  ;;  %v1477_v33 = vstv %s2922_s29  ;;  %s2948_s29 = sld [smem:[#allocation9 + $0x13]] }
 0x325   : > { %1313 = vrot.lane.b32.xlu2 %v1310_v42, %s3220_s8  ;;  %1129 = vrot.lane.b32.xlu1 %v1126_v56, %s3220_s8  ;;  %v1436_v42 = vsel %vm777_vm0, %v1434_v30, %v1435_v38  ;;  %v1479_v45 = vmul.f32 %v4544_v14, %v1477_v33  ;;  %v4596_v56 = vld [vmem:[#allocation2 + $0x10] sm:$0x3f]  ;;  %v1478_v51 = vmul.f32 %v4559_v54, %v1477_v33 }
 0x326   : > { %v4585_v23 = vpop.permute.xlu0 %1601  ;;  %v1480_v6 = vmul.f32 %v4596_v56, %v1477_v33  ;;  %v1304_v30 = vmul.f32 %v4596_v56, %v1301_v16  ;;  %v1521_v16 = vmul.f32 %v4544_v14, %v4250_v37  ;;  %v1866_v28 = vmul.f32 %v4596_v56, %v1863_v53 }
 0x327   : > { %5921 = vst [vmem:[#allocation104_spill] sm:$0xff] %v4585_v23  ;;  %v4587_v29 = vpop.permute.xlu2 %736  ;;  %v4589_v48 = vpop.permute.xlu1 %1419  ;;  %v1485_v23 = vrot.slane %v1479_v45, 3  ;;  %v4623_v45 = vmul.f32 %v4544_v14, %v4321_v11 }
 0x328   : > { %5922 = vst [vmem:[#allocation105_spill] sm:$0xff] %v4589_v48  ;;  %v1311_v47 = vrot.slane %v1304_v30, 6 }
 0x32a   : > { %v1312_v33 = vsel %vm699_vm2, %v1309_v52, %v1311_v47  ;;  %v5778_v47 = vrot.slane %v4623_v45, 5 }
 0x32c   : > { %1439 = vrot.lane.b32.xlu0 %v1436_v42, %s3223_s11  ;;  %v1487_v42 = vrot.slane %v1480_v6, 3  ;;  %v1520_v6 = vmul.f32 %v4559_v54, %v4250_v37 }
 0x32d   : > { %1441 = vrot.lane.b32.xlu2 %v1438_v1, %s3223_s11  ;;  %1265 = vrot.lane.b32.xlu1 %v1262_v57, %s3220_s8  ;;  %v1484_v1 = vrot.slane %v1478_v51, 3  ;;  %v1386_v57 = vmul.f32 %v4559_v54, %v4534_v49  ;;  %v1527_v51 = vrot.slane %v1521_v16, 3  ;;  %v5929_v16 = vrot.slane %v4557_v40, 1 }
 0x32e   : > { %v4607_v38 = vpop.permute.xlu0 %1649  ;;  %v1488_v35 = vsel %vm870_vm13, %v1485_v23, %v1487_v42  ;;  %v1526_v52 = vrot.slane %v1520_v6, 3 }
 0x32f   : > { %5925 = vst [vmem:[#allocation106_spill] sm:$0xff] %v4607_v38  ;;  %v4609_v22 = vpop.permute.xlu2 %829  ;;  %v4611_v41 = vpop.permute.xlu1 %1509  ;;  %v1486_v7 = vsel %vm870_vm13, %v1484_v1, %v1485_v23  ;;  %v1392_v42 = vrot.slane %v1386_v57, 1  ;;  %v1729_v1 = vstv %s2934_s22  ;;  %s3224_s22 = smov 123  }
 0x330   : > { %5926 = vst [vmem:[#allocation107_spill] sm:$0xff] %v4611_v41  ;;  %v1731_v38 = vmul.f32 %v4544_v14, %v1729_v1 }
 0x331   : > { %v1394_v6 = vsel %vm777_vm0, %v1392_v42, %v5929_v16 }
 0x334   : > { %1489 = vrot.lane.b32.xlu0 %v1486_v7, %s3223_s11  ;;  %v1569_v7 = vstv %s2926_s26  ;;  %s2953_s26 = sld [smem:[#allocation9 + $0x52]] }
 0x335   : > { %1491 = vrot.lane.b32.xlu2 %v1488_v35, %s3223_s11  ;;  %1315 = vrot.lane.b32.xlu1 %v1312_v33, %s3220_s8  ;;  %v5928_v35 = vrot.slane %v4337_v8, 5  ;;  %v1528_v33 = vsel %vm870_vm13, %v1526_v52, %v1527_v51  ;;  %v1571_v49 = vmul.f32 %v4544_v14, %v1569_v7  ;;  %v1730_v8 = vmul.f32 %v4559_v54, %v1729_v1  ;;  %s2936_s8 = sld [smem:[#allocation9 + $0x19]] }
 0x336   : > { %v741_v5 = vpop.permute.xlu0 %740  ;;  %v1570_v57 = vmul.f32 %v4559_v54, %v1569_v7 }
 0x337   : > { %v4627_v23 = vpop.permute.xlu2 %1355  ;;  %v4631_v30 = vpop.permute.xlu1 %1557  ;;  %v1622_v37 = vsel %vm963_vm14, %v5778_v47, %v5928_v35  ;;  %v1577_v41 = vrot.slane %v1571_v49, 5 }
 0x338   : > { %5927 = vst [vmem:[#allocation108_spill] sm:$0xff] %v4631_v30  ;;  %v1737_v30 = vrot.slane %v1731_v38, 2  ;;  %v1576_v61 = vrot.slane %v1570_v57, 5  ;;  %v5932_v38 = vrot.slane %v4261_v13, 3 }
 0x33a   : > { %v1578_v42 = vsel %vm963_vm14, %v1576_v61, %v1577_v41  ;;  %v1530_v49 = vsel %vm870_vm13, %v1527_v51, %v5932_v38 }
 0x33c   : > { %1625 = vrot.lane.b32.xlu0 %v1622_v37, %s3223_s11  ;;  %v1736_v37 = vrot.slane %v1730_v8, 2  ;;  %v1572_v8 = vmul.f32 %v4596_v56, %v1569_v7 }
 0x33d   : > { %1531 = vrot.lane.b32.xlu2 %v1528_v33, %s3223_s11  ;;  %1397 = vrot.lane.b32.xlu1 %v1394_v6, %s3223_s11  ;;  %v4656_v33 = vld [vmem:[#allocation3 + $0x10] sm:$0x3f]  ;;  %v1732_v6 = vmul.f32 %v4596_v56, %v1729_v1 }
 0x33e   : > { %v1016_v35 = vpop.permute.xlu0 %1015  ;;  %v1738_v40 = vsel %vm553_vm1, %v1736_v37, %v1737_v30  ;;  %v1752_v16 = vmul.f32 %v4656_v33, %v4197_v18 }
 0x33f   : > { %v4650_v52 = vpop.permute.xlu2 %1627  ;;  %v4652_v47 = vpop.permute.xlu1 %1647  ;;  %v1739_v1 = vrot.slane %v1732_v6, 2  ;;  %v747_v6 = vadd.f32 %v741_v5, %v3851_v39  ;;  %v4694_v5 = vld [vmem:[#allocation3 + $0x8] sm:$0xff] }
 0x340   : > { %5930 = vst [vmem:[#allocation109_spill] sm:$0xff] %v4650_v52  ;;  %v1759_v18 = vrot.slane %v1752_v16, 2 }
 0x341   : > { %5931 = vst [vmem:[#allocation110_spill] sm:$0xff] %v4652_v47  ;;  %v1579_v47 = vrot.slane %v1572_v8, 5  ;;  %v1740_v51 = vsel %vm553_vm1, %v1737_v30, %v1739_v1  ;;  %v1612_v8 = vmul.f32 %v4559_v54, %v4321_v11  ;;  %v5935_v11 = vrot.slane %v4623_v45, 5 }
 0x343   : > { %v1580_v38 = vsel %vm963_vm14, %v1577_v41, %v1579_v47  ;;  %v836_v41 = vadd.f32 %v4609_v22, %v747_v6 }
 0x344   : > { %1741 = vrot.lane.b32.xlu0 %v1738_v40, %s3221_s5  ;;  %v1771_v40 = vstv %s2936_s8  ;;  %s2952_s8 = sld [smem:[#allocation9 + $0x21]] }
 0x345   : > { %1581 = vrot.lane.b32.xlu2 %v1578_v42, %s3223_s11  ;;  %1533 = vrot.lane.b32.xlu1 %v1530_v49, %s3223_s11  ;;  %v5934_v42 = vrot.slane %v4212_v17, 2  ;;  %v1773_v7 = vmul.f32 %v4544_v14, %v1771_v40  ;;  %v1772_v16 = vmul.f32 %v4559_v54, %v1771_v40  ;;  %v1774_v30 = vmul.f32 %v4596_v56, %v1771_v40 }
 0x346   : > { %v4668_v61 = vpop.permute.xlu0 %1267 }
 0x347   : > { %v4670_v57 = vpop.permute.xlu2 %783  ;;  %v4672_v37 = vpop.permute.xlu1 %1761  ;;  %v1760_v13 = vsel %vm553_vm1, %v5934_v42, %v1759_v18  ;;  %v1779_v1 = vrot.slane %v1773_v7, 2  ;;  %v1778_v42 = vrot.slane %v1772_v16, 2  ;;  %v1781_v47 = vrot.slane %v1774_v30, 2 }
 0x348   : > { %5933 = vst [vmem:[#allocation111_spill] sm:$0xff] %v4672_v37 }
 0x349   : > { %v1780_v39 = vsel %vm553_vm1, %v1778_v42, %v1779_v1 }
 0x34c   : > { %1763 = vrot.lane.b32.xlu0 %v1760_v13, %s3221_s5  ;;  %v1618_v13 = vrot.slane %v1612_v8, 5 }
 0x34d   : > { %1743 = vrot.lane.b32.xlu2 %v1740_v51, %s3221_s5  ;;  %1583 = vrot.lane.b32.xlu1 %v1580_v38, %s3223_s11  ;;  %v1795_v51 = vstv %s2937_s13  ;;  %s4958_s13 = sld [smem:[#allocation9 + $0x60]] }
 0x34e   : > { %v4685_v49 = vpop.permute.xlu0 %1535  ;;  %v1797_v38 = vmul.f32 %v4694_v5, %v1795_v51  ;;  %v1620_v7 = vsel %vm963_vm14, %v1618_v13, %v5935_v11  ;;  %v1796_v22 = vmul.f32 %v4229_v20, %v1795_v51  ;;  %v1798_v30 = vmul.f32 %v4656_v33, %v1795_v51 }
 0x34f   : > { %v4687_v17 = vpop.permute.xlu2 %920  ;;  %v923_v18 = vpop.permute.xlu1 %922  ;;  %v1823_v11 = vmul.f32 %v4544_v14, %v1821_v21  ;;  %v1782_v51 = vsel %vm553_vm1, %v1779_v1, %v1781_v47 }
 0x350   : > { %v929_v40 = vadd.f32 %v923_v18, %v836_v41  ;;  %v1803_v18 = vrot.slane %v1797_v38, 2  ;;  %v1802_v41 = vrot.slane %v1796_v22, 2  ;;  %v1805_v37 = vrot.slane %v1798_v30, 2 }
 0x351   : > { %v1822_v38 = vmul.f32 %v4559_v54, %v1821_v21 }
 0x352   : > { %v1022_v42 = vadd.f32 %v1016_v35, %v929_v40  ;;  %v1804_v45 = vsel %vm553_vm1, %v1802_v41, %v1803_v18 }
 0x354   : > { %1787 = vrot.lane.b32.xlu0 %v1781_v47, %s3221_s5  ;;  %v1828_v47 = vrot.slane %v1822_v38, 4 }
 0x355   : > { %1783 = vrot.lane.b32.xlu2 %v1780_v39, %s3221_s5  ;;  %1623 = vrot.lane.b32.xlu1 %v1620_v7, %s3223_s11  ;;  %v1841_v39 = vstv %s2939_s25  ;;  %v1095_v7 = vadd.f32 %v4034_v55, %v1022_v42  ;;  %v1829_v42 = vrot.slane %v1823_v11, 4  ;;  %s2941_s11 = sld [smem:[#allocation9 + $0x58]]  ;;  %v1824_v11 = vmul.f32 %v4596_v56, %v1821_v21 }
 0x356   : > { %v4704_v16 = vpop.permute.xlu0 %827  ;;  %v1843_v13 = vmul.f32 %v4694_v5, %v1841_v39  ;;  %v1842_v35 = vmul.f32 %v4229_v20, %v1841_v39  ;;  %v1844_v52 = vmul.f32 %v4656_v33, %v1841_v39  ;;  %v4748_v39 = vmul.f32 %v4544_v14, %v3826_v60  ;;  %s4964_s25 = sld [smem:[#allocation9 + $0x2f]] }
 0x357   : > { %v4706_v6 = vpop.permute.xlu2 %971  ;;  %v1176_v8 = vpop.permute.xlu1 %1175  ;;  %v5936_v21 = vrot.slane %v3832_v63, 2 }
 0x358   : > { %v1182_v40 = vadd.f32 %v1176_v8, %v1095_v7  ;;  %v1849_v55 = vrot.slane %v1843_v13, 4  ;;  %v1848_v1 = vrot.slane %v1842_v35, 4  ;;  %v1830_v7 = vsel %vm626_vm15, %v1828_v47, %v1829_v42 }
 0x359   : > { %v1806_v13 = vsel %vm553_vm1, %v1803_v18, %v1805_v37  ;;  %v1865_v35 = vmul.f32 %v4544_v14, %v1863_v53  ;;  %v1851_v18 = vrot.slane %v1844_v52, 4  ;;  %v662_v48 = vrot.slane %v4748_v39, 4 }
 0x35a   : > { %v1850_v8 = vsel %vm626_vm15, %v1848_v1, %v1849_v55 }
 0x35b   : > { %v1887_v4 = vstv %s2941_s11  ;;  %v1852_v63 = vsel %vm626_vm15, %v1849_v55, %v1851_v18  ;;  %v1864_v18 = vmul.f32 %v4559_v54, %v1863_v53  ;;  %v655_v53 = vmul.f32 %v4559_v54, %v3826_v60  ;;  %s5144_s11 = sld [smem:[#allocation9 + $0x37]] }
 0x35c   : > { %1811 = vrot.lane.b32.xlu0 %v1805_v37, %s3221_s5  ;;  %v1873_v37 = vrot.slane %v1866_v28, 4  ;;  %v1890_v52 = vmul.f32 %v4656_v33, %v1887_v4 }
 0x35d   : > { %1807 = vrot.lane.b32.xlu2 %v1804_v45, %s3221_s5  ;;  %1785 = vrot.lane.b32.xlu1 %v1782_v51, %s3221_s5  ;;  %v4727_v45 = vmul.f32 %v4544_v14, %v3824_v27  ;;  %v1274_v51 = vadd.f32 %v4668_v61, %v1182_v40 }
 0x35e   : > { %v4719_v22 = vpop.permute.xlu0 %878 }
 0x35f   : > { %v4721_v30 = vpop.permute.xlu2 %1011  ;;  %v4723_v41 = vpop.permute.xlu1 %1351  ;;  %v589_v61 = vrot.slane %v4727_v45, 2  ;;  %v1362_v38 = vadd.f32 %v4627_v23, %v1274_v51  ;;  %v532_v23 = vmul.f32 %v4544_v14, %v3841_v0  ;;  %v1871_v51 = vrot.slane %v1865_v35, 4 }
 0x361   : > { %v592_v45 = vsel %vm553_vm1, %v589_v61, %v5936_v21  ;;  %v1874_v28 = vsel %vm626_vm15, %v1871_v51, %v1873_v37  ;;  %v582_v21 = vmul.f32 %v4559_v54, %v3824_v27 }
 0x362   : > { %v597_v34 = vadd.f32 %v592_v45, %v532_v23 }
 0x364   : > { %1853 = vrot.lane.b32.xlu0 %v1850_v8, %s3221_s5 }
 0x365   : > { %1833 = vrot.lane.b32.xlu2 %v1830_v7, %s3221_s5  ;;  %1809 = vrot.lane.b32.xlu1 %v1806_v13, %s3221_s5  ;;  %v1831_v7 = vrot.slane %v1824_v11, 4 }
 0x366   : > { %v4742_v40 = vpop.permute.xlu0 %918 }
 0x367   : > { %v4744_v1 = vpop.permute.xlu2 %1173  ;;  %v1444_v47 = vpop.permute.xlu1 %1443  ;;  %v1832_v11 = vsel %vm626_vm15, %v1829_v42, %v1831_v7  ;;  %v1897_v42 = vrot.slane %v1890_v52, 4 }
 0x368   : > { %v1450_v8 = vadd.f32 %v1444_v47, %v1362_v38  ;;  %v1889_v38 = vmul.f32 %v4694_v5, %v1887_v4 }
 0x36a   : > { %v4756_v13 = vadd.f32 %v4685_v49, %v1450_v8  ;;  %v5937_v49 = vrot.slane %v3836_v59, 4  ;;  %v1895_v7 = vrot.slane %v1889_v38, 4  ;;  %v547_v59 = vmul.f32 %v4559_v54, %v3960_v32 }
 0x36c   : > { %1877 = vrot.lane.b32.xlu0 %v1874_v28, %s3221_s5  ;;  %v665_v35 = vsel %vm626_vm15, %v662_v48, %v5937_v49  ;;  %v1870_v28 = vrot.slane %v1864_v18, 4  ;;  %v531_v49 = vmul.f32 %v4559_v54, %v3841_v0  ;;  %v620_v0 = vmul.f32 %v4559_v54, %v3973_v58 }
 0x36d   : > { %1855 = vrot.lane.b32.xlu2 %v1852_v63, %s3221_s5  ;;  %1835 = vrot.lane.b32.xlu1 %v1832_v11, %s3221_s5  ;;  %v670_v55 = vadd.f32 %v665_v35, %v597_v34  ;;  %v1913_v63 = vstv %s2942_s9  ;;  %v588_v11 = vrot.slane %v582_v21, 2  ;;  %v1898_v34 = vsel %vm626_vm15, %v1895_v7, %v1897_v42  ;;  %s5153_s9 = sld [smem:[#allocation9 + $0x4c]] }
 0x36e   : > { %v4770_v39 = vpop.permute.xlu0 %969  ;;  %v1916_v27 = vmul.f32 %v4596_v56, %v1913_v63  ;;  %v1872_v32 = vsel %vm626_vm15, %v1870_v28, %v1871_v51  ;;  %v1915_v60 = vmul.f32 %v4544_v14, %v1913_v63  ;;  %v554_v35 = vrot.slane %v547_v59, 2 }
 0x36f   : > { %v4772_v47 = vpop.permute.xlu2 %1223  ;;  %v739_v45 = vpop.permute.xlu1 %738  ;;  %v590_v52 = vsel %vm553_vm1, %v588_v11, %v589_v61  ;;  %v1888_v51 = vmul.f32 %v4229_v20, %v1887_v4  ;;  %v5938_v21 = vrot.slane %v3971_v25, 2  ;;  %v693_v11 = vmul.f32 %v4559_v54, %v3982_v36 }
 0x370   : > { %v746_v8 = vadd.f32 %v739_v45, %v670_v55  ;;  %v1923_v61 = vrot.slane %v1916_v27, 6  ;;  %v596_v18 = vadd.f32 %v590_v52, %v531_v49  ;;  %v1921_v4 = vrot.slane %v1915_v60, 6 }
 0x371   : > { %v556_v45 = vsel %vm553_vm1, %v554_v35, %v5938_v21  ;;  %v1933_v25 = vstv %s4780_s12  ;;  %v627_v52 = vrot.slane %v620_v0, 4  ;;  %v5940_v35 = vrot.slane %v3980_v9, 4  ;;  %s5160_s12 = sld [smem:[#allocation9 + $0x1b]] }
 0x372   : > { %v835_v23 = vadd.f32 %v4704_v16, %v746_v8  ;;  %v1924_v58 = vsel %vm699_vm2, %v1921_v4, %v1923_v61 }
 0x374   : > { %1901 = vrot.lane.b32.xlu0 %v1898_v34, %s3221_s5  ;;  %v4792_v16 = vadd.f32 %v4687_v17, %v835_v23  ;;  %v661_v17 = vrot.slane %v655_v53, 4  ;;  %v5939_v23 = vstv %s3952_s30  ;;  %v1894_v34 = vrot.slane %v1888_v51, 4  ;;  %s4843_s30 = sld [smem:[#allocation9 + $0x44]] }
 0x375   : > { %1879 = vrot.lane.b32.xlu2 %v1873_v37, %s3221_s5  ;;  %1875 = vrot.lane.b32.xlu1 %v1872_v32, %s3221_s5  ;;  %v519_v28 = vmul.f32 %v4559_v54, %v5939_v23  ;;  %v1955_v32 = vstv %s4786_s7  ;;  %v629_v51 = vsel %vm626_vm15, %v627_v52, %v5940_v35  ;;  %s3225_s7 = smov 122  }
 0x376   : > { %v4799_v38 = vpop.permute.xlu0 %1131  ;;  %v663_v59 = vsel %vm626_vm15, %v661_v17, %v662_v48  ;;  %v1896_v36 = vsel %vm626_vm15, %v1894_v34, %v1895_v7  ;;  %v700_v7 = vrot.slane %v693_v11, 6  ;;  %v4852_v34 = vmul.f32 %v4544_v14, %v1955_v32 }
 0x377   : > { %v4801_v37 = vpop.permute.xlu2 %1263  ;;  %v786_v55 = vpop.permute.xlu1 %785  ;;  %v561_v27 = vadd.f32 %v556_v45, %v519_v28  ;;  %v669_v48 = vadd.f32 %v663_v59, %v596_v18  ;;  %v1975_v28 = vstv %s4818_s20  ;;  %s5191_s20 = sld [smem:[#allocation9 + $0x6]] }
 0x378   : > { %v790_v8 = vadd.f32 %v786_v55, %v4038_v24  ;;  %v4823_v24 = vmul.f32 %v4694_v5, %v1933_v25 }
 0x379   : > { %v745_v49 = vadd.f32 %v4587_v29, %v669_v48  ;;  %v634_v61 = vadd.f32 %v629_v51, %v561_v27  ;;  %v5941_v29 = vrot.slane %v3988_v44, 6  ;;  %v1936_v27 = vmul.f32 %v4656_v33, %v1933_v25 }
 0x37a   : > { %v883_v53 = vadd.f32 %v4719_v22, %v790_v8  ;;  %v1934_v22 = vmul.f32 %v4229_v20, %v1933_v25  ;;  %v1941_v21 = vrot.slane %v4823_v24, 6 }
 0x37b   : > { %v702_v9 = vsel %vm699_vm2, %v700_v7, %v5941_v29 }
 0x37c   : > { %v976_v60 = vadd.f32 %v4706_v6, %v883_v53  ;;  %1927 = vrot.lane.b32.xlu0 %v1924_v58, %s3221_s5  ;;  %v1956_v6 = vmul.f32 %v4559_v54, %v1955_v32  ;;  %v1940_v0 = vrot.slane %v1934_v22, 6  ;;  %v4849_v53 = vmul.f32 %v4694_v5, %v1975_v28 }
 0x37d   : > { %1903 = vrot.lane.b32.xlu2 %v1897_v42, %s3221_s5  ;;  %1899 = vrot.lane.b32.xlu1 %v1896_v36, %s3221_s5  ;;  %v1914_v42 = vmul.f32 %v4559_v54, %v1913_v63  ;;  %v707_v63 = vadd.f32 %v702_v9, %v634_v61  ;;  %v1976_v58 = vmul.f32 %v4229_v20, %v1975_v28 }
 0x37e   : > { %v1172_v17 = vpop.permute.xlu0 %1171  ;;  %v1960_v59 = vrot.slane %v1956_v6, 7  ;;  %v1942_v11 = vsel %vm699_vm2, %v1940_v0, %v1941_v21  ;;  %v1061_v52 = vadd.f32 %v4060_v43, %v976_v60  ;;  %v1981_v22 = vrot.slane %v4849_v53, 7 }
 0x37f   : > { %v4835_v55 = vpop.permute.xlu2 %1313  ;;  %v826_v18 = vpop.permute.xlu1 %825  ;;  %v1920_v23 = vrot.slane %v1914_v42, 6  ;;  %v789_v24 = vadd.f32 %v4670_v57, %v707_v63  ;;  %v1980_v6 = vrot.slane %v1976_v58, 7  ;;  %v2063_v42 = vstv %s4843_s30  ;;  %s2969_s30 = sld [smem:[#allocation9 + $0x5a]] }
 0x380   : > { %v834_v45 = vadd.f32 %v826_v18, %v745_v49  ;;  %v1943_v49 = vrot.slane %v1936_v27, 6  ;;  %v1136_v51 = vadd.f32 %v4799_v38, %v1061_v52  ;;  %v2065_v38 = vmul.f32 %v4694_v5, %v2063_v42 }
 0x381   : > { %v1982_v43 = vsel %vm732_vm12, %v1980_v6, %v1981_v22  ;;  %v4897_v63 = vmul.f32 %v4656_v33, %v2063_v42 }
 0x382   : > { %v927_v8 = vadd.f32 %v4742_v40, %v834_v45  ;;  %v1922_v40 = vsel %vm699_vm2, %v1920_v23, %v1921_v4  ;;  %v1961_v4 = vrot.slane %v4852_v34, 7  ;;  %v4873_v7 = vadd.f32 %v4772_v47, %v1136_v51 }
 0x383   : > { %v2071_v0 = vrot.slane %v2065_v38, 1 }
 0x384   : > { %v1020_v44 = vadd.f32 %v4721_v30, %v927_v8  ;;  %1963 = vrot.lane.b32.xlu0 %v1960_v59, %s3224_s22  ;;  %v1962_v60 = vsel %vm732_vm12, %v1960_v59, %v1961_v4 }
 0x385   : > { %1945 = vrot.lane.b32.xlu2 %v1942_v11, %s3221_s5  ;;  %1925 = vrot.lane.b32.xlu1 %v1922_v40, %s3221_s5  ;;  %v4901_v11 = vld [vmem:[#allocation3] sm:$0xff] }
 0x386   : > { %v1093_v32 = vadd.f32 %v4118_v2, %v1020_v44  ;;  %v1222_v48 = vpop.permute.xlu0 %1221  ;;  %v2039_v2 = vstv %s2948_s29  ;;  %s2968_s29 = sld [smem:[#allocation9 + $0x29]] }
 0x387   : > { %v4863_v30 = vpop.permute.xlu2 %1441  ;;  %v877_v36 = vpop.permute.xlu1 %876  ;;  %v2040_v18 = vmul.f32 %v4559_v54, %v2039_v2 }
 0x388   : > { %v882_v25 = vadd.f32 %v877_v36, %v789_v24  ;;  %v1180_v35 = vadd.f32 %v1172_v17, %v1093_v32  ;;  %v2041_v17 = vmul.f32 %v4544_v14, %v2039_v2  ;;  %v2073_v32 = vrot.slane %v4897_v63, 1 }
 0x389   : > { %v2046_v28 = vrot.slane %v2040_v18, 1 }
 0x38a   : > { %v975_v57 = vadd.f32 %v4770_v39, %v882_v25  ;;  %v1272_v61 = vadd.f32 %v4801_v37, %v1180_v35  ;;  %v1944_v39 = vsel %vm699_vm2, %v1941_v21, %v1943_v49  ;;  %v2064_v37 = vmul.f32 %v4229_v20, %v2063_v42 }
 0x38b   : > { %v2047_v8 = vrot.slane %v2041_v17, 1  ;;  %v2155_v25 = vstv %s2953_s26  ;;  %v5942_v35 = vrot.slane %v4065_v26, 1  ;;  %v2074_v42 = vsel %vm777_vm0, %v2071_v0, %v2073_v32  ;;  %s2966_s26 = sld [smem:[#allocation9 + $0x22]] }
 0x38c   : > { %1985 = vrot.lane.b32.xlu0 %v1982_v43, %s3224_s22  ;;  %v1360_v47 = vadd.f32 %v4723_v41, %v1272_v61  ;;  %v2070_v23 = vrot.slane %v2064_v37, 1  ;;  %v1060_v58 = vadd.f32 %v3984_v19, %v975_v57  ;;  %v4921_v51 = vmul.f32 %v4694_v5, %v2155_v25 }
 0x38d   : > { %1965 = vrot.lane.b32.xlu2 %v1962_v60, %s3224_s22  ;;  %1947 = vrot.lane.b32.xlu1 %v1944_v39, %s3221_s5  ;;  %v2048_v20 = vsel %vm777_vm0, %v2046_v28, %v2047_v8  ;;  %s2946_s5 = sld [smem:[#allocation9 + $0xc]]  ;;  %v810_v19 = vadd.f32 %v4182_v15, %v3769_v31  ;;  %v2156_v61 = vmul.f32 %v4901_v11, %v2155_v25 }
 0x38e   : > { %v1354_v45 = vpop.permute.xlu0 %1353  ;;  %v2072_v41 = vsel %vm777_vm0, %v2070_v23, %v2071_v0  ;;  %v2163_v18 = vrot.slane %v4921_v51, 3 }
 0x38f   : > { %v4890_v29 = vpop.permute.xlu2 %1491  ;;  %v1014_v9 = vpop.permute.xlu1 %1013  ;;  %v2162_v28 = vrot.slane %v2156_v61, 3  ;;  %v5950_v61 = vld [vmem:[#allocation23_spill] sm:$0xff] }
 0x390   : > { %v1021_v59 = vadd.f32 %v1014_v9, %v4792_v16  ;;  %v2018_v16 = vmul.f32 %v4901_v11, %v4058_v46  ;;  %v5943_v9 = vld [vmem:[#allocation24_spill] sm:$0xff] }
 0x392   : > { %v1094_v21 = vadd.f32 %v4054_v62, %v1021_v59  ;;  %v4906_v62 = vmul.f32 %v4596_v56, %v2039_v2  ;;  %v2024_v36 = vrot.slane %v2018_v16, 1  ;;  %v5944_v59 = vld [vmem:[#allocation87_spill] sm:$0xff]  ;;  %v2164_v16 = vsel %vm870_vm13, %v2162_v28, %v2163_v18 }
 0x393   : > { %v4931_v2 = vstv %s2946_s5  ;;  %v2247_v28 = vstv %s4958_s13  ;;  %s3227_s5 = smov 32   ;;  %s3228_s13 = smov 48  }
 0x394   : > { %2075 = vrot.lane.b32.xlu0 %v2072_v41, %s3224_s22  ;;  %v1181_v44 = vadd.f32 %v4744_v1, %v1094_v21  ;;  %v5780_v46 = vrot.slane %v4906_v62, 1  ;;  %v2026_v1 = vsel %vm777_vm0, %v2024_v36, %v5942_v35  ;;  %v4940_v31 = vmul.f32 %v4544_v14, %v4931_v2 }
 0x395   : > { %2051 = vrot.lane.b32.xlu2 %v2048_v20, %s3224_s22  ;;  %1983 = vrot.lane.b32.xlu1 %v1980_v6, %s3224_s22  ;;  %v2131_v6 = vstv %s2952_s8  ;;  %v1998_v17 = vmul.f32 %v4559_v54, %v4931_v2  ;;  %v4962_v20 = vmul.f32 %v4656_v33, %v2155_v25  ;;  %s2971_s8 = sld [smem:[#allocation9 + $0x61]] }
 0x396   : > { %v4910_v40 = vpop.permute.xlu0 %1399  ;;  %v4929_v57 = vmul.f32 %v4544_v14, %v2131_v6  ;;  %v2050_v26 = vsel %vm777_vm0, %v2047_v8, %v5780_v46  ;;  %v2132_v43 = vmul.f32 %v4559_v54, %v2131_v6  ;;  %v2005_v8 = vrot.slane %v4940_v31, 1  ;;  %v6043_v31 = vld [vmem:[#allocation56_spill] sm:$0xff] }
 0x397   : > { %v4912_v27 = vpop.permute.xlu2 %1531  ;;  %v1130_v24 = vpop.permute.xlu1 %1129  ;;  %v4978_v36 = vmul.f32 %v4596_v56, %v2131_v6  ;;  %v5779_v6 = vrot.slane %v4962_v20, 3 }
 0x398   : > { %v1135_v52 = vadd.f32 %v1130_v24, %v1060_v58  ;;  %v2138_v21 = vrot.slane %v2132_v43, 3  ;;  %v5945_v58 = vld [vmem:[#allocation46_spill] sm:$0xff] }
 0x399   : > { %v2110_v24 = vmul.f32 %v4901_v11, %v5945_v58 }
 0x39a   : > { %v1227_v49 = vadd.f32 %v1222_v48, %v1135_v52  ;;  %v903_v48 = vadd.f32 %v4436_v12, %v810_v19  ;;  %v564_v12 = vmul.f32 %v4901_v11, %v5943_v9  ;;  %v5948_v19 = vld [vmem:[#allocation25_spill] sm:$0xff] }
 0x39c   : > { %2029 = vrot.lane.b32.xlu0 %v2026_v1, %s3224_s22  ;;  %v4943_v15 = vadd.f32 %v4835_v55, %v1227_v49  ;;  %v2139_v55 = vrot.slane %v4929_v57, 3  ;;  %v996_v23 = vadd.f32 %v5944_v59, %v903_v48  ;;  %v570_v52 = vrot.slane %v564_v12, 2  ;;  %v5946_v49 = vld [vmem:[#allocation30_spill] sm:$0xff] }
 0x39d   : > { %2077 = vrot.lane.b32.xlu2 %v2074_v42, %s3224_s22  ;;  %2053 = vrot.lane.b32.xlu1 %v2050_v26, %s3224_s22  ;;  %v5947_v1 = vstv %s3636_s23  ;;  %v5949_v42 = vrot.slane %v5948_v19, 2  ;;  %v2116_v59 = vrot.slane %v2110_v24, 3  ;;  %v2166_v24 = vsel %vm870_vm13, %v2163_v18, %v5779_v6  ;;  %s5099_s23 = sld [smem:[#allocation9 + $0x3e]] }
 0x39e   : > { %v1440_v60 = vpop.permute.xlu0 %1439  ;;  %v1074_v35 = vadd.f32 %v5946_v49, %v996_v23  ;;  %v524_v51 = vmul.f32 %v4901_v11, %v5947_v1  ;;  %v2141_v23 = vrot.slane %v4978_v36, 3 }
 0x39f   : > { %v4949_v38 = vpop.permute.xlu2 %1581  ;;  %v1448_v39 = vadd.f32 %v1440_v60, %v1360_v47  ;;  %v1266_v37 = vpop.permute.xlu1 %1265  ;;  %v2004_v47 = vrot.slane %v1998_v17, 1  ;;  %v572_v57 = vsel %vm553_vm1, %v570_v52, %v5949_v42  ;;  %v5952_v60 = vld [vmem:[#allocation26_spill] sm:$0xff]  ;;  %v2223_v52 = vstv %s4964_s25  ;;  %s3229_s25 = smov 64  }
 0x3a0   : > { %v1273_v0 = vadd.f32 %v1266_v37, %v1181_v44  ;;  %v2140_v44 = vsel %vm870_vm13, %v2138_v21, %v2139_v55  ;;  %v637_v17 = vmul.f32 %v4901_v11, %v5952_v60  ;;  %v1156_v37 = vadd.f32 %v4514_v3, %v1074_v35  ;;  %v5953_v21 = vld [vmem:[#allocation18_spill] sm:$0xff] }
 0x3a1   : > { %v5000_v12 = vadd.f32 %v4912_v27, %v1448_v39  ;;  %v5012_v3 = vmul.f32 %v4694_v5, %v2247_v28  ;;  %v5955_v39 = vld [vmem:[#allocation47_spill] sm:$0xff]  ;;  %v5025_v1 = vmul.f32 %v4544_v14, %v2223_v52  ;;  %v2248_v42 = vmul.f32 %v4901_v11, %v2247_v28 }
 0x3a2   : > { %v1361_v41 = vadd.f32 %v1354_v45, %v1273_v0  ;;  %v2006_v45 = vsel %vm777_vm0, %v2004_v47, %v2005_v8  ;;  %v577_v47 = vadd.f32 %v572_v57, %v524_v51  ;;  %v5956_v58 = vrot.slane %v5955_v39, 3  ;;  %v5961_v39 = vld [vmem:[#allocation19_spill] sm:$0xff] }
 0x3a3   : > { %v1248_v35 = vadd.f32 %v4463_v10, %v1156_v37  ;;  %v5028_v51 = vstv %s4970_s6  ;;  %v643_v19 = vrot.slane %v637_v17, 4  ;;  %v2224_v57 = vmul.f32 %v4559_v54, %v2223_v52  ;;  %s3230_s6 = smov 80  }
 0x3a4   : > { %2167 = vrot.lane.b32.xlu0 %v2164_v16, %s3224_s22  ;;  %v4981_v25 = vadd.f32 %v4863_v30, %v1361_v41  ;;  %v5951_v30 = vld [vmem:[#allocation41_spill] sm:$0xff]  ;;  %v5007_v41 = vmul.f32 %v4694_v5, %v5953_v21  ;;  %v5954_v16 = vld [vmem:[#allocation27_spill] sm:$0xff]  ;;  %v5037_v18 = vmul.f32 %v4544_v14, %v5028_v51  ;;  %v2090_v14 = vmul.f32 %v4559_v54, %v5028_v51 }
 0x3a5   : > { %2143 = vrot.lane.b32.xlu2 %v2140_v44, %s3224_s22  ;;  %2009 = vrot.lane.b32.xlu1 %v2006_v45, %s3224_s22  ;;  %v767_v43 = vadd.f32 %v5951_v30, %v5950_v61  ;;  %v710_v44 = vmul.f32 %v4901_v11, %v5954_v16  ;;  %v5957_v45 = vld [vmem:[#allocation40_spill] sm:$0xff]  ;;  %v2255_v16 = vrot.slane %v5012_v3, 5 }
 0x3a6   : > { %v1490_v26 = vpop.permute.xlu0 %1489  ;;  %v607_v61 = vrot.slane %v5007_v41, 2  ;;  %v5958_v30 = vld [vmem:[#allocation28_spill] sm:$0xff]  ;;  %v2096_v46 = vrot.slane %v2090_v14, 3  ;;  %v5087_v14 = vmul.f32 %v4596_v56, %v2223_v52  ;;  %v5973_v52 = vld [vmem:[#allocation63_spill] sm:$0xff] }
 0x3a7   : > { %v4991_v48 = vpop.permute.xlu2 %1743  ;;  %v1316_v9 = vpop.permute.xlu1 %1315  ;;  %v860_v49 = vadd.f32 %v5957_v45, %v767_v43  ;;  %v5959_v43 = vrot.slane %v5958_v30, 4  ;;  %v5962_v45 = vld [vmem:[#allocation43_spill] sm:$0xff]  ;;  %v2254_v30 = vrot.slane %v2248_v42, 5 }
 0x3a8   : > { %v1320_v0 = vadd.f32 %v1316_v9, %v4873_v7  ;;  %v2118_v7 = vsel %vm870_vm13, %v2116_v59, %v5956_v58  ;;  %v5059_v58 = vmul.f32 %v4694_v5, %v5961_v39 }
 0x3a9   : > { %v645_v60 = vsel %vm626_vm15, %v643_v19, %v5959_v43 }
 0x3aa   : > { %v1404_v27 = vadd.f32 %v4910_v40, %v1320_v0  ;;  %v2142_v40 = vsel %vm870_vm13, %v2139_v55, %v2141_v23  ;;  %v716_v55 = vrot.slane %v710_v44, 6  ;;  %v1340_v0 = vadd.f32 %v4465_v50, %v1248_v35  ;;  %v5964_v35 = vld [vmem:[#allocation29_spill] sm:$0xff] }
 0x3ab   : > { %v650_v44 = vadd.f32 %v645_v60, %v577_v47  ;;  %v2230_v50 = vrot.slane %v2224_v57, 5  ;;  %v5965_v43 = vrot.slane %v5964_v35, 6  ;;  %v5967_v47 = vld [vmem:[#allocation20_spill] sm:$0xff]  ;;  %v5078_v57 = vmul.f32 %v4656_v33, %v2247_v28 }
 0x3ac   : > { %2121 = vrot.lane.b32.xlu0 %v2118_v7, %s3224_s22  ;;  %v5040_v10 = vadd.f32 %v4890_v29, %v1404_v27  ;;  %v5960_v29 = vld [vmem:[#allocation44_spill] sm:$0xff]  ;;  %v2231_v27 = vrot.slane %v5025_v1, 5  ;;  %v5966_v1 = vld [vmem:[#allocation21_spill] sm:$0xff]  ;;  %v5968_v60 = vrot.slane %v5967_v47, 2  ;;  %v680_v56 = vrot.slane %v5059_v58, 4  ;;  %v5977_v58 = vld [vmem:[#allocation102_spill] sm:$0xff] }
 0x3ad   : > { %2169 = vrot.lane.b32.xlu2 %v2166_v24, %s3224_s22  ;;  %2145 = vrot.lane.b32.xlu1 %v2142_v40, %s3224_s22  ;;  %v953_v9 = vadd.f32 %v5960_v29, %v860_v49  ;;  %v5786_v24 = vrot.slane %v5037_v18, 3  ;;  %v5963_v40 = vld [vmem:[#allocation105_spill] sm:$0xff]  ;;  %v718_v3 = vsel %vm699_vm2, %v716_v55, %v5965_v43  ;;  %v539_v29 = vmul.f32 %v4694_v5, %v5966_v1  ;;  %v5971_v28 = vld [vmem:[#allocation48_spill] sm:$0xff] }
 0x3ae   : > { %v1626_v17 = vpop.permute.xlu0 %1625  ;;  %v1424_v49 = vadd.f32 %v5963_v40, %v1340_v0  ;;  %v2232_v42 = vsel %vm963_vm14, %v2230_v50, %v2231_v27  ;;  %v5969_v0 = vld [vmem:[#allocation31_spill] sm:$0xff]  ;;  %v600_v50 = vmul.f32 %v4901_v11, %v5953_v21  ;;  %v5972_v43 = vld [vmem:[#allocation72_spill] sm:$0xff]  ;;  %v5785_v47 = vrot.slane %v5078_v57, 5 }
 0x3af   : > { %v5049_v37 = vpop.permute.xlu2 %1783  ;;  %v1398_v59 = vpop.permute.xlu1 %1397  ;;  %v1046_v19 = vadd.f32 %v5962_v45, %v953_v9  ;;  %v2256_v9 = vsel %vm963_vm14, %v2254_v30, %v2255_v16  ;;  %v5970_v45 = vld [vmem:[#allocation101_spill] sm:$0xff]  ;;  %v2202_v30 = vmul.f32 %v4901_v11, %v5971_v28 }
 0x3b0   : > { %v1403_v7 = vadd.f32 %v1398_v59, %v4943_v15  ;;  %v610_v15 = vsel %vm553_vm1, %v607_v61, %v5968_v60  ;;  %v1516_v40 = vadd.f32 %v5970_v45, %v1424_v49  ;;  %v2233_v60 = vrot.slane %v5087_v14, 5  ;;  %v5978_v45 = vld [vmem:[#allocation53_spill] sm:$0xff]  ;;  %v6048_v14 = vld [vmem:[#allocation58_spill] sm:$0xff] }
 0x3b1   : > { %v1114_v59 = vadd.f32 %v5969_v0, %v1046_v19  ;;  %v615_v35 = vadd.f32 %v610_v15, %v539_v29  ;;  %v5974_v19 = vld [vmem:[#allocation69_spill] sm:$0xff]  ;;  %v5975_v15 = vld [vmem:[#allocation22_spill] sm:$0xff]  ;;  %v606_v0 = vrot.slane %v600_v50, 2 }
 0x3b2   : > { %v1495_v6 = vadd.f32 %v1490_v26, %v1403_v7  ;;  %v2098_v26 = vsel %vm870_vm13, %v2096_v46, %v5786_v24  ;;  %v723_v7 = vadd.f32 %v718_v3, %v650_v44  ;;  %v5982_v50 = vld [vmem:[#allocation86_spill] sm:$0xff] }
 0x3b3   : > { %v1206_v44 = vadd.f32 %v5973_v52, %v1114_v59 }
 0x3b4   : > { %2259 = vrot.lane.b32.xlu0 %v2256_v9, %s3224_s22  ;;  %v1587_v55 = vadd.f32 %v4949_v38, %v1495_v6  ;;  %v809_v49 = vadd.f32 %v5974_v19, %v723_v7  ;;  %v5976_v9 = vrot.slane %v5975_v15, 4  ;;  %v2258_v19 = vsel %vm963_vm14, %v2255_v16, %v5785_v47 }
 0x3b5   : > { %2235 = vrot.lane.b32.xlu2 %v2232_v42, %s3224_s22  ;;  %2101 = vrot.lane.b32.xlu1 %v2098_v26, %s3224_s22  ;;  %v2208_v26 = vrot.slane %v2202_v30, 5  ;;  %v1298_v28 = vadd.f32 %v5978_v45, %v1206_v44  ;;  %v608_v30 = vsel %vm553_vm1, %v606_v0, %v607_v61  ;;  %v5983_v44 = vld [vmem:[#allocation92_spill] sm:$0xff]  ;;  %v5986_v61 = vld [vmem:[#allocation45_spill] sm:$0xff] }
 0x3b6   : > { %v1742_v46 = vpop.permute.xlu0 %1741  ;;  %v1672_v38 = vadd.f32 %v5972_v43, %v1587_v55  ;;  %v683_v42 = vsel %vm626_vm15, %v680_v56, %v5976_v9  ;;  %v1608_v55 = vadd.f32 %v5977_v58, %v1516_v40  ;;  %v5979_v43 = vld [vmem:[#allocation67_spill] sm:$0xff]  ;;  %v673_v40 = vmul.f32 %v4901_v11, %v5961_v39 }
 0x3b7   : > { %v5097_v6 = vpop.permute.xlu2 %1807  ;;  %v1534_v3 = vpop.permute.xlu1 %1533  ;;  %v688_v59 = vadd.f32 %v683_v42, %v615_v35  ;;  %v5984_v39 = vld [vmem:[#allocation39_spill] sm:$0xff]  ;;  %v5140_v9 = vstv %s5099_s23  ;;  %v1382_v42 = vadd.f32 %v5986_v61, %v1298_v28  ;;  %v5990_v28 = vld [vmem:[#allocation109_spill] sm:$0xff]  ;;  %s3231_s23 = smov 96  }
 0x3b8   : > { %v1747_v21 = vadd.f32 %v1742_v46, %v1672_v38  ;;  %v1541_v29 = vadd.f32 %v1534_v3, %v4981_v25  ;;  %v902_v46 = vadd.f32 %v5979_v43, %v809_v49  ;;  %v5980_v38 = vld [vmem:[#allocation50_spill] sm:$0xff]  ;;  %v1686_v49 = vadd.f32 %v5984_v39, %v1608_v55  ;;  %v5987_v43 = vld [vmem:[#allocation68_spill] sm:$0xff] }
 0x3b9   : > { %v5981_v25 = vrot.slane %v5980_v38, 5  ;;  %v766_v35 = vadd.f32 %v5982_v50, %v688_v59  ;;  %v538_v3 = vmul.f32 %v4901_v11, %v5966_v1  ;;  %v5150_v59 = vstv %s5105_s10  ;;  %v5988_v38 = vld [vmem:[#allocation79_spill] sm:$0xff]  ;;  %s3232_s10 = smov 112  }
 0x3ba   : > { %v5113_v7 = vadd.f32 %v1626_v17, %v1541_v29  ;;  %v2234_v17 = vsel %vm963_vm14, %v2231_v27, %v2233_v60  ;;  %v995_v16 = vadd.f32 %v5983_v44, %v902_v46  ;;  %v5985_v27 = vld [vmem:[#allocation71_spill] sm:$0xff]  ;;  %v679_v45 = vrot.slane %v673_v40, 4 }
 0x3bb   : > { %v2210_v52 = vsel %vm963_vm14, %v2208_v26, %v5981_v25  ;;  %v2182_v41 = vmul.f32 %v4559_v54, %v5985_v27  ;;  %v614_v55 = vadd.f32 %v608_v30, %v538_v3  ;;  %v1474_v46 = vadd.f32 %v5987_v43, %v1382_v42  ;;  %v5989_v25 = vld [vmem:[#allocation33_spill] sm:$0xff]  ;;  %v5165_v30 = vld [vmem:[#allocation2] sm:$0xff] }
 0x3bc   : > { %2213 = vrot.lane.b32.xlu0 %v2210_v52, %s3224_s22  ;;  %v859_v54 = vadd.f32 %v5988_v38, %v766_v35  ;;  %v1073_v52 = vadd.f32 %v5989_v25, %v995_v16  ;;  %v2321_v40 = vmul.f32 %v4901_v11, %v5140_v9  ;;  %v681_v35 = vsel %vm626_vm15, %v679_v45, %v680_v56  ;;  %v5994_v3 = vld [vmem:[#allocation61_spill] sm:$0xff]  ;;  %v5997_v56 = vld [vmem:[#allocation83_spill] sm:$0xff]  ;;  %v6000_v25 = vld [vmem:[#allocation100_spill] sm:$0xff] }
 0x3bd   : > { %2261 = vrot.lane.b32.xlu2 %v2258_v19, %s3224_s22  ;;  %2237 = vrot.lane.b32.xlu1 %v2234_v17, %s3224_s22  ;;  %v1634_v19 = vadd.f32 %v5990_v28, %v4756_v13  ;;  %v2188_v50 = vrot.slane %v2182_v41, 5  ;;  %v687_v44 = vadd.f32 %v681_v35, %v614_v55  ;;  %v5992_v13 = vld [vmem:[#allocation73_spill] sm:$0xff]  ;;  %v5781_v43 = vstv %s5144_s11 }
 0x3be   : > { %v1764_v29 = vpop.permute.xlu0 %1763  ;;  %v5993_v16 = vrot.slane %v5992_v13, 5  ;;  %v5996_v41 = vld [vmem:[#allocation85_spill] sm:$0xff]  ;;  %v2407_v35 = vstv %s5153_s9  ;;  %v6003_v13 = vld [vmem:[#allocation66_spill] sm:$0xff] }
 0x3bf   : > { %v1834_v15 = vpop.permute.xlu2 %1833  ;;  %v1768_v26 = vadd.f32 %v1764_v29, %v1686_v49  ;;  %v1584_v0 = vpop.permute.xlu1 %1583  ;;  %v1566_v29 = vadd.f32 %v5994_v3, %v1474_v46  ;;  %v1155_v61 = vadd.f32 %v5996_v41, %v1073_v52  ;;  %v1707_v42 = vadd.f32 %v5997_v56, %v1634_v19  ;;  %v5205_v3 = vld [vmem:[#allocation2 + $0x8] sm:$0xff] }
 0x3c0   : > { %v5147_v58 = vadd.f32 %v1834_v15, %v1747_v21  ;;  %v1588_v1 = vadd.f32 %v1584_v0, %v5040_v10  ;;  %v5991_v21 = vld [vmem:[#allocation64_spill] sm:$0xff]  ;;  %v2302_v10 = vmul.f32 %v5165_v30, %v5150_v59  ;;  %v2190_v39 = vsel %vm963_vm14, %v2188_v50, %v5993_v16  ;;  %v5995_v15 = vld [vmem:[#allocation70_spill] sm:$0xff]  ;;  %v5998_v0 = vld [vmem:[#allocation37_spill] sm:$0xff] }
 0x3c1   : > { %v952_v27 = vadd.f32 %v5995_v15, %v859_v54  ;;  %v765_v55 = vadd.f32 %v5998_v0, %v687_v44  ;;  %v1247_v46 = vadd.f32 %v6000_v25, %v1155_v61  ;;  %v2322_v19 = vmul.f32 %v4694_v5, %v5140_v9  ;;  %v6004_v15 = vld [vmem:[#allocation35_spill] sm:$0xff]  ;;  %v6005_v41 = vld [vmem:[#allocation93_spill] sm:$0xff]  ;;  %v6006_v56 = vld [vmem:[#allocation84_spill] sm:$0xff] }
 0x3c2   : > { %v1673_v17 = vadd.f32 %v5991_v21, %v1588_v1  ;;  %v6001_v21 = vld [vmem:[#allocation89_spill] sm:$0xff]  ;;  %v2383_v44 = vstv %s5160_s12 }
 0x3c3   : > { %v1339_v61 = vadd.f32 %v6005_v41, %v1247_v46  ;;  %v6008_v46 = vld [vmem:[#allocation62_spill] sm:$0xff] }
 0x3c4   : > { %2327 = vrot.lane.b32.xlu0 %v2321_v40, %s3225_s7  ;;  %v5176_v49 = vadd.f32 %v4991_v48, %v1673_v17  ;;  %v5999_v48 = vld [vmem:[#allocation95_spill] sm:$0xff]  ;;  %v858_v17 = vadd.f32 %v6001_v21, %v765_v55  ;;  %v6007_v55 = vld [vmem:[#allocation42_spill] sm:$0xff] }
 0x3c5   : > { %2308 = vrot.lane.b32.xlu2 %v2302_v10, %s3225_s7  ;;  %2193 = vrot.lane.b32.xlu1 %v2190_v39, %s3224_s22  ;;  %v1045_v38 = vadd.f32 %v5999_v48, %v952_v27  ;;  %v6002_v10 = vld [vmem:[#allocation54_spill] sm:$0xff]  ;;  %v5203_v39 = vmul.f32 %v4694_v5, %v2407_v35  ;;  %v2384_v48 = vmul.f32 %v5165_v30, %v2383_v44 }
 0x3c6   : > { %v1788_v45 = vpop.permute.xlu0 %1787  ;;  %v1658_v50 = vadd.f32 %v6002_v10, %v1566_v29  ;;  %v2303_v29 = vmul.f32 %v5205_v3, %v5150_v59 }
 0x3c7   : > { %v1856_v1 = vpop.permute.xlu2 %1855  ;;  %v1794_v28 = vadd.f32 %v1788_v45, %v1707_v42  ;;  %v1624_v52 = vpop.permute.xlu1 %1623  ;;  %v1113_v27 = vadd.f32 %v6004_v15, %v1045_v38  ;;  %v951_v42 = vadd.f32 %v6006_v56, %v858_v17  ;;  %v2415_v21 = vrot.slane %v5203_v39, 2  ;;  %v6012_v56 = vld [vmem:[#allocation103_spill] sm:$0xff] }
 0x3c8   : > { %v5187_v54 = vadd.f32 %v1856_v1, %v1768_v26  ;;  %v1632_v40 = vadd.f32 %v1624_v52, %v5000_v12  ;;  %v2287_v26 = vmul.f32 %v4901_v11, %v5781_v43  ;;  %v5208_v12 = vmul.f32 %v5205_v3, %v2383_v44 }
 0x3c9   : > { %v1726_v45 = vadd.f32 %v6007_v55, %v1658_v50  ;;  %v2408_v1 = vmul.f32 %v4901_v11, %v2407_v35  ;;  %v1706_v52 = vadd.f32 %v6008_v46, %v5113_v7  ;;  %v6013_v7 = vld [vmem:[#allocation107_spill] sm:$0xff]  ;;  %v2390_v43 = vrot.slane %v2384_v48, 2 }
 0x3ca   : > { %v1705_v16 = vadd.f32 %v6003_v13, %v1632_v40  ;;  %v2391_v17 = vrot.slane %v5208_v12, 2 }
 0x3cb   : > { %v2414_v39 = vrot.slane %v2408_v1, 2  ;;  %v6015_v1 = vld [vmem:[#allocation49_spill] sm:$0xff] }
 0x3cc   : > { %2291 = vrot.lane.b32.xlu0 %v2287_v26, %s3225_s7  ;;  %v5218_v0 = vadd.f32 %v5049_v37, %v1705_v16  ;;  %v6009_v37 = vld [vmem:[#allocation88_spill] sm:$0xff]  ;;  %v2362_v48 = vmul.f32 %v4901_v11, %v6015_v1  ;;  %v2475_v1 = vstv %s2968_s29 }
 0x3cd   : > { %2329 = vrot.lane.b32.xlu2 %v2322_v19, %s3225_s7  ;;  %2310 = vrot.lane.b32.xlu1 %v2303_v29, %s3225_s7  ;;  %v1205_v40 = vadd.f32 %v6009_v37, %v1113_v27  ;;  %v6010_v19 = vld [vmem:[#allocation94_spill] sm:$0xff]  ;;  %v6011_v26 = vld [vmem:[#allocation80_spill] sm:$0xff]  ;;  %v5782_v29 = vstv %s5191_s20  ;;  %v2416_v12 = vsel %vm553_vm1, %v2414_v39, %v2415_v21  ;;  %v2392_v27 = vsel %vm553_vm1, %v2390_v43, %v2391_v17 }
 0x3ce   : > { %v1812_v38 = vpop.permute.xlu0 %1811  ;;  %v1423_v10 = vadd.f32 %v6010_v19, %v1339_v61  ;;  %v1044_v15 = vadd.f32 %v6011_v26, %v951_v42  ;;  %v5242_v61 = vmul.f32 %v4656_v33, %v2407_v35  ;;  %v6014_v42 = vld [vmem:[#allocation36_spill] sm:$0xff]  ;;  %v6018_v26 = vld [vmem:[#allocation90_spill] sm:$0xff] }
 0x3cf   : > { %v1880_v25 = vpop.permute.xlu2 %1879  ;;  %v1818_v13 = vadd.f32 %v1812_v38, %v1726_v45  ;;  %v1786_v16 = vpop.permute.xlu1 %1785  ;;  %v1297_v55 = vadd.f32 %v6012_v56, %v1205_v40  ;;  %v5249_v38 = vld [vmem:[#allocation2 + $0x10] sm:$0x3f]  ;;  %v6016_v43 = vld [vmem:[#allocation96_spill] sm:$0xff]  ;;  %v2368_v56 = vrot.slane %v2362_v48, 2  ;;  %v2477_v48 = vmul.f32 %v5205_v3, %v2475_v1 }
 0x3d0   : > { %v5230_v50 = vadd.f32 %v1880_v25, %v1794_v28  ;;  %v1793_v41 = vadd.f32 %v1786_v16, %v1706_v52  ;;  %v1515_v46 = vadd.f32 %v6013_v7, %v1423_v10  ;;  %v2274_v28 = vmul.f32 %v5165_v30, %v5782_v29  ;;  %v6017_v37 = vld [vmem:[#allocation104_spill] sm:$0xff] }
 0x3d1   : > { %v1112_v45 = vadd.f32 %v6014_v42, %v1044_v15  ;;  %v5252_v25 = vmul.f32 %v5249_v38, %v2383_v44  ;;  %v1381_v52 = vadd.f32 %v6016_v43, %v1297_v55  ;;  %v5783_v16 = vrot.slane %v5242_v61, 2  ;;  %v6019_v44 = vld [vmem:[#allocation97_spill] sm:$0xff]  ;;  %v6023_v43 = vld [vmem:[#allocation108_spill] sm:$0xff] }
 0x3d2   : > { %v1607_v40 = vadd.f32 %v6017_v37, %v1515_v46  ;;  %v6021_v46 = vld [vmem:[#allocation51_spill] sm:$0xff]  ;;  %v2092_v36 = vmul.f32 %v5249_v38, %v5028_v51 }
 0x3d3   : > { %v1204_v15 = vadd.f32 %v6018_v26, %v1112_v45  ;;  %v5784_v7 = vrot.slane %v5252_v25, 2  ;;  %v1473_v39 = vadd.f32 %v6019_v44, %v1381_v52  ;;  %v6022_v42 = vrot.slane %v6021_v46, 2  ;;  %v6025_v52 = vld [vmem:[#allocation91_spill] sm:$0xff]  ;;  %v6027_v46 = vld [vmem:[#allocation106_spill] sm:$0xff] }
 0x3d4   : > { %2419 = vrot.lane.b32.xlu0 %v2416_v12, %s3225_s7  ;;  %v6020_v12 = vld [vmem:[#allocation32_spill] sm:$0xff]  ;;  %v2418_v45 = vsel %vm553_vm1, %v2415_v21, %v5783_v16  ;;  %v2476_v44 = vmul.f32 %v5165_v30, %v2475_v1  ;;  %v6029_v16 = vld [vmem:[#allocation98_spill] sm:$0xff] }
 0x3d5   : > { %2395 = vrot.lane.b32.xlu2 %v2392_v27, %s3225_s7  ;;  %2278 = vrot.lane.b32.xlu1 %v2274_v28, %s3225_s7  ;;  %v1685_v55 = vadd.f32 %v6020_v12, %v1607_v40  ;;  %v2499_v27 = vstv %s2969_s30  ;;  %v2370_v28 = vsel %vm553_vm1, %v2368_v56, %v6022_v42  ;;  %v1565_v37 = vadd.f32 %v6023_v43, %v1473_v39 }
 0x3d6   : > { %v1854_v33 = vpop.permute.xlu0 %1853  ;;  %v1296_v40 = vadd.f32 %v6025_v52, %v1204_v15  ;;  %v2500_v56 = vmul.f32 %v4901_v11, %v2499_v27 }
 0x3d7   : > { %v1904_v35 = vpop.permute.xlu2 %1903  ;;  %v1810_v10 = vpop.permute.xlu1 %1809  ;;  %v1657_v42 = vadd.f32 %v6027_v46, %v1565_v37 }
 0x3d8   : > { %v5257_v19 = vadd.f32 %v1904_v35, %v1818_v13  ;;  %v2501_v13 = vmul.f32 %v4694_v5, %v2499_v27  ;;  %v6024_v35 = vld [vmem:[#allocation111_spill] sm:$0xff]  ;;  %v2394_v5 = vsel %vm553_vm1, %v2391_v17, %v5784_v7  ;;  %v2483_v17 = vrot.slane %v2477_v48, 4 }
 0x3d9   : > { %v1767_v29 = vadd.f32 %v6024_v35, %v1685_v55  ;;  %v6026_v55 = vld [vmem:[#allocation74_spill] sm:$0xff]  ;;  %v2506_v52 = vrot.slane %v2500_v56, 4 }
 0x3da   : > { %v2507_v12 = vrot.slane %v2501_v13, 4  ;;  %v2342_v15 = vmul.f32 %v5165_v30, %v6026_v55  ;;  %v6030_v13 = vld [vmem:[#allocation34_spill] sm:$0xff] }
 0x3db   : > { %v1859_v26 = vadd.f32 %v1854_v33, %v1767_v29  ;;  %v6028_v29 = vld [vmem:[#allocation65_spill] sm:$0xff]  ;;  %v1725_v24 = vadd.f32 %v6030_v13, %v1657_v42 }
 0x3dc   : > { %2373 = vrot.lane.b32.xlu0 %v2370_v28, %s3225_s7  ;;  %v1380_v33 = vadd.f32 %v6028_v29, %v1296_v40  ;;  %v2348_v47 = vrot.slane %v2342_v15, 2  ;;  %v2508_v55 = vsel %vm626_vm15, %v2506_v52, %v2507_v12  ;;  %v5305_v40 = vmul.f32 %v5249_v38, %v2475_v1 }
 0x3dd   : > { %2421 = vrot.lane.b32.xlu2 %v2418_v45, %s3225_s7  ;;  %2397 = vrot.lane.b32.xlu1 %v2394_v5, %s3225_s7  ;;  %v2482_v5 = vrot.slane %v2476_v44, 4  ;;  %v1817_v56 = vadd.f32 %v1810_v10, %v1725_v24  ;;  %v6033_v44 = vld [vmem:[#allocation52_spill] sm:$0xff] }
 0x3de   : > { %v1878_v21 = vpop.permute.xlu0 %1877  ;;  %v1472_v7 = vadd.f32 %v6029_v16, %v1380_v33  ;;  %v2485_v24 = vrot.slane %v5305_v40, 4 }
 0x3df   : > { %v1946_v39 = vpop.permute.xlu2 %1945  ;;  %v1885_v28 = vadd.f32 %v1878_v21, %v1793_v41  ;;  %v1836_v35 = vpop.permute.xlu1 %1835  ;;  %v2484_v37 = vsel %vm626_vm15, %v2482_v5, %v2483_v17  ;;  %v5294_v41 = vld [vmem:[#allocation3 + $0x10] sm:$0x3f]  ;;  %v2454_v21 = vmul.f32 %v4901_v11, %v6033_v44  ;;  %v6036_v5 = vld [vmem:[#allocation55_spill] sm:$0xff] }
 0x3e0   : > { %v5286_v43 = vadd.f32 %v1946_v39, %v1859_v26  ;;  %v1840_v45 = vadd.f32 %v1836_v35, %v5176_v49  ;;  %v5297_v26 = vmul.f32 %v5294_v41, %v2499_v27  ;;  %v6031_v49 = vld [vmem:[#allocation76_spill] sm:$0xff]  ;;  %v6034_v27 = vld [vmem:[#allocation99_spill] sm:$0xff]  ;;  %v6037_v13 = vrot.slane %v6036_v5, 4 }
 0x3e1   : > { %v6032_v48 = vrot.slane %v6031_v49, 2  ;;  %v1564_v39 = vadd.f32 %v6034_v27, %v1472_v7  ;;  %v2460_v10 = vrot.slane %v2454_v21, 4 }
 0x3e2   : > { %v2509_v33 = vrot.slane %v5297_v26, 4 }
 0x3e3   : > { %v2350_v16 = vsel %vm553_vm1, %v2348_v47, %v6032_v48  ;;  %v6035_v47 = vld [vmem:[#allocation110_spill] sm:$0xff] }
 0x3e4   : > { %2511 = vrot.lane.b32.xlu0 %v2508_v55, %s3225_s7  ;;  %v1656_v52 = vadd.f32 %v6035_v47, %v1564_v39  ;;  %v2462_v55 = vsel %vm626_vm15, %v2460_v10, %v6037_v13  ;;  %v2510_v7 = vsel %vm626_vm15, %v2507_v12, %v2509_v33  ;;  %v6039_v12 = vld [vmem:[#allocation75_spill] sm:$0xff]  ;;  %v5347_v13 = vstv %s2971_s8 }
 0x3e5   : > { %2487 = vrot.lane.b32.xlu2 %v2484_v37, %s3225_s7  ;;  %2353 = vrot.lane.b32.xlu1 %v2350_v16, %s3225_s7  ;;  %v6038_v37 = vld [vmem:[#allocation38_spill] sm:$0xff]  ;;  %v2526_v16 = vmul.f32 %v5165_v30, %v6039_v12  ;;  %v2546_v34 = vmul.f32 %v4901_v11, %v5347_v13 }
 0x3e6   : > { %v1902_v15 = vpop.permute.xlu0 %1901  ;;  %v1724_v49 = vadd.f32 %v6038_v37, %v1656_v52  ;;  %v6040_v52 = vld [vmem:[#allocation77_spill] sm:$0xff] }
 0x3e7   : > { %v1966_v46 = vpop.permute.xlu2 %1965  ;;  %v1909_v42 = vadd.f32 %v1902_v15, %v1817_v56  ;;  %v1876_v29 = vpop.permute.xlu1 %1875  ;;  %v6041_v10 = vrot.slane %v6040_v52, 6 }
 0x3e8   : > { %v5311_v35 = vadd.f32 %v1966_v46, %v1885_v28  ;;  %v1884_v1 = vadd.f32 %v1876_v29, %v5218_v0  ;;  %v5323_v28 = vstv %s2966_s26  ;;  %v2486_v0 = vsel %vm626_vm15, %v2483_v17, %v2485_v24 }
 0x3e9   : > { %v5333_v48 = vmul.f32 %v5205_v3, %v5323_v28  ;;  %v1816_v56 = vadd.f32 %v5097_v6, %v1724_v49  ;;  %v2434_v27 = vmul.f32 %v5165_v30, %v5323_v28  ;;  %v2532_v29 = vrot.slane %v2526_v16, 6  ;;  %v5356_v30 = vld [vmem:[#allocation3 + $0x8] sm:$0xff] }
 0x3ea   : > { %v2552_v16 = vrot.slane %v2546_v34, 6 }
 0x3eb   : > { %v2441_v46 = vrot.slane %v5333_v48, 4  ;;  %v2440_v47 = vrot.slane %v2434_v27, 4  ;;  %v2534_v5 = vsel %vm699_vm2, %v2532_v29, %v6041_v10 }
 0x3ec   : > { %2465 = vrot.lane.b32.xlu0 %v2462_v55, %s3225_s7 }
 0x3ed   : > { %2513 = vrot.lane.b32.xlu2 %v2510_v7, %s3225_s7  ;;  %2489 = vrot.lane.b32.xlu1 %v2486_v0, %s3225_s7  ;;  %v2442_v6 = vsel %vm626_vm15, %v2440_v47, %v2441_v46 }
 0x3ee   : > { %v1928_v44 = vpop.permute.xlu0 %1927 }
 0x3ef   : > { %v2052_v21 = vpop.permute.xlu2 %2051  ;;  %v5341_v39 = vadd.f32 %v1928_v44, %v1840_v45  ;;  %v1900_v15 = vpop.permute.xlu1 %1899  ;;  %v5360_v45 = vmul.f32 %v5356_v30, %v5347_v13 }
 0x3f0   : > { %v1908_v17 = vadd.f32 %v1900_v15, %v1816_v56  ;;  %v2000_v56 = vmul.f32 %v5249_v38, %v4931_v2 }
 0x3f1   : > { %v2553_v0 = vrot.slane %v5360_v45, 6 }
 0x3f2   : > { %v2007_v27 = vrot.slane %v2000_v56, 1  ;;  %v6051_v56 = vrot.slane %v5252_v25, 2 }
 0x3f3   : > { %v2554_v11 = vsel %vm699_vm2, %v2552_v16, %v2553_v0 }
 0x3f4   : > { %1967 = vrot.lane.b32.xlu0 %v1961_v4, %s3224_s22  ;;  %v2008_v53 = vsel %vm777_vm0, %v2005_v8, %v2007_v27  ;;  %v6044_v8 = vrot.slane %v4962_v20, 3  ;;  %v6047_v20 = vrot.slane %v5037_v18, 3  ;;  %v6049_v18 = vrot.slane %v5078_v57, 5 }
 0x3f5   : > { %2537 = vrot.lane.b32.xlu2 %v2534_v5, %s3225_s7  ;;  %2445 = vrot.lane.b32.xlu1 %v2442_v6, %s3225_s7  ;;  %v2099_v5 = vrot.slane %v2092_v36, 3  ;;  %v6046_v6 = vld [vmem:[#allocation78_spill] sm:$0xff] }
 0x3f6   : > { %v1964_v55 = vpop.permute.xlu0 %1963 }
 0x3f7   : > { %v2078_v7 = vpop.permute.xlu2 %2077  ;;  %v1972_v4 = vadd.f32 %v1964_v55, %v1884_v1  ;;  %v1926_v37 = vpop.permute.xlu1 %1925  ;;  %v2100_v51 = vsel %vm870_vm13, %v6047_v20, %v2099_v5 }
 0x3f8   : > { %v1931_v49 = vadd.f32 %v1926_v37, %v5147_v58 }
 0x3f9   : > { %v2060_v12 = vadd.f32 %v2052_v21, %v1972_v4 }
 0x3fc   : > { %2079 = vrot.lane.b32.xlu0 %v2073_v32, %s3224_s22 }
 0x3fd   : > { %1987 = vrot.lane.b32.xlu2 %v1981_v22, %s3224_s22  ;;  %2557 = vrot.lane.b32.xlu1 %v2554_v11, %s3225_s7  ;;  %v6042_v22 = vrot.slane %v4906_v62, 1  ;;  %v6045_v62 = vld [vmem:[#allocation57_spill] sm:$0xff] }
 0x3fe   : > { %v1986_v58 = vpop.permute.xlu0 %1985 }
 0x3ff   : > { %v2144_v1 = vpop.permute.xlu2 %2143  ;;  %v1993_v44 = vadd.f32 %v1986_v58, %v1909_v42  ;;  %v1948_v2 = vpop.permute.xlu1 %1947 }
 0x400   : > { %v5379_v21 = vadd.f32 %v2144_v1, %v2060_v12  ;;  %v5382_v63 = vadd.f32 %v1948_v2, %v5187_v54  ;;  %v6052_v1 = vstv %s5144_s11  ;;  %v6053_v2 = vld [vmem:[#allocation59_spill] sm:$0xff]  ;;  %s2980_s11 = sshll.u32 %s3280_s19, 5  ;;  %s2762_s19 = scalar_lea.sflag [#allocation7], %s3356_s14 }
 0x401   : > { %v5384_v32 = vadd.f32 %v2078_v7, %v1993_v44  ;;  %v2288_v44 = vmul.f32 %v5356_v30, %v6052_v1  ;;  %v2548_v30 = vmul.f32 %v5294_v41, %v5347_v13  ;;  %v6057_v13 = vld [vmem:[#allocation82_spill] sm:$0xff] }
 0x404   : > { %2147 = vrot.lane.b32.xlu0 %v2141_v23, %s3224_s22 }
 0x405   : > { %2011 = vrot.lane.b32.xlu2 %v2008_v53, %s3224_s22  ;;  %2055 = vrot.lane.b32.xlu1 %v6042_v22, %s3224_s22 }
 0x406   : > { %v2076_v42 = vpop.permute.xlu0 %2075 }
 0x407   : > { %v1984_v15 = vpop.permute.xlu1 %1983  ;;  %v5398_v47 = vpop.permute.xlu2 %2169 }
 0x408   : > { %v1992_v54 = vadd.f32 %v1984_v15, %v1908_v17  ;;  %v2555_v15 = vrot.slane %v2548_v30, 6 }
 0x40a   : > { %v5396_v29 = vadd.f32 %v2076_v42, %v1992_v54  ;;  %v2556_v48 = vsel %vm699_vm2, %v2553_v0, %v2555_v15 }
 0x40c   : > { %2123 = vrot.lane.b32.xlu0 %v6043_v31, %s3224_s22 }
 0x40d   : > { %2171 = vrot.lane.b32.xlu2 %v6044_v8, %s3224_s22  ;;  %2031 = vrot.lane.b32.xlu1 %v6045_v62, %s3224_s22 }
 0x40e   : > { %v2030_v23 = vpop.permute.xlu0 %2029 }
 0x40f   : > { %v5410_v17 = vadd.f32 %v2030_v23, %v5286_v43  ;;  %v2054_v52 = vpop.permute.xlu1 %2053  ;;  %v2236_v43 = vpop.permute.xlu2 %2235 }
 0x410   : > { %v2061_v10 = vadd.f32 %v2054_v52, %v5311_v35  ;;  %v2323_v35 = vmul.f32 %v5294_v41, %v5140_v9  ;;  %v2304_v9 = vmul.f32 %v5249_v38, %v5150_v59  ;;  %v6054_v59 = vrot.slane %v5242_v61, 2  ;;  %v6055_v61 = vld [vmem:[#allocation81_spill] sm:$0xff]  ;;  %v6056_v41 = vld [vmem:[#allocation60_spill] sm:$0xff] }
 0x411   : > { %v2244_v62 = vadd.f32 %v2236_v43, %v5379_v21 }
 0x414   : > { %2195 = vrot.lane.b32.xlu0 %v6046_v6, %s3224_s22 }
 0x415   : > { %2239 = vrot.lane.b32.xlu2 %v2233_v60, %s3224_s22  ;;  %2103 = vrot.lane.b32.xlu1 %v2100_v51, %s3224_s22 }
 0x416   : > { %v2168_v55 = vpop.permute.xlu0 %2167 }
 0x417   : > { %v2010_v7 = vpop.permute.xlu1 %2009  ;;  %v2262_v37 = vpop.permute.xlu2 %2261  ;;  %v2176_v0 = vadd.f32 %v2168_v55, %v5396_v29 }
 0x418   : > { %v5422_v34 = vadd.f32 %v2010_v7, %v1931_v49  ;;  %v6050_v49 = vstv %s5191_s20  ;;  %s231_s20 = scalar_lea.vmem [#allocation10], %s2870_s3 }
 0x419   : > { %v2275_v16 = vmul.f32 %v5205_v3, %v6050_v49  ;;  %v2436_v3 = vmul.f32 %v5249_v38, %v5323_v28  ;;  %s2774_s30 = sshll.u32 %s231_s20, 4  ;;  %s2775_s30 = int_to_ptr.vmem [resolvable:$true] %s2774_s30 }
 0x41b   : > { %v2443_v53 = vrot.slane %v2436_v3, 4 }
 0x41c   : > { %2331 = vrot.lane.b32.xlu0 %v2323_v35, %s3225_s7  ;;  %v2177_v35 = vadd.f32 %v5398_v47, %v5384_v32 }
 0x41d   : > { %2215 = vrot.lane.b32.xlu2 %v6048_v14, %s3224_s22  ;;  %2263 = vrot.lane.b32.xlu1 %v6049_v18, %s3224_s22  ;;  %v2444_v22 = vsel %vm626_vm15, %v2441_v46, %v2443_v53  ;;  %s3226_s22 = smov 16  }
 0x41e   : > { %v5432_v60 = vpop.permute.xlu0 %2121  ;;  %v2269_v18 = vadd.f32 %v2262_v37, %v2177_v35 }
 0x41f   : > { %v2146_v4 = vpop.permute.xlu1 %2145  ;;  %v2309_v58 = vpop.permute.xlu2 %2308 }
 0x420   : > { %v2153_v12 = vadd.f32 %v2146_v4, %v2061_v10  ;;  %v2317_v10 = vadd.f32 %v2309_v58, %v2244_v62 }
 0x424   : > { %2399 = vrot.lane.b32.xlu0 %v6051_v56, %s3225_s7 }
 0x425   : > { %2280 = vrot.lane.b32.xlu2 %v2275_v16, %s3225_s7  ;;  %2312 = vrot.lane.b32.xlu1 %v2304_v9, %s3225_s7 }
 0x426   : > { %v2260_v57 = vpop.permute.xlu0 %2259 }
 0x427   : > { %v2102_v11 = vpop.permute.xlu1 %2101  ;;  %v2330_v38 = vpop.permute.xlu2 %2329  ;;  %v2268_v23 = vadd.f32 %v2260_v57, %v2176_v0 }
 0x428   : > { %v2337_v29 = vadd.f32 %v2330_v38, %v2269_v18  ;;  %v2107_v58 = vadd.f32 %v2102_v11, %v5422_v34 }
 0x42c   : > { %2375 = vrot.lane.b32.xlu0 %v6053_v2, %s3225_s7 }
 0x42d   : > { %2423 = vrot.lane.b32.xlu2 %v6054_v59, %s3225_s7  ;;  %2293 = vrot.lane.b32.xlu1 %v2288_v44, %s3225_s7  ;;  %v2127_v44 = vadd.f32 %v5432_v60, %v5410_v17 }
 0x42e   : > { %v2214_v25 = vpop.permute.xlu0 %2213 }
 0x42f   : > { %v2238_v27 = vpop.permute.xlu1 %2237  ;;  %v2396_v40 = vpop.permute.xlu2 %2395 }
 0x430   : > { %v2245_v4 = vadd.f32 %v2238_v27, %v2153_v12  ;;  %v2219_v12 = vadd.f32 %v2214_v25, %v2127_v44 }
 0x434   : > { %2447 = vrot.lane.b32.xlu0 %v2444_v22, %s3225_s7 }
 0x435   : > { %2491 = vrot.lane.b32.xlu2 %v2485_v24, %s3225_s7  ;;  %2355 = vrot.lane.b32.xlu1 %v6055_v61, %s3225_s7 }
 0x436   : > { %v2328_v28 = vpop.permute.xlu0 %2327 }
 0x437   : > { %v2194_v42 = vpop.permute.xlu1 %2193  ;;  %v2422_v45 = vpop.permute.xlu2 %2421  ;;  %v2336_v26 = vadd.f32 %v2328_v28, %v2268_v23 }
 0x438   : > { %v2429_v21 = vadd.f32 %v2422_v45, %v2337_v29  ;;  %v2199_v32 = vadd.f32 %v2194_v42, %v2107_v58 }
 0x43c   : > { %2559 = vrot.lane.b32.xlu0 %v2556_v48, %s3225_s7 }
 0x43d   : > { %2467 = vrot.lane.b32.xlu2 %v6056_v41, %s3225_s7  ;;  %2515 = vrot.lane.b32.xlu1 %v2509_v33, %s3225_s7  ;;  %v2404_v33 = vadd.f32 %v2396_v40, %v2317_v10 }
 0x43e   : > { %v2292_v24 = vpop.permute.xlu0 %2291 }
 0x43f   : > { %v2311_v46 = vpop.permute.xlu1 %2310  ;;  %v2488_v52 = vpop.permute.xlu2 %2487  ;;  %v2297_v2 = vadd.f32 %v2292_v24, %v2219_v12 }
 0x440   : > { %v2496_v20 = vadd.f32 %v2488_v52, %v2404_v33  ;;  %v2318_v55 = vadd.f32 %v2311_v46, %v2245_v4 }
 0x445   : > { %2539 = vrot.lane.b32.xlu1 %v6057_v13, %s3225_s7  ;;  %s2773_s7 = scalar_lea.hbm %s5698_s4, %s2980_s11 }
 0x446   : > { %v2420_v54 = vpop.permute.xlu0 %2419  ;;  %s2776_s29 = sshll.u32 %s2773_s7, 4  ;;  %s2777_s29 = int_to_ptr.hbm [resolvable:$true] %s2776_s29 }
 0x447   : > { %v2279_v31 = vpop.permute.xlu1 %2278  ;;  %v2428_v5 = vadd.f32 %v2420_v54, %v2336_v26  ;;  %v2514_v49 = vpop.permute.xlu2 %2513  ;;  %s3150_s26 = sshra.s32 %s2777_s29, 4  ;;  %s3151_s26 = int_to_ptr.hbm [resolvable:$true] %s3150_s26 }
 0x448   : > { %v2521_v9 = vadd.f32 %v2514_v49, %v2429_v21  ;;  %v2284_v3 = vadd.f32 %v2279_v31, %v2199_v32  ;;  %s3152_s3 = scalar_lea.hbm %s3151_s26, 32  ;;  %p3157_p0 = scmp.lt.s32.totalorder %s3151_s26, %s5698_s4 }
 0x449   : > { %p3153_p4 = scmp.ne.s32.totalorder %s3151_s26, %s3152_s3 }
 0x44b   : > { %p3154_p6 = pnand %p3153_p4, %p3311_p11 }
 0x44d   : > { %p3155_p13 = pneg %p3154_p6 }
 0x44e   : > { %v2374_v8 = vpop.permute.xlu0 %2373 }
 0x44f   : > { %v2398_v36 = vpop.permute.xlu1 %2397  ;;  %v2538_v47 = vpop.permute.xlu2 %2537  ;;  %v2379_v27 = vadd.f32 %v2374_v8, %v2297_v2 }
 0x450   : > { %v2405_v43 = vadd.f32 %v2398_v36, %v2318_v55 }
 0x456   : > { %v2512_v6 = vpop.permute.xlu0 %2511 }
 0x457   : > { %v2520_v51 = vadd.f32 %v2512_v6, %v2428_v5  ;;  %v2354_v7 = vpop.permute.xlu1 %2353  ;;  %v1988_v28 = vpop.permute.xlu2 %1987 }
 0x458   : > { %v2359_v59 = vadd.f32 %v2354_v7, %v2284_v3 }
 0x459   : > { %v2567_v14 = vadd.f32 %v2520_v51, %v2496_v20 }
 0x45b   : > { %v2573_v15 = vrot.slane %v2567_v14, 1 }
 0x45e   : > { %v2466_v1 = vpop.permute.xlu0 %2465 }
 0x45f   : > { %v2490_v16 = vpop.permute.xlu1 %2489  ;;  %v2471_v22 = vadd.f32 %v2466_v1, %v2379_v27  ;;  %v2012_v41 = vpop.permute.xlu2 %2011 }
 0x460   : > { %v2497_v56 = vadd.f32 %v2490_v16, %v2405_v43  ;;  %v1994_v16 = vadd.f32 %v1988_v28, %v5257_v19 }
 0x462   : > { %v5481_v57 = vadd.f32 %v2521_v9, %v2497_v56 }
 0x464   : > { %v2574_v38 = vrot.slane %v5481_v57, 1 }
 0x466   : > { %v1968_v30 = vpop.permute.xlu0 %1967  ;;  %v2575_v17 = vsel %vm777_vm0, %v2573_v15, %v2574_v38 }
 0x467   : > { %v2446_v37 = vpop.permute.xlu1 %2445  ;;  %v2172_v54 = vpop.permute.xlu2 %2171  ;;  %v1974_v21 = vadd.f32 %v1968_v30, %v5230_v50  ;;  %v2016_v50 = vadd.f32 %v2012_v41, %v5341_v39 }
 0x468   : > { %v2451_v53 = vadd.f32 %v2446_v37, %v2359_v59 }
 0x46a   : > { %v2543_v34 = vadd.f32 %v2538_v47, %v2451_v53 }
 0x46e   : > { %v2080_v42 = vpop.permute.xlu0 %2079 }
 0x46f   : > { %v2558_v61 = vpop.permute.xlu1 %2557  ;;  %v2240_v10 = vpop.permute.xlu2 %2239  ;;  %v2086_v58 = vadd.f32 %v2080_v42, %v1994_v16 }
 0x470   : > { %v2563_v11 = vadd.f32 %v2558_v61, %v2471_v22 }
 0x471   : > { %v2178_v37 = vadd.f32 %v2172_v54, %v2086_v58 }
 0x472   : > { %v2565_v48 = vadd.f32 %v2563_v11, %v2543_v34 }
 0x474   : > { %v2580_v60 = vadd.f32 %v2575_v17, %v2565_v48 }
 0x476   : > { %v2972_v25 = vmul.f32 -1.442695, %v2580_v60  ;;  %v2148_v46 = vpop.permute.xlu0 %2147 }
 0x477   : > { %v2056_v13 = vpop.permute.xlu1 %2055  ;;  %v2216_v7 = vpop.permute.xlu2 %2215 }
 0x478   : > { %3071 = vpow2.f32 %v2972_v25  ;;  %v2062_v9 = vadd.f32 %v2056_v13, %v1974_v21 }
 0x47a   : > { %v2154_v32 = vadd.f32 %v2148_v46, %v2062_v9 }
 0x47c   : > { %v2246_v2 = vadd.f32 %v2240_v10, %v2154_v32 }
 0x47e   : > { %v3072_v40 = vpop.eup %3071  ;;  %v2124_v0 = vpop.permute.xlu0 %2123 }
 0x47f   : > { %v2588_v24 = vadd.f32 1.0, %v3072_v40  ;;  %v2032_v62 = vpop.permute.xlu1 %2031  ;;  %v2281_v29 = vpop.permute.xlu2 %2280 }
 0x480   : > { %v2036_v47 = vadd.f32 %v2032_v62, %v5382_v63 }
 0x481   : > { %3073 = vrcp.f32 %v2588_v24  ;;  %v2601_v36 = vand.u32 2147483648, %v2588_v24  ;;  %v2599_v52 = vand.u32 2147483647, %v2588_v24  ;;  %vm2595_vm4 = vweird.f32 %v2588_v24 }
 0x482   : > { %v2128_v59 = vadd.f32 %v2124_v0, %v2036_v47 }
 0x483   : > { %v2602_v33 = vor.u32 1.1754944e-38, %v2601_v36  ;;  %vm2600_vm6 = vcmp.eq.f32.partialorder %v2599_v52, 8.507059e+37 }
 0x484   : > { %v2220_v34 = vadd.f32 %v2216_v7, %v2128_v59  ;;  %v2620_v7 = vlaneseq }
 0x486   : > { %v2196_v20 = vpop.permute.xlu0 %2195  ;;  %vm2622_vm8 = vcmp.lt.s32.totalorder %v2620_v7, 16  ;;  %vm5515_vm12 = vcmp.ge.s32.totalorder %v2620_v7, 16  ;;  %vm5520_vm13 = vcmp.lt.s32.totalorder %v2620_v7, 32  ;;  %vm5538_vm15 = vcmp.ge.s32.totalorder %v2620_v7, 32 }
 0x487   : > { %v3074_v31 = vpop.eup %3073  ;;  %v2104_v51 = vpop.permute.xlu1 %2103  ;;  %vm2634_vm14 = vmand %vm5515_vm12, %vm5520_vm13  ;;  %vm5557_vm2 = vcmp.ge.s32.totalorder %v2620_v7, 48  ;;  %vm2692_vm13 = vcmp.ge.s32.totalorder %v2620_v7, 112 }
 0x488   : > { %v2591_v45 = vmul.f32 %v3074_v31, %v2588_v24  ;;  %vm2596_vm3 = vweird.f32 %v3074_v31  ;;  %v2424_v1 = vpop.permute.xlu2 %2423  ;;  %v2108_v27 = vadd.f32 %v2104_v51, %v2016_v50 }
 0x489   : > { %vm2597_vm5 = vmor %vm2595_vm4, %vm2596_vm3  ;;  %vm5562_vm3 = vcmp.lt.s32.totalorder %v2620_v7, 64  ;;  %vm5567_vm4 = vcmp.ge.s32.totalorder %v2620_v7, 64 }
 0x48a   : > { %v2592_v8 = vsub.f32 1.0, %v2591_v45  ;;  %v2200_v28 = vadd.f32 %v2196_v20, %v2108_v27 }
 0x48c   : > { %v2593_v23 = vmul.f32 %v3074_v31, %v2592_v8  ;;  %v2285_v48 = vadd.f32 %v2281_v29, %v2200_v28 }
 0x48e   : > { %v2594_v26 = vadd.f32 %v3074_v31, %v2593_v23  ;;  %v2332_v14 = vpop.permute.xlu0 %2331 }
 0x48f   : > { %v2264_v18 = vpop.permute.xlu1 %2263 }
 0x490   : > { %v2598_v5 = vsel %vm2597_vm5, %v3074_v31, %v2594_v26  ;;  %v2270_v3 = vadd.f32 %v2264_v18, %v2178_v37  ;;  %v2492_v30 = vpop.permute.xlu2 %2491  ;;  %vm5572_vm5 = vcmp.lt.s32.totalorder %v2620_v7, 80 }
 0x491   : > { %v5490_v6 = vsel %vm2600_vm6, %v2602_v33, %v2598_v5  ;;  %vm2654_vm6 = vmand %vm5557_vm2, %vm5562_vm3 }
 0x492   : > { %2626 = vst [vmem:[#allocation1] sm:$0xff] %v5490_v6  ;;  %v2338_v22 = vadd.f32 %v2332_v14, %v2270_v3 }
 0x493   : > { %2624 = vst.msk [vmem:[#allocation4] sm:$0x1] %vm2622_vm8, %v5490_v6 }
 0x494   : > { %v2430_v15 = vadd.f32 %v2424_v1, %v2338_v22 }
 0x496   : > { %v2400_v55 = vpop.permute.xlu0 %2399 }
 0x497   : > { %v2313_v49 = vpop.permute.xlu1 %2312 }
 0x498   : > { %v2319_v53 = vadd.f32 %v2313_v49, %v2246_v2  ;;  %v2468_v40 = vpop.permute.xlu2 %2467 }
 0x499   : > { %v2628_v35 = vld [vmem:[#allocation1 + $0x1] ss:$9 sm:$0xff] }
 0x49a   : > { %2636 = vst [vmem:[#allocation1] sm:$0xff] %v5490_v6  ;;  %2629 = vrot.lane.b32.xlu2 %v2628_v35, %s3226_s22  ;;  %v2406_v63 = vadd.f32 %v2400_v55, %v2319_v53 }
 0x49c   : > { %v2498_v17 = vadd.f32 %v2492_v30, %v2406_v63 }
 0x49e   : > { %v2376_v44 = vpop.permute.xlu0 %2375 }
 0x49f   : > { %v2294_v56 = vpop.permute.xlu1 %2293 }
 0x4a0   : > { %v2298_v11 = vadd.f32 %v2294_v56, %v2220_v34 }
 0x4a1   : > { %v2638_v4 = vld [vmem:[#allocation1 + $0x2] ss:$9 sm:$0xff] }
 0x4a2   : > { %2646 = vst [vmem:[#allocation1] sm:$0xff] %v5490_v6  ;;  %2639 = vrot.lane.b32.xlu0 %v2638_v4, %s3227_s5  ;;  %v2380_v25 = vadd.f32 %v2376_v44, %v2298_v11 }
 0x4a4   : > { %v2472_v46 = vadd.f32 %v2468_v40, %v2380_v25  ;;  %v6083_v40 = vld [vmem:[#allocation14_spill] sm:$0xff] }
 0x4a6   : > { %v2448_v61 = vpop.permute.xlu0 %2447 }
 0x4a7   : > { %v2356_v19 = vpop.permute.xlu1 %2355 }
 0x4a8   : > { %v2360_v42 = vadd.f32 %v2356_v19, %v2285_v48 }
 0x4a9   : > { %v2648_v43 = vld [vmem:[#allocation1 + $0x3] ss:$9 sm:$0xff] }
 0x4aa   : > { %2649 = vrot.lane.b32.xlu1 %v2648_v43, %s3228_s13  ;;  %2656 = vst [vmem:[#allocation1] sm:$0xff] %v5490_v6  ;;  %v2452_v13 = vadd.f32 %v2448_v61, %v2360_v42 }
 0x4ae   : > { %v2560_v24 = vpop.permute.xlu0 %2559 }
 0x4af   : > { %v2516_v39 = vpop.permute.xlu1 %2515  ;;  %v2564_v45 = vadd.f32 %v2560_v24, %v2472_v46  ;;  %v6084_v46 = vld [vmem:[#allocation17_spill] sm:$0xff] }
 0x4b0   : > { %v2522_v60 = vadd.f32 %v2516_v39, %v2430_v15 }
 0x4b1   : > { %v2658_v12 = vld [vmem:[#allocation1 + $0x4] ss:$9 sm:$0xff] }
 0x4b2   : > { %2659 = vrot.lane.b32.xlu2 %v2658_v12, %s3229_s25  ;;  %2666 = vst [vmem:[#allocation1] sm:$0xff] %v5490_v6  ;;  %v2569_v41 = vadd.f32 %v2522_v60, %v2498_v17 }
 0x4b4   : > { %v2576_v54 = vrot.slane %v2569_v41, 1 }
 0x4b6   : > { %v2577_v62 = vsel %vm777_vm0, %v2574_v38, %v2576_v54  ;;  %vm5543_vm0 = vcmp.lt.s32.totalorder %v2620_v7, 48  ;;  %v6085_v54 = vld [vmem:[#allocation15_spill] sm:$0xff] }
 0x4b7   : > { %v2540_v31 = vpop.permute.xlu1 %2539  ;;  %vm2644_vm1 = vmand %vm5538_vm15, %vm5543_vm0 }
 0x4b8   : > { %v2544_v8 = vadd.f32 %v2540_v31, %v2452_v13 }
 0x4b9   : > { %v2668_v0 = vld [vmem:[#allocation1 + $0x5] ss:$9 sm:$0xff] }
 0x4ba   : > { %v2566_v36 = vadd.f32 %v2564_v45, %v2544_v8  ;;  %2669 = vrot.lane.b32.xlu0 %v2668_v0, %s3230_s6  ;;  %2676 = vst [vmem:[#allocation1] sm:$0xff] %v5490_v6  ;;  %v6086_v45 = vld [vmem:[#allocation16_spill] sm:$0xff] }
 0x4bc   : > { %v2581_v23 = vadd.f32 %v2577_v62, %v2566_v36 }
 0x4be   : > { %v2973_v52 = vmul.f32 -1.442695, %v2581_v23 }
 0x4c0   : > { %3075 = vpow2.f32 %v2973_v52 }
 0x4c1   : > { %v2678_v10 = vld [vmem:[#allocation1 + $0x6] ss:$9 sm:$0xff] }
 0x4c2   : > { %2686 = vst [vmem:[#allocation1] sm:$0xff] %v5490_v6 }
 0x4c6   : > { %v3076_v26 = vpop.eup %3075 }
 0x4c7   : > { %v2589_v33 = vadd.f32 1.0, %v3076_v26 }
 0x4c9   : > { %3077 = vrcp.f32 %v2589_v33  ;;  %v2616_v35 = vand.u32 2147483648, %v2589_v33  ;;  %v2614_v18 = vand.u32 2147483647, %v2589_v33  ;;  %vm2610_vm9 = vweird.f32 %v2589_v33  ;;  %v2688_v55 = vld [vmem:[#allocation1 + $0x7] ss:$9 sm:$0xff] }
 0x4cb   : > { %v2617_v38 = vor.u32 1.1754944e-38, %v2616_v35  ;;  %vm2615_vm11 = vcmp.eq.f32.partialorder %v2614_v18, 8.507059e+37 }
 0x4cf   : > { %v3078_v5 = vpop.eup %3077 }
 0x4d0   : > { %v2606_v20 = vmul.f32 %v3078_v5, %v2589_v33  ;;  %vm2611_vm7 = vweird.f32 %v3078_v5 }
 0x4d1   : > { %vm2612_vm10 = vmor %vm2610_vm9, %vm2611_vm7  ;;  %vm5600_vm9 = vcmp.lt.s32.totalorder %v2620_v7, 96 }
 0x4d2   : > { %v2607_v51 = vsub.f32 1.0, %v2606_v20  ;;  %vm2664_vm7 = vmand %vm5567_vm4, %vm5572_vm5 }
 0x4d4   : > { %v2608_v14 = vmul.f32 %v3078_v5, %v2607_v51 }
 0x4d6   : > { %v2609_v57 = vadd.f32 %v3078_v5, %v2608_v14 }
 0x4d8   : > { %v2613_v4 = vsel %vm2612_vm10, %v3078_v5, %v2609_v57 }
 0x4d9   : > { %v2618_v29 = vsel %vm2615_vm11, %v2617_v38, %v2613_v4  ;;  %vm5624_vm11 = vcmp.ge.s32.totalorder %v2620_v7, 96 }
 0x4da   : > { %2698 = vst [vmem:[#allocation1] sm:$0xff] %v2618_v29 }
 0x4db   : > { %2696 = vst.msk [vmem:[#allocation4 + $0x1] sm:$0x1] %vm2622_vm8, %v2618_v29  ;;  %vm5595_vm8 = vcmp.ge.s32.totalorder %v2620_v7, 80 }
 0x4dc   : > { %vm5787_vm10 = vmand %vm5595_vm8, %vm5600_vm9 }
 0x4dd   : > { %vm6082_vm0 = vmand %vm5595_vm8, %vm5600_vm9 }
 0x4e1   : > { %v2700_v49 = vld [vmem:[#allocation1 + $0x1] ss:$9 sm:$0xff] }
 0x4e2   : > { %2701 = vrot.lane.b32.xlu1 %v2700_v49, %s3226_s22  ;;  %2705 = vst [vmem:[#allocation1] sm:$0xff] %v2618_v29 }
 0x4e9   : > { %v2707_v16 = vld [vmem:[#allocation1 + $0x2] ss:$9 sm:$0xff] }
 0x4ea   : > { %2679 = vrot.lane.b32.xlu1 %v2678_v10, %s3231_s23  ;;  %2708 = vrot.lane.b32.xlu2 %v2707_v16, %s3227_s5  ;;  %2712 = vst [vmem:[#allocation1] sm:$0xff] %v2618_v29 }
 0x4f1   : > { %v2714_v9 = vld [vmem:[#allocation1 + $0x3] ss:$9 sm:$0xff] }
 0x4f2   : > { %2715 = vrot.lane.b32.xlu0 %v2714_v9, %s3228_s13  ;;  %2719 = vst [vmem:[#allocation1] sm:$0xff] %v2618_v29  ;;  %s3156_s13 = scalar_lea.hbm %s5698_s4, 64 }
 0x4f3   : > { %p3158_p3 = scmp.lt.s32.totalorder %s3156_s13, %s3152_s3 }
 0x4f4   : > { %v2630_v43 = vpop.permute.xlu2 %2629 }
 0x4f5   : > { %2635 = vst.msk [vmem:[#allocation4] sm:$0x1] %vm2634_vm14, %v2630_v43  ;;  %p3159_p5 = por %p3158_p3, %p3157_p0 }
 0x4f7   : > { %p3160_p8 = pnand %p3159_p5, %p3155_p13 }
 0x4f9   : > { %v2721_v56 = vld [vmem:[#allocation1 + $0x4] ss:$9 sm:$0xff] }
 0x4fa   : > { %2722 = vrot.lane.b32.xlu1 %v2721_v56, %s3229_s25  ;;  %2726 = vst [vmem:[#allocation1] sm:$0xff] %v2618_v29 }
 0x501   : > { %v2728_v58 = vld [vmem:[#allocation1 + $0x5] ss:$9 sm:$0xff] }
 0x502   : > { %2729 = vrot.lane.b32.xlu2 %v2728_v58, %s3230_s6  ;;  %2733 = vst [vmem:[#allocation1] sm:$0xff] %v2618_v29 }
 0x509   : > { %v2735_v47 = vld [vmem:[#allocation1 + $0x6] ss:$9 sm:$0xff] }
 0x50a   : > { %2689 = vrot.lane.b32.xlu2 %v2688_v55, %s3232_s10  ;;  %2736 = vrot.lane.b32.xlu0 %v2735_v47, %s3231_s23  ;;  %2740 = vst [vmem:[#allocation1] sm:$0xff] %v2618_v29 }
 0x50c   : > { %v2660_v19 = vpop.permute.xlu2 %2659 }
 0x511   : > { %v2742_v59 = vld [vmem:[#allocation1 + $0x7] ss:$9 sm:$0xff] }
 0x512   : > { %2743 = vrot.lane.b32.xlu1 %v2742_v59, %s3232_s10 }
 0x514   : > { %v2640_v32 = vpop.permute.xlu0 %2639 }
 0x515   : > { %2645 = vst.msk [vmem:[#allocation4] sm:$0x1] %vm2644_vm1, %v2640_v32 }
 0x51c   : > { %v2650_v2 = vpop.permute.xlu1 %2649 }
 0x51d   : > { %2655 = vst.msk [vmem:[#allocation4] sm:$0x1] %vm2654_vm6, %v2650_v2 }
 0x51e   : > { %2665 = vst.msk [vmem:[#allocation4] sm:$0x1] %vm2664_vm7, %v2660_v19 }
 0x52c   : > { %v2670_v22 = vpop.permute.xlu0 %2669 }
 0x52d   : > { %2675 = vst.msk [vmem:[#allocation4] sm:$0x1] %vm5787_vm10, %v2670_v22  ;;  %vm5629_vm10 = vcmp.lt.s32.totalorder %v2620_v7, 112 }
 0x52e   : > { %vm2684_vm12 = vmand %vm5624_vm11, %vm5629_vm10 }
 0x544   : > { %v2709_v30 = vpop.permute.xlu2 %2708 }
 0x554   : > { %v2702_v61 = vpop.permute.xlu1 %2701 }
 0x555   : > { %2704 = vst.msk [vmem:[#allocation4 + $0x1] sm:$0x1] %vm2634_vm14, %v2702_v61  ;;  %vm2693_vm14 = vcmp.lt.s32.totalorder %v2620_v7, 128 }
 0x556   : > { %2711 = vst.msk [vmem:[#allocation4 + $0x1] sm:$0x1] %vm2644_vm1, %v2709_v30  ;;  %vm2694_vm15 = vmand %vm2692_vm13, %vm2693_vm14 }
 0x55c   : > { %v2680_v34 = vpop.permute.xlu1 %2679  ;;  %v2730_v11 = vpop.permute.xlu2 %2729 }
 0x55d   : > { %2685 = vst.msk [vmem:[#allocation4] sm:$0x1] %vm2684_vm12, %v2680_v34 }
 0x564   : > { %v2716_v15 = vpop.permute.xlu0 %2715  ;;  %v2690_v39 = vpop.permute.xlu2 %2689 }
 0x565   : > { %2718 = vst.msk [vmem:[#allocation4 + $0x1] sm:$0x1] %vm2654_vm6, %v2716_v15 }
 0x566   : > { %2695 = vst.msk [vmem:[#allocation4] sm:$0x1] %vm2694_vm15, %v2690_v39 }
 0x56c   : > { %v2723_v48 = vpop.permute.xlu1 %2722 }
 0x56d   : > { %2725 = vst.msk [vmem:[#allocation4 + $0x1] sm:$0x1] %vm2664_vm7, %v2723_v48 }
 0x56e   : > { %2732 = vst.msk [vmem:[#allocation4 + $0x1] sm:$0x1] %vm6082_vm0, %v2730_v11 }
 0x57c   : > { %v2737_v17 = vpop.permute.xlu0 %2736 }
 0x57d   : > { %2739 = vst.msk [vmem:[#allocation4 + $0x1] sm:$0x1] %vm2684_vm12, %v2737_v17 }
 0x584   : > { %v2744_v60 = vpop.permute.xlu1 %2743 }
 0x585   : > { %2746 = vst.msk [vmem:[#allocation4 + $0x1] sm:$0x1] %vm2694_vm15, %v2744_v60 }
 0x58c   : > { %v2747_v25 = vld [vmem:[#allocation4] sm:$0x3] }
 0x58d   : > { %v2749_v42 = vperm.slane %v2747_v25, 0  ;;  %v2750_v41 = vperm.slane %v2747_v25, 1 }
 0x58f   : > { %v2753_v24 = vmul.f32 %v2749_v42, %v6083_v40  ;;  %v2754_v13 = vmul.f32 %v2750_v41, %v6084_v46  ;;  %v2755_v31 = vmul.f32 %v2749_v42, %v6085_v54  ;;  %v2756_v8 = vmul.f32 %v2750_v41, %v6086_v45 }
 0x591   : > { %2757 = vst [vmem:[%s231_s20] sm:$0xff] %v2753_v24 }
 0x592   : > { %2758 = vst [vmem:[%s231_s20 + $0x8] sm:$0xff] %v2754_v13 }
 0x593   : > { %2759 = vst [vmem:[%s231_s20 + $0x10] sm:$0xff] %v2755_v31 }
 0x594   : > { %2760 = vst [vmem:[%s231_s20 + $0x18] sm:$0xff] %v2756_v8 }
 0x595   : > { %3163 = shalt.err (!%p3160_p8)
}
 0x596   : > { %s3233_s14 = smov 256  }
 0x597   : > { %2987 = dma.vmem_to_hbm [thread:$0]  (%p3311_p11), %s2775_s30, 512, %s2777_s29, %s2762_s19, %s3233_s14, %s3233_s14, %s3226_s22  }
 0x598 PF: > { %s2791_s23 = sand.u32 1, %s3194_s15   ;;  %p6087_p9 = scmp.ge.s32.totalorder %s3206_s18, 2 }
 0x599   : > { %s2792_s10 = scalar_lea.sflag [#allocation7], %s2791_s23 }
 0x59a   : > { %p2998_p10 = pnand %p6087_p9, %p3315_p12 }
 0x59c   : > { %p2999_p1 = pneg %p2998_p10 }
 0x59e   : > { %3189 = dma.done.wait (%p2999_p1), %s2792_s10, 512  }
 0x59f   : > { %3191 = vsyncadd (%p2999_p1), %s2792_s10, 4294966784  ;;  %p18_p2 = scmp.ge.s32.totalorder %s3284_s21, 4   ;;  %s6088_s15 = smov %s3198_s16 }
 0x5a0   : > { %s6089_s16 = smov %s3202_s17  ;;  %s6090_s17 = smov %s3296_s24 }
 0x5a1   : > { %s6091_s18 = smov %s3284_s21  ;;  %20 = sbr.rel (!%p18_p2) target bundleno = 8 (0x8), region = 100 }
 0x5a6   :  { %2798 = vsyncpa [#allocation6], 1 }
 0x5a7   :  { %2800 = vsyncpa [#allocation6 + $0x1], 1 }
 0x5a8   :  { %2801 = vsyncpa [#allocation7], 1 }
 0x5a9   :  { %2803 = vsyncpa [#allocation7 + $0x1], 1 }
 0x5aa   :  { %2804 = vsyncpa [#allocation8], 1 }
 0x5ab   :  { %2806 = vsyncpa [#allocation8 + $0x1], 1 }

</bundles_post_ra>
